<compile_context>
chip_gen: v5e
topology: v5e:2x2
jax: 0.10.0
libtpu: 0.0.40
codegen_flags: <defaults>
</compile_context>

<pallas_src>
import functools
import math

import numpy as np
import jax
import jax.numpy as jnp
from jax import lax
from jax.experimental import pallas as pl
from jax.experimental.pallas import tpu as pltpu


# ----------------------------- configuration -------------------------------
INPUT_DIM = 32
SLOT_SIZE = 32
BINDING_NUM_SLOTS = 2
REASONING_NUM_SLOTS = 2
NUM_SLOTS = BINDING_NUM_SLOTS + REASONING_NUM_SLOTS
N_KEYS = 128
TOP_K = 8
K_DIM = SLOT_SIZE // 2      # 16
V_DIM = SLOT_SIZE           # 32

BATCH = 2
SEQ = 8


# ------------------------- deterministic parameters ------------------------
def get_uniform_keys(n_keys, dim, seed):
    """Same init as the PyTorch module (nn.Linear-style uniform)."""
    rng = np.random.RandomState(seed)
    bound = 1 / math.sqrt(dim)
    return rng.uniform(-bound, bound, (n_keys, dim)).astype(np.float32)


def init_params():
    keys_np = np.stack(
        [get_uniform_keys(N_KEYS, K_DIM, seed=i) for i in range(NUM_SLOTS)], axis=0
    )  # (num_slots, n_keys, k_dim)
    binding_keys = jnp.asarray(keys_np[:BINDING_NUM_SLOTS])
    reasoning_keys = jnp.asarray(keys_np[BINDING_NUM_SLOTS:])

    root = jax.random.PRNGKey(0)
    k_bv, k_rv, k_wq, k_bq, k_wr, k_br = jax.random.split(root, 6)

    std = V_DIM ** (-0.5)
    binding_values = std * jax.random.normal(
        k_bv, (BINDING_NUM_SLOTS, N_KEYS, V_DIM), jnp.float32)
    reasoning_values = std * jax.random.normal(
        k_rv, (REASONING_NUM_SLOTS, N_KEYS, V_DIM), jnp.float32)

    bq_bound = 1 / math.sqrt(INPUT_DIM)
    wq = jax.random.uniform(k_wq, (INPUT_DIM, K_DIM), jnp.float32,
                            -bq_bound, bq_bound)     # stored transposed: x @ wq
    bq = jax.random.uniform(k_bq, (1, K_DIM), jnp.float32, -bq_bound, bq_bound)

    br_bound = 1 / math.sqrt(K_DIM)
    wr = jax.random.uniform(k_wr, (K_DIM, V_DIM), jnp.float32,
                            -br_bound, br_bound)     # stored transposed: q @ wr
    br = jax.random.uniform(k_br, (1, V_DIM), jnp.float32, -br_bound, br_bound)

    return dict(
        binding_keys=binding_keys, reasoning_keys=reasoning_keys,
        binding_values=binding_values, reasoning_values=reasoning_values,
        wq=wq, bq=bq, wr=wr, br=br,
    )


# --------------------- init-time kernel-constant folding -------------------
def _fold_constants(keys, values, wq, bq, wr, br):
    """Build the folded kernel constants for one flag (or the fused 'both').

    Returns:
      W_in : (input_dim, n_slots*n_keys + n_slots*v_dim)
             [ wq @ keys_n^T  |  tile(wq @ wr, n_slots) ]
      b_in : (1, same)        [ bq @ keys_n^T  |  tile(bq @ wr + br, n_slots) ]
      V_bd : (n_slots*n_keys, n_slots*v_dim)  block-diagonal value table.
    """
    n_slots, n_keys, k_dim = keys.shape
    v_dim = values.shape[-1]

    keys_n = keys / jnp.linalg.norm(keys, axis=-1, keepdims=True)
    keys_flat = keys_n.reshape(n_slots * n_keys, k_dim)

    # Fold the query projection into the keys (scores = x @ W_score + b_score).
    w_score = wq @ keys_flat.T                      # (input_dim, n_slots*n_keys)
    b_score = bq @ keys_flat.T                      # (1, n_slots*n_keys)

    # Fold the residual linear onto the input and tile per slot.
    wqr = wq @ wr                                   # (input_dim, v_dim)
    bqr = bq @ wr + br                              # (1, v_dim)
    w_res = jnp.tile(wqr, (1, n_slots))             # (input_dim, n_slots*v_dim)
    b_res = jnp.tile(bqr, (1, n_slots))

    w_in = jnp.concatenate([w_score, w_res], axis=-1)
    b_in = jnp.concatenate([b_score, b_res], axis=-1)

    # Block-diagonal value table -> one K=n_slots*128, N=n_slots*32 MXU op.
    v_bd = jnp.zeros((n_slots * n_keys, n_slots * v_dim), jnp.float32)
    for s in range(n_slots):
        v_bd = v_bd.at[s * n_keys:(s + 1) * n_keys,
                       s * v_dim:(s + 1) * v_dim].set(values[s])

    return w_in, b_in, v_bd


def prepare_kernel_constants(params):
    """Done ONCE at init (would be cached in a real module)."""
    consts = {}
    for flag in ("binding", "reasoning"):
        consts[flag] = _fold_constants(
            params[f"{flag}_keys"], params[f"{flag}_values"],
            params["wq"], params["bq"], params["wr"], params["br"])
    keys_all = jnp.concatenate([params["binding_keys"],
                                params["reasoning_keys"]], axis=0)
    vals_all = jnp.concatenate([params["binding_values"],
                                params["reasoning_values"]], axis=0)
    consts["both"] = _fold_constants(keys_all, vals_all,
                                     params["wq"], params["bq"],
                                     params["wr"], params["br"])
    return consts


# --------------------------------- kernel ----------------------------------
def hashing_symbol_kernel(x_ref, w_ref, b_ref, vbd_ref, o_ref, *,
                          n_slots, n_keys, v_dim):
    """One grid step handles this BS block for all slots.

    x:    (bs, input_dim)
    w/b:  folded [score | tiled-residual] projection
    vbd:  (n_slots*n_keys, n_slots*v_dim) block-diagonal value table
    out:  (bs, n_slots*v_dim)   lane-dense
    """
    bs = x_ref.shape[0]
    n_sc = n_slots * n_keys

    x = x_ref[...]

    # ONE input-side MXU op: key scores for every slot + tiled residual.
    proj = jnp.dot(x, w_ref[...], preferred_element_type=jnp.float32) + b_ref[...]
    scores_all = proj[:, :n_sc]          # (bs, n_slots*n_keys), 128-lane aligned
    resid_all = proj[:, n_sc:]           # (bs, n_slots*v_dim)
    # TODO(synk): nn.Dropout(p=0.1) on the query is identity in eval mode; not applied.

    col = lax.broadcasted_iota(jnp.int32, (bs, n_keys), 1)
    neg = jnp.float32(jnp.finfo(jnp.float32).min)

    w_cols = []
    for s in range(n_slots):             # static unroll: slot XLU chains interleave
        scores = scores_all[:, s * n_keys:(s + 1) * n_keys]

        # Exact iterative top-k (ties broken by lowest index, matching topk).
        work = scores
        mmax = None
        for t in range(TOP_K):
            m = jnp.max(work, axis=-1, keepdims=True)
            if t == 0:
                mmax = m                 # reuse as softmax max (global max)
            is_max = work == m
            pos = jnp.min(jnp.where(is_max, col, n_keys), axis=-1, keepdims=True)
            work = jnp.where(col == pos, neg, work)

        # Knocked-out lanes hold `neg`; recover the selection mask once.
        selected = work != scores

        # Softmax over the selected scores; unselected lanes underflow to 0.
        e = jnp.exp(jnp.where(selected, scores - mmax, neg))
        inv = pl.reciprocal(jnp.sum(e, axis=-1, keepdims=True), approx=True)
        w_cols.append(e * inv)           # (bs, n_keys), sparse softmax weights

    # 128-lane-aligned pieces -> cheap placement concat, then ONE block-diag
    # matmul producing the full lane-dense output tile, plus one dense add.
    w_all = jnp.concatenate(w_cols, axis=-1)                 # (bs, n_slots*n_keys)
    out = jnp.dot(w_all, vbd_ref[...], preferred_element_type=jnp.float32)
    o_ref[...] = (out + resid_all).astype(o_ref.dtype)


def _pallas_hashing(x_flat, w_in, b_in, v_bd, n_slots, n_keys, v_dim):
    bs, in_dim = x_flat.shape
    total_cols = w_in.shape[1]
    out_dim = n_slots * v_dim

    # v7x megacore: split the BS axis across TensorCores only when it is big
    # enough to amortize the extra grid step; at toy sizes keep one step.
    n_blocks = 2 if (bs >= 256 and bs % 2 == 0 and (bs // 2) % 8 == 0) else 1
    bs_blk = bs // n_blocks

    flops = 2 * bs * in_dim * total_cols + 2 * bs * (n_slots * n_keys) * out_dim
    bytes_accessed = 4 * (x_flat.size + w_in.size + b_in.size + v_bd.size
                          + bs * out_dim)
    cost = pl.CostEstimate(flops=int(flops),
                           transcendentals=int(bs * n_slots * n_keys),
                           bytes_accessed=int(bytes_accessed))

    kernel = functools.partial(hashing_symbol_kernel,
                               n_slots=n_slots, n_keys=n_keys, v_dim=v_dim)

    return pl.pallas_call(
        kernel,
        out_shape=jax.ShapeDtypeStruct((bs, out_dim), jnp.float32),
        grid=(n_blocks,),
        in_specs=[
            pl.BlockSpec((bs_blk, in_dim), lambda i: (i, 0)),
            pl.BlockSpec((in_dim, total_cols), lambda i: (0, 0)),
            pl.BlockSpec((1, total_cols), lambda i: (0, 0)),
            pl.BlockSpec((n_slots * n_keys, out_dim), lambda i: (0, 0)),
        ],
        out_specs=pl.BlockSpec((bs_blk, out_dim), lambda i: (i, 0)),
        compiler_params=pltpu.CompilerParams(
            dimension_semantics=("parallel",)),
        cost_estimate=cost,
    )(x_flat, w_in, b_in, v_bd)


# ------------------------------ jitted wrappers -----------------------------
@jax.jit
def hashing_symbol_forward(x, w_in, b_in, v_bd):
    """Module-faithful per-flag forward with pre-folded constants:
    (batch, seq, input_dim) -> (batch, seq, n_slots_flag, v_dim)."""
    batch, seq, in_dim = x.shape
    n_slots = v_bd.shape[1] // V_DIM
    x_flat = x.reshape(batch * seq, in_dim)
    out = _pallas_hashing(x_flat, w_in, b_in, v_bd, n_slots, N_KEYS, V_DIM)
    return out.reshape(batch, seq, n_slots, V_DIM)      # reshape only


@jax.jit
def hashing_symbol_forward_both(x, w_in, b_in, v_bd):
    """Fused path: both flags (all 4 slots) in ONE pallas_call with a fully
    lane-dense (bs, 128) output.  Returns (binding_out, reasoning_out)."""
    batch, seq, in_dim = x.shape
    n_slots = v_bd.shape[1] // V_DIM
    x_flat = x.reshape(batch * seq, in_dim)
    out = _pallas_hashing(x_flat, w_in, b_in, v_bd, n_slots, N_KEYS, V_DIM)
    out = out.reshape(batch, seq, n_slots, V_DIM)
    return out[..., :BINDING_NUM_SLOTS, :], out[..., BINDING_NUM_SLOTS:, :]


# ---------------------------- pure-JAX reference ----------------------------
def reference_forward(x, params, flag):
    if flag == "binding":
        keys, values = params["binding_keys"], params["binding_values"]
    else:
        keys, values = params["reasoning_keys"], params["reasoning_values"]
    batch, seq, in_dim = x.shape
    q = x.reshape(-1, in_dim) @ params["wq"] + params["bq"]             # (BS, k_dim)
    keys_n = keys / jnp.linalg.norm(keys, axis=-1, keepdims=True)
    scores = jnp.einsum("bd,snd->sbn", q, keys_n)                       # (S, BS, n_keys)
    top_s, top_i = lax.top_k(scores, TOP_K)                             # (S, BS, k)
    w = jax.nn.softmax(top_s, axis=-1)
    s_idx = jnp.arange(keys.shape[0])[:, None, None]
    gathered = values[s_idx, top_i]                                     # (S, BS, k, v_dim)
    out = jnp.einsum("sbk,sbkd->sbd", w, gathered)
    resid = q @ params["wr"] + params["br"]
    out = out + resid[None]
    return out.transpose(1, 0, 2).reshape(batch, seq, keys.shape[0], values.shape[-1])


# ---------------------------------- main ------------------------------------
if __name__ == "__main__":
    params = init_params()
    consts = prepare_kernel_constants(params)   # init-time, cached
    x = jax.random.normal(jax.random.PRNGKey(0), (BATCH, SEQ, INPUT_DIM), jnp.float32)

    # Tolerance: EUP approximate reciprocal + folded projections reassociate fp
    # math (~1e-6..1e-3); well below any wrong-key-selection error (~3e-2).
    RTOL = ATOL = 2e-3
    ok = True

    # Fused path: one launch, one grid step, 128-lane output, all 4 slots.
    b_out, r_out = jax.block_until_ready(
        hashing_symbol_forward_both(x, *consts["both"]))
    for flag, y in (("binding", b_out), ("reasoning", r_out)):
        y_ref = jax.block_until_ready(reference_forward(x, params, flag))
        exp_slots = BINDING_NUM_SLOTS if flag == "binding" else REASONING_NUM_SLOTS
        assert y.shape == (BATCH, SEQ, exp_slots, V_DIM), y.shape
        good = bool(np.allclose(np.asarray(y), np.asarray(y_ref),
                                rtol=RTOL, atol=ATOL))
        if not good:
            print(f"mismatch (fused, {flag}): max abs err = "
                  f"{np.max(np.abs(np.asarray(y) - np.asarray(y_ref)))}")
        ok = ok and good

    # Module-faithful per-flag path (also single launch / single grid step).
    for flag in ("binding", "reasoning"):
        y = jax.block_until_ready(hashing_symbol_forward(x, *consts[flag]))
        y_ref = jax.block_until_ready(reference_forward(x, params, flag))
        exp_slots = BINDING_NUM_SLOTS if flag == "binding" else REASONING_NUM_SLOTS
        assert y.shape == (BATCH, SEQ, exp_slots, V_DIM), y.shape
        good = bool(np.allclose(np.asarray(y), np.asarray(y_ref),
                                rtol=RTOL, atol=ATOL))
        if not good:
            print(f"mismatch (per-flag, {flag}): max abs err = "
                  f"{np.max(np.abs(np.asarray(y) - np.asarray(y_ref)))}")
        ok = ok and good

    if ok:
        print("KERNEL_OK")
</pallas_src>

<mosaic_0001>
module attributes {stable_mosaic.version = 11 : i64} {
  func.func @hashing_symbol_kernel(%arg0: i32, %arg1: memref<16x32xf32, #tpu.memory_space<vmem>>, %arg2: memref<32x640xf32, #tpu.memory_space<vmem>>, %arg3: memref<1x640xf32, #tpu.memory_space<vmem>>, %arg4: memref<512x128xf32, #tpu.memory_space<vmem>>, %arg5: memref<16x128xf32, #tpu.memory_space<vmem>>) attributes {dimension_semantics = [#tpu.dimension_semantics<parallel>], iteration_bounds = array<i64: 1>, scalar_prefetch = 0 : i64, scratch_operands = 0 : i64, tpu.core_type = #tpu.core_type<tc>, window_params = [{transform_indices = @transform_0, window_bounds = array<i64: 16, 32>}, {pipeline_mode = #tpu.pipeline_mode<synchronous>, transform_indices = @transform_1, window_bounds = array<i64: 32, 640>}, {pipeline_mode = #tpu.pipeline_mode<synchronous>, transform_indices = @transform_2, window_bounds = array<i64: 1, 640>}, {pipeline_mode = #tpu.pipeline_mode<synchronous>, transform_indices = @transform_3, window_bounds = array<i64: 512, 128>}, {transform_indices = @transform_4, window_bounds = array<i64: 16, 128>}]} {
    %c0 = arith.constant 0 : index
    %c0_0 = arith.constant 0 : index
    %0 = vector.load %arg1[%c0, %c0_0] : memref<16x32xf32, #tpu.memory_space<vmem>>, vector<16x32xf32>
    %c0_1 = arith.constant 0 : index
    %c0_2 = arith.constant 0 : index
    %1 = vector.load %arg2[%c0_1, %c0_2] : memref<32x640xf32, #tpu.memory_space<vmem>>, vector<32x640xf32>
    %cst = arith.constant dense<0.000000e+00> : vector<16x640xf32>
    %2 = tpu.matmul %0, %1, %cst {dimension_numbers = #tpu.dot_dimension_numbers<[1], [0], [0], [1], [0, 0, 1, 1], [], []>} : vector<16x32xf32>, vector<32x640xf32>, vector<16x640xf32> -> vector<16x640xf32>
    %c0_3 = arith.constant 0 : index
    %c0_4 = arith.constant 0 : index
    %3 = vector.load %arg3[%c0_3, %c0_4] : memref<1x640xf32, #tpu.memory_space<vmem>>, vector<1x640xf32>
    %4 = vector.broadcast %3 : vector<1x640xf32> to vector<16x640xf32>
    %5 = arith.addf %2, %4 : vector<16x640xf32>
    %6 = vector.extract_strided_slice %5 {offsets = [0, 0], sizes = [16, 512], strides = [1, 1]} : vector<16x640xf32> to vector<16x512xf32>
    %7 = vector.extract_strided_slice %5 {offsets = [0, 512], sizes = [16, 128], strides = [1, 1]} : vector<16x640xf32> to vector<16x128xf32>
    %8 = tpu.iota {dimensions = array<i32: 1>} : vector<16x128xi32>
    %9 = vector.extract_strided_slice %6 {offsets = [0, 0], sizes = [16, 128], strides = [1, 1]} : vector<16x512xf32> to vector<16x128xf32>
    %cst_5 = arith.constant dense<0xFF800000> : vector<16xf32>
    %10 = vector.multi_reduction <maximumf>, %9, %cst_5 [1] : vector<16x128xf32> to vector<16xf32>
    %11 = vector.shape_cast %10 : vector<16xf32> to vector<16x1xf32>
    %12 = vector.broadcast %11 : vector<16x1xf32> to vector<16x128xf32>
    %13 = arith.cmpf oeq, %9, %12 : vector<16x128xf32>
    %c128_i32 = arith.constant 128 : i32
    %14 = vector.broadcast %c128_i32 : i32 to vector<16x128xi32>
    %15 = arith.select %13, %8, %14 : vector<16x128xi1>, vector<16x128xi32>
    %cst_6 = arith.constant dense<2147483647> : vector<16xi32>
    %16 = vector.multi_reduction <minsi>, %15, %cst_6 [1] : vector<16x128xi32> to vector<16xi32>
    %17 = vector.shape_cast %16 : vector<16xi32> to vector<16x1xi32>
    %18 = vector.broadcast %17 : vector<16x1xi32> to vector<16x128xi32>
    %19 = arith.cmpi eq, %8, %18 : vector<16x128xi32>
    %cst_7 = arith.constant -3.40282347E+38 : f32
    %20 = vector.broadcast %cst_7 : f32 to vector<16x128xf32>
    %21 = arith.select %19, %20, %9 : vector<16x128xi1>, vector<16x128xf32>
    %cst_8 = arith.constant dense<0xFF800000> : vector<16xf32>
    %22 = vector.multi_reduction <maximumf>, %21, %cst_8 [1] : vector<16x128xf32> to vector<16xf32>
    %23 = vector.shape_cast %22 : vector<16xf32> to vector<16x1xf32>
    %24 = vector.broadcast %23 : vector<16x1xf32> to vector<16x128xf32>
    %25 = arith.cmpf oeq, %21, %24 : vector<16x128xf32>
    %c128_i32_9 = arith.constant 128 : i32
    %26 = vector.broadcast %c128_i32_9 : i32 to vector<16x128xi32>
    %27 = arith.select %25, %8, %26 : vector<16x128xi1>, vector<16x128xi32>
    %cst_10 = arith.constant dense<2147483647> : vector<16xi32>
    %28 = vector.multi_reduction <minsi>, %27, %cst_10 [1] : vector<16x128xi32> to vector<16xi32>
    %29 = vector.shape_cast %28 : vector<16xi32> to vector<16x1xi32>
    %30 = vector.broadcast %29 : vector<16x1xi32> to vector<16x128xi32>
    %31 = arith.cmpi eq, %8, %30 : vector<16x128xi32>
    %cst_11 = arith.constant -3.40282347E+38 : f32
    %32 = vector.broadcast %cst_11 : f32 to vector<16x128xf32>
    %33 = arith.select %31, %32, %21 : vector<16x128xi1>, vector<16x128xf32>
    %cst_12 = arith.constant dense<0xFF800000> : vector<16xf32>
    %34 = vector.multi_reduction <maximumf>, %33, %cst_12 [1] : vector<16x128xf32> to vector<16xf32>
    %35 = vector.shape_cast %34 : vector<16xf32> to vector<16x1xf32>
    %36 = vector.broadcast %35 : vector<16x1xf32> to vector<16x128xf32>
    %37 = arith.cmpf oeq, %33, %36 : vector<16x128xf32>
    %c128_i32_13 = arith.constant 128 : i32
    %38 = vector.broadcast %c128_i32_13 : i32 to vector<16x128xi32>
    %39 = arith.select %37, %8, %38 : vector<16x128xi1>, vector<16x128xi32>
    %cst_14 = arith.constant dense<2147483647> : vector<16xi32>
    %40 = vector.multi_reduction <minsi>, %39, %cst_14 [1] : vector<16x128xi32> to vector<16xi32>
    %41 = vector.shape_cast %40 : vector<16xi32> to vector<16x1xi32>
    %42 = vector.broadcast %41 : vector<16x1xi32> to vector<16x128xi32>
    %43 = arith.cmpi eq, %8, %42 : vector<16x128xi32>
    %cst_15 = arith.constant -3.40282347E+38 : f32
    %44 = vector.broadcast %cst_15 : f32 to vector<16x128xf32>
    %45 = arith.select %43, %44, %33 : vector<16x128xi1>, vector<16x128xf32>
    %cst_16 = arith.constant dense<0xFF800000> : vector<16xf32>
    %46 = vector.multi_reduction <maximumf>, %45, %cst_16 [1] : vector<16x128xf32> to vector<16xf32>
    %47 = vector.shape_cast %46 : vector<16xf32> to vector<16x1xf32>
    %48 = vector.broadcast %47 : vector<16x1xf32> to vector<16x128xf32>
    %49 = arith.cmpf oeq, %45, %48 : vector<16x128xf32>
    %c128_i32_17 = arith.constant 128 : i32
    %50 = vector.broadcast %c128_i32_17 : i32 to vector<16x128xi32>
    %51 = arith.select %49, %8, %50 : vector<16x128xi1>, vector<16x128xi32>
    %cst_18 = arith.constant dense<2147483647> : vector<16xi32>
    %52 = vector.multi_reduction <minsi>, %51, %cst_18 [1] : vector<16x128xi32> to vector<16xi32>
    %53 = vector.shape_cast %52 : vector<16xi32> to vector<16x1xi32>
    %54 = vector.broadcast %53 : vector<16x1xi32> to vector<16x128xi32>
    %55 = arith.cmpi eq, %8, %54 : vector<16x128xi32>
    %cst_19 = arith.constant -3.40282347E+38 : f32
    %56 = vector.broadcast %cst_19 : f32 to vector<16x128xf32>
    %57 = arith.select %55, %56, %45 : vector<16x128xi1>, vector<16x128xf32>
    %cst_20 = arith.constant dense<0xFF800000> : vector<16xf32>
    %58 = vector.multi_reduction <maximumf>, %57, %cst_20 [1] : vector<16x128xf32> to vector<16xf32>
    %59 = vector.shape_cast %58 : vector<16xf32> to vector<16x1xf32>
    %60 = vector.broadcast %59 : vector<16x1xf32> to vector<16x128xf32>
    %61 = arith.cmpf oeq, %57, %60 : vector<16x128xf32>
    %c128_i32_21 = arith.constant 128 : i32
    %62 = vector.broadcast %c128_i32_21 : i32 to vector<16x128xi32>
    %63 = arith.select %61, %8, %62 : vector<16x128xi1>, vector<16x128xi32>
    %cst_22 = arith.constant dense<2147483647> : vector<16xi32>
    %64 = vector.multi_reduction <minsi>, %63, %cst_22 [1] : vector<16x128xi32> to vector<16xi32>
    %65 = vector.shape_cast %64 : vector<16xi32> to vector<16x1xi32>
    %66 = vector.broadcast %65 : vector<16x1xi32> to vector<16x128xi32>
    %67 = arith.cmpi eq, %8, %66 : vector<16x128xi32>
    %cst_23 = arith.constant -3.40282347E+38 : f32
    %68 = vector.broadcast %cst_23 : f32 to vector<16x128xf32>
    %69 = arith.select %67, %68, %57 : vector<16x128xi1>, vector<16x128xf32>
    %cst_24 = arith.constant dense<0xFF800000> : vector<16xf32>
    %70 = vector.multi_reduction <maximumf>, %69, %cst_24 [1] : vector<16x128xf32> to vector<16xf32>
    %71 = vector.shape_cast %70 : vector<16xf32> to vector<16x1xf32>
    %72 = vector.broadcast %71 : vector<16x1xf32> to vector<16x128xf32>
    %73 = arith.cmpf oeq, %69, %72 : vector<16x128xf32>
    %c128_i32_25 = arith.constant 128 : i32
    %74 = vector.broadcast %c128_i32_25 : i32 to vector<16x128xi32>
    %75 = arith.select %73, %8, %74 : vector<16x128xi1>, vector<16x128xi32>
    %cst_26 = arith.constant dense<2147483647> : vector<16xi32>
    %76 = vector.multi_reduction <minsi>, %75, %cst_26 [1] : vector<16x128xi32> to vector<16xi32>
    %77 = vector.shape_cast %76 : vector<16xi32> to vector<16x1xi32>
    %78 = vector.broadcast %77 : vector<16x1xi32> to vector<16x128xi32>
    %79 = arith.cmpi eq, %8, %78 : vector<16x128xi32>
    %cst_27 = arith.constant -3.40282347E+38 : f32
    %80 = vector.broadcast %cst_27 : f32 to vector<16x128xf32>
    %81 = arith.select %79, %80, %69 : vector<16x128xi1>, vector<16x128xf32>
    %cst_28 = arith.constant dense<0xFF800000> : vector<16xf32>
    %82 = vector.multi_reduction <maximumf>, %81, %cst_28 [1] : vector<16x128xf32> to vector<16xf32>
    %83 = vector.shape_cast %82 : vector<16xf32> to vector<16x1xf32>
    %84 = vector.broadcast %83 : vector<16x1xf32> to vector<16x128xf32>
    %85 = arith.cmpf oeq, %81, %84 : vector<16x128xf32>
    %c128_i32_29 = arith.constant 128 : i32
    %86 = vector.broadcast %c128_i32_29 : i32 to vector<16x128xi32>
    %87 = arith.select %85, %8, %86 : vector<16x128xi1>, vector<16x128xi32>
    %cst_30 = arith.constant dense<2147483647> : vector<16xi32>
    %88 = vector.multi_reduction <minsi>, %87, %cst_30 [1] : vector<16x128xi32> to vector<16xi32>
    %89 = vector.shape_cast %88 : vector<16xi32> to vector<16x1xi32>
    %90 = vector.broadcast %89 : vector<16x1xi32> to vector<16x128xi32>
    %91 = arith.cmpi eq, %8, %90 : vector<16x128xi32>
    %cst_31 = arith.constant -3.40282347E+38 : f32
    %92 = vector.broadcast %cst_31 : f32 to vector<16x128xf32>
    %93 = arith.select %91, %92, %81 : vector<16x128xi1>, vector<16x128xf32>
    %cst_32 = arith.constant dense<0xFF800000> : vector<16xf32>
    %94 = vector.multi_reduction <maximumf>, %93, %cst_32 [1] : vector<16x128xf32> to vector<16xf32>
    %95 = vector.shape_cast %94 : vector<16xf32> to vector<16x1xf32>
    %96 = vector.broadcast %95 : vector<16x1xf32> to vector<16x128xf32>
    %97 = arith.cmpf oeq, %93, %96 : vector<16x128xf32>
    %c128_i32_33 = arith.constant 128 : i32
    %98 = vector.broadcast %c128_i32_33 : i32 to vector<16x128xi32>
    %99 = arith.select %97, %8, %98 : vector<16x128xi1>, vector<16x128xi32>
    %cst_34 = arith.constant dense<2147483647> : vector<16xi32>
    %100 = vector.multi_reduction <minsi>, %99, %cst_34 [1] : vector<16x128xi32> to vector<16xi32>
    %101 = vector.shape_cast %100 : vector<16xi32> to vector<16x1xi32>
    %102 = vector.broadcast %101 : vector<16x1xi32> to vector<16x128xi32>
    %103 = arith.cmpi eq, %8, %102 : vector<16x128xi32>
    %cst_35 = arith.constant -3.40282347E+38 : f32
    %104 = vector.broadcast %cst_35 : f32 to vector<16x128xf32>
    %105 = arith.select %103, %104, %93 : vector<16x128xi1>, vector<16x128xf32>
    %106 = arith.cmpf one, %105, %9 : vector<16x128xf32>
    %107 = vector.broadcast %11 : vector<16x1xf32> to vector<16x128xf32>
    %108 = arith.subf %9, %107 : vector<16x128xf32>
    %cst_36 = arith.constant -3.40282347E+38 : f32
    %109 = vector.broadcast %cst_36 : f32 to vector<16x128xf32>
    %110 = arith.select %106, %108, %109 : vector<16x128xi1>, vector<16x128xf32>
    %111 = math.exp %110 : vector<16x128xf32>
    %cst_37 = arith.constant dense<0.000000e+00> : vector<16xf32>
    %112 = vector.multi_reduction <add>, %111, %cst_37 [1] : vector<16x128xf32> to vector<16xf32>
    %113 = vector.shape_cast %112 : vector<16xf32> to vector<16x1xf32>
    %114 = tpu.reciprocal %113 {approx = true} : vector<16x1xf32> -> vector<16x1xf32>
    %115 = vector.broadcast %114 : vector<16x1xf32> to vector<16x128xf32>
    %116 = arith.mulf %111, %115 : vector<16x128xf32>
    %117 = vector.extract_strided_slice %6 {offsets = [0, 128], sizes = [16, 128], strides = [1, 1]} : vector<16x512xf32> to vector<16x128xf32>
    %cst_38 = arith.constant dense<0xFF800000> : vector<16xf32>
    %118 = vector.multi_reduction <maximumf>, %117, %cst_38 [1] : vector<16x128xf32> to vector<16xf32>
    %119 = vector.shape_cast %118 : vector<16xf32> to vector<16x1xf32>
    %120 = vector.broadcast %119 : vector<16x1xf32> to vector<16x128xf32>
    %121 = arith.cmpf oeq, %117, %120 : vector<16x128xf32>
    %c128_i32_39 = arith.constant 128 : i32
    %122 = vector.broadcast %c128_i32_39 : i32 to vector<16x128xi32>
    %123 = arith.select %121, %8, %122 : vector<16x128xi1>, vector<16x128xi32>
    %cst_40 = arith.constant dense<2147483647> : vector<16xi32>
    %124 = vector.multi_reduction <minsi>, %123, %cst_40 [1] : vector<16x128xi32> to vector<16xi32>
    %125 = vector.shape_cast %124 : vector<16xi32> to vector<16x1xi32>
    %126 = vector.broadcast %125 : vector<16x1xi32> to vector<16x128xi32>
    %127 = arith.cmpi eq, %8, %126 : vector<16x128xi32>
    %cst_41 = arith.constant -3.40282347E+38 : f32
    %128 = vector.broadcast %cst_41 : f32 to vector<16x128xf32>
    %129 = arith.select %127, %128, %117 : vector<16x128xi1>, vector<16x128xf32>
    %cst_42 = arith.constant dense<0xFF800000> : vector<16xf32>
    %130 = vector.multi_reduction <maximumf>, %129, %cst_42 [1] : vector<16x128xf32> to vector<16xf32>
    %131 = vector.shape_cast %130 : vector<16xf32> to vector<16x1xf32>
    %132 = vector.broadcast %131 : vector<16x1xf32> to vector<16x128xf32>
    %133 = arith.cmpf oeq, %129, %132 : vector<16x128xf32>
    %c128_i32_43 = arith.constant 128 : i32
    %134 = vector.broadcast %c128_i32_43 : i32 to vector<16x128xi32>
    %135 = arith.select %133, %8, %134 : vector<16x128xi1>, vector<16x128xi32>
    %cst_44 = arith.constant dense<2147483647> : vector<16xi32>
    %136 = vector.multi_reduction <minsi>, %135, %cst_44 [1] : vector<16x128xi32> to vector<16xi32>
    %137 = vector.shape_cast %136 : vector<16xi32> to vector<16x1xi32>
    %138 = vector.broadcast %137 : vector<16x1xi32> to vector<16x128xi32>
    %139 = arith.cmpi eq, %8, %138 : vector<16x128xi32>
    %cst_45 = arith.constant -3.40282347E+38 : f32
    %140 = vector.broadcast %cst_45 : f32 to vector<16x128xf32>
    %141 = arith.select %139, %140, %129 : vector<16x128xi1>, vector<16x128xf32>
    %cst_46 = arith.constant dense<0xFF800000> : vector<16xf32>
    %142 = vector.multi_reduction <maximumf>, %141, %cst_46 [1] : vector<16x128xf32> to vector<16xf32>
    %143 = vector.shape_cast %142 : vector<16xf32> to vector<16x1xf32>
    %144 = vector.broadcast %143 : vector<16x1xf32> to vector<16x128xf32>
    %145 = arith.cmpf oeq, %141, %144 : vector<16x128xf32>
    %c128_i32_47 = arith.constant 128 : i32
    %146 = vector.broadcast %c128_i32_47 : i32 to vector<16x128xi32>
    %147 = arith.select %145, %8, %146 : vector<16x128xi1>, vector<16x128xi32>
    %cst_48 = arith.constant dense<2147483647> : vector<16xi32>
    %148 = vector.multi_reduction <minsi>, %147, %cst_48 [1] : vector<16x128xi32> to vector<16xi32>
    %149 = vector.shape_cast %148 : vector<16xi32> to vector<16x1xi32>
    %150 = vector.broadcast %149 : vector<16x1xi32> to vector<16x128xi32>
    %151 = arith.cmpi eq, %8, %150 : vector<16x128xi32>
    %cst_49 = arith.constant -3.40282347E+38 : f32
    %152 = vector.broadcast %cst_49 : f32 to vector<16x128xf32>
    %153 = arith.select %151, %152, %141 : vector<16x128xi1>, vector<16x128xf32>
    %cst_50 = arith.constant dense<0xFF800000> : vector<16xf32>
    %154 = vector.multi_reduction <maximumf>, %153, %cst_50 [1] : vector<16x128xf32> to vector<16xf32>
    %155 = vector.shape_cast %154 : vector<16xf32> to vector<16x1xf32>
    %156 = vector.broadcast %155 : vector<16x1xf32> to vector<16x128xf32>
    %157 = arith.cmpf oeq, %153, %156 : vector<16x128xf32>
    %c128_i32_51 = arith.constant 128 : i32
    %158 = vector.broadcast %c128_i32_51 : i32 to vector<16x128xi32>
    %159 = arith.select %157, %8, %158 : vector<16x128xi1>, vector<16x128xi32>
    %cst_52 = arith.constant dense<2147483647> : vector<16xi32>
    %160 = vector.multi_reduction <minsi>, %159, %cst_52 [1] : vector<16x128xi32> to vector<16xi32>
    %161 = vector.shape_cast %160 : vector<16xi32> to vector<16x1xi32>
    %162 = vector.broadcast %161 : vector<16x1xi32> to vector<16x128xi32>
    %163 = arith.cmpi eq, %8, %162 : vector<16x128xi32>
    %cst_53 = arith.constant -3.40282347E+38 : f32
    %164 = vector.broadcast %cst_53 : f32 to vector<16x128xf32>
    %165 = arith.select %163, %164, %153 : vector<16x128xi1>, vector<16x128xf32>
    %cst_54 = arith.constant dense<0xFF800000> : vector<16xf32>
    %166 = vector.multi_reduction <maximumf>, %165, %cst_54 [1] : vector<16x128xf32> to vector<16xf32>
    %167 = vector.shape_cast %166 : vector<16xf32> to vector<16x1xf32>
    %168 = vector.broadcast %167 : vector<16x1xf32> to vector<16x128xf32>
    %169 = arith.cmpf oeq, %165, %168 : vector<16x128xf32>
    %c128_i32_55 = arith.constant 128 : i32
    %170 = vector.broadcast %c128_i32_55 : i32 to vector<16x128xi32>
    %171 = arith.select %169, %8, %170 : vector<16x128xi1>, vector<16x128xi32>
    %cst_56 = arith.constant dense<2147483647> : vector<16xi32>
    %172 = vector.multi_reduction <minsi>, %171, %cst_56 [1] : vector<16x128xi32> to vector<16xi32>
    %173 = vector.shape_cast %172 : vector<16xi32> to vector<16x1xi32>
    %174 = vector.broadcast %173 : vector<16x1xi32> to vector<16x128xi32>
    %175 = arith.cmpi eq, %8, %174 : vector<16x128xi32>
    %cst_57 = arith.constant -3.40282347E+38 : f32
    %176 = vector.broadcast %cst_57 : f32 to vector<16x128xf32>
    %177 = arith.select %175, %176, %165 : vector<16x128xi1>, vector<16x128xf32>
    %cst_58 = arith.constant dense<0xFF800000> : vector<16xf32>
    %178 = vector.multi_reduction <maximumf>, %177, %cst_58 [1] : vector<16x128xf32> to vector<16xf32>
    %179 = vector.shape_cast %178 : vector<16xf32> to vector<16x1xf32>
    %180 = vector.broadcast %179 : vector<16x1xf32> to vector<16x128xf32>
    %181 = arith.cmpf oeq, %177, %180 : vector<16x128xf32>
    %c128_i32_59 = arith.constant 128 : i32
    %182 = vector.broadcast %c128_i32_59 : i32 to vector<16x128xi32>
    %183 = arith.select %181, %8, %182 : vector<16x128xi1>, vector<16x128xi32>
    %cst_60 = arith.constant dense<2147483647> : vector<16xi32>
    %184 = vector.multi_reduction <minsi>, %183, %cst_60 [1] : vector<16x128xi32> to vector<16xi32>
    %185 = vector.shape_cast %184 : vector<16xi32> to vector<16x1xi32>
    %186 = vector.broadcast %185 : vector<16x1xi32> to vector<16x128xi32>
    %187 = arith.cmpi eq, %8, %186 : vector<16x128xi32>
    %cst_61 = arith.constant -3.40282347E+38 : f32
    %188 = vector.broadcast %cst_61 : f32 to vector<16x128xf32>
    %189 = arith.select %187, %188, %177 : vector<16x128xi1>, vector<16x128xf32>
    %cst_62 = arith.constant dense<0xFF800000> : vector<16xf32>
    %190 = vector.multi_reduction <maximumf>, %189, %cst_62 [1] : vector<16x128xf32> to vector<16xf32>
    %191 = vector.shape_cast %190 : vector<16xf32> to vector<16x1xf32>
    %192 = vector.broadcast %191 : vector<16x1xf32> to vector<16x128xf32>
    %193 = arith.cmpf oeq, %189, %192 : vector<16x128xf32>
    %c128_i32_63 = arith.constant 128 : i32
    %194 = vector.broadcast %c128_i32_63 : i32 to vector<16x128xi32>
    %195 = arith.select %193, %8, %194 : vector<16x128xi1>, vector<16x128xi32>
    %cst_64 = arith.constant dense<2147483647> : vector<16xi32>
    %196 = vector.multi_reduction <minsi>, %195, %cst_64 [1] : vector<16x128xi32> to vector<16xi32>
    %197 = vector.shape_cast %196 : vector<16xi32> to vector<16x1xi32>
    %198 = vector.broadcast %197 : vector<16x1xi32> to vector<16x128xi32>
    %199 = arith.cmpi eq, %8, %198 : vector<16x128xi32>
    %cst_65 = arith.constant -3.40282347E+38 : f32
    %200 = vector.broadcast %cst_65 : f32 to vector<16x128xf32>
    %201 = arith.select %199, %200, %189 : vector<16x128xi1>, vector<16x128xf32>
    %cst_66 = arith.constant dense<0xFF800000> : vector<16xf32>
    %202 = vector.multi_reduction <maximumf>, %201, %cst_66 [1] : vector<16x128xf32> to vector<16xf32>
    %203 = vector.shape_cast %202 : vector<16xf32> to vector<16x1xf32>
    %204 = vector.broadcast %203 : vector<16x1xf32> to vector<16x128xf32>
    %205 = arith.cmpf oeq, %201, %204 : vector<16x128xf32>
    %c128_i32_67 = arith.constant 128 : i32
    %206 = vector.broadcast %c128_i32_67 : i32 to vector<16x128xi32>
    %207 = arith.select %205, %8, %206 : vector<16x128xi1>, vector<16x128xi32>
    %cst_68 = arith.constant dense<2147483647> : vector<16xi32>
    %208 = vector.multi_reduction <minsi>, %207, %cst_68 [1] : vector<16x128xi32> to vector<16xi32>
    %209 = vector.shape_cast %208 : vector<16xi32> to vector<16x1xi32>
    %210 = vector.broadcast %209 : vector<16x1xi32> to vector<16x128xi32>
    %211 = arith.cmpi eq, %8, %210 : vector<16x128xi32>
    %cst_69 = arith.constant -3.40282347E+38 : f32
    %212 = vector.broadcast %cst_69 : f32 to vector<16x128xf32>
    %213 = arith.select %211, %212, %201 : vector<16x128xi1>, vector<16x128xf32>
    %214 = arith.cmpf one, %213, %117 : vector<16x128xf32>
    %215 = vector.broadcast %119 : vector<16x1xf32> to vector<16x128xf32>
    %216 = arith.subf %117, %215 : vector<16x128xf32>
    %cst_70 = arith.constant -3.40282347E+38 : f32
    %217 = vector.broadcast %cst_70 : f32 to vector<16x128xf32>
    %218 = arith.select %214, %216, %217 : vector<16x128xi1>, vector<16x128xf32>
    %219 = math.exp %218 : vector<16x128xf32>
    %cst_71 = arith.constant dense<0.000000e+00> : vector<16xf32>
    %220 = vector.multi_reduction <add>, %219, %cst_71 [1] : vector<16x128xf32> to vector<16xf32>
    %221 = vector.shape_cast %220 : vector<16xf32> to vector<16x1xf32>
    %222 = tpu.reciprocal %221 {approx = true} : vector<16x1xf32> -> vector<16x1xf32>
    %223 = vector.broadcast %222 : vector<16x1xf32> to vector<16x128xf32>
    %224 = arith.mulf %219, %223 : vector<16x128xf32>
    %225 = vector.extract_strided_slice %6 {offsets = [0, 256], sizes = [16, 128], strides = [1, 1]} : vector<16x512xf32> to vector<16x128xf32>
    %cst_72 = arith.constant dense<0xFF800000> : vector<16xf32>
    %226 = vector.multi_reduction <maximumf>, %225, %cst_72 [1] : vector<16x128xf32> to vector<16xf32>
    %227 = vector.shape_cast %226 : vector<16xf32> to vector<16x1xf32>
    %228 = vector.broadcast %227 : vector<16x1xf32> to vector<16x128xf32>
    %229 = arith.cmpf oeq, %225, %228 : vector<16x128xf32>
    %c128_i32_73 = arith.constant 128 : i32
    %230 = vector.broadcast %c128_i32_73 : i32 to vector<16x128xi32>
    %231 = arith.select %229, %8, %230 : vector<16x128xi1>, vector<16x128xi32>
    %cst_74 = arith.constant dense<2147483647> : vector<16xi32>
    %232 = vector.multi_reduction <minsi>, %231, %cst_74 [1] : vector<16x128xi32> to vector<16xi32>
    %233 = vector.shape_cast %232 : vector<16xi32> to vector<16x1xi32>
    %234 = vector.broadcast %233 : vector<16x1xi32> to vector<16x128xi32>
    %235 = arith.cmpi eq, %8, %234 : vector<16x128xi32>
    %cst_75 = arith.constant -3.40282347E+38 : f32
    %236 = vector.broadcast %cst_75 : f32 to vector<16x128xf32>
    %237 = arith.select %235, %236, %225 : vector<16x128xi1>, vector<16x128xf32>
    %cst_76 = arith.constant dense<0xFF800000> : vector<16xf32>
    %238 = vector.multi_reduction <maximumf>, %237, %cst_76 [1] : vector<16x128xf32> to vector<16xf32>
    %239 = vector.shape_cast %238 : vector<16xf32> to vector<16x1xf32>
    %240 = vector.broadcast %239 : vector<16x1xf32> to vector<16x128xf32>
    %241 = arith.cmpf oeq, %237, %240 : vector<16x128xf32>
    %c128_i32_77 = arith.constant 128 : i32
    %242 = vector.broadcast %c128_i32_77 : i32 to vector<16x128xi32>
    %243 = arith.select %241, %8, %242 : vector<16x128xi1>, vector<16x128xi32>
    %cst_78 = arith.constant dense<2147483647> : vector<16xi32>
    %244 = vector.multi_reduction <minsi>, %243, %cst_78 [1] : vector<16x128xi32> to vector<16xi32>
    %245 = vector.shape_cast %244 : vector<16xi32> to vector<16x1xi32>
    %246 = vector.broadcast %245 : vector<16x1xi32> to vector<16x128xi32>
    %247 = arith.cmpi eq, %8, %246 : vector<16x128xi32>
    %cst_79 = arith.constant -3.40282347E+38 : f32
    %248 = vector.broadcast %cst_79 : f32 to vector<16x128xf32>
    %249 = arith.select %247, %248, %237 : vector<16x128xi1>, vector<16x128xf32>
    %cst_80 = arith.constant dense<0xFF800000> : vector<16xf32>
    %250 = vector.multi_reduction <maximumf>, %249, %cst_80 [1] : vector<16x128xf32> to vector<16xf32>
    %251 = vector.shape_cast %250 : vector<16xf32> to vector<16x1xf32>
    %252 = vector.broadcast %251 : vector<16x1xf32> to vector<16x128xf32>
    %253 = arith.cmpf oeq, %249, %252 : vector<16x128xf32>
    %c128_i32_81 = arith.constant 128 : i32
    %254 = vector.broadcast %c128_i32_81 : i32 to vector<16x128xi32>
    %255 = arith.select %253, %8, %254 : vector<16x128xi1>, vector<16x128xi32>
    %cst_82 = arith.constant dense<2147483647> : vector<16xi32>
    %256 = vector.multi_reduction <minsi>, %255, %cst_82 [1] : vector<16x128xi32> to vector<16xi32>
    %257 = vector.shape_cast %256 : vector<16xi32> to vector<16x1xi32>
    %258 = vector.broadcast %257 : vector<16x1xi32> to vector<16x128xi32>
    %259 = arith.cmpi eq, %8, %258 : vector<16x128xi32>
    %cst_83 = arith.constant -3.40282347E+38 : f32
    %260 = vector.broadcast %cst_83 : f32 to vector<16x128xf32>
    %261 = arith.select %259, %260, %249 : vector<16x128xi1>, vector<16x128xf32>
    %cst_84 = arith.constant dense<0xFF800000> : vector<16xf32>
    %262 = vector.multi_reduction <maximumf>, %261, %cst_84 [1] : vector<16x128xf32> to vector<16xf32>
    %263 = vector.shape_cast %262 : vector<16xf32> to vector<16x1xf32>
    %264 = vector.broadcast %263 : vector<16x1xf32> to vector<16x128xf32>
    %265 = arith.cmpf oeq, %261, %264 : vector<16x128xf32>
    %c128_i32_85 = arith.constant 128 : i32
    %266 = vector.broadcast %c128_i32_85 : i32 to vector<16x128xi32>
    %267 = arith.select %265, %8, %266 : vector<16x128xi1>, vector<16x128xi32>
    %cst_86 = arith.constant dense<2147483647> : vector<16xi32>
    %268 = vector.multi_reduction <minsi>, %267, %cst_86 [1] : vector<16x128xi32> to vector<16xi32>
    %269 = vector.shape_cast %268 : vector<16xi32> to vector<16x1xi32>
    %270 = vector.broadcast %269 : vector<16x1xi32> to vector<16x128xi32>
    %271 = arith.cmpi eq, %8, %270 : vector<16x128xi32>
    %cst_87 = arith.constant -3.40282347E+38 : f32
    %272 = vector.broadcast %cst_87 : f32 to vector<16x128xf32>
    %273 = arith.select %271, %272, %261 : vector<16x128xi1>, vector<16x128xf32>
    %cst_88 = arith.constant dense<0xFF800000> : vector<16xf32>
    %274 = vector.multi_reduction <maximumf>, %273, %cst_88 [1] : vector<16x128xf32> to vector<16xf32>
    %275 = vector.shape_cast %274 : vector<16xf32> to vector<16x1xf32>
    %276 = vector.broadcast %275 : vector<16x1xf32> to vector<16x128xf32>
    %277 = arith.cmpf oeq, %273, %276 : vector<16x128xf32>
    %c128_i32_89 = arith.constant 128 : i32
    %278 = vector.broadcast %c128_i32_89 : i32 to vector<16x128xi32>
    %279 = arith.select %277, %8, %278 : vector<16x128xi1>, vector<16x128xi32>
    %cst_90 = arith.constant dense<2147483647> : vector<16xi32>
    %280 = vector.multi_reduction <minsi>, %279, %cst_90 [1] : vector<16x128xi32> to vector<16xi32>
    %281 = vector.shape_cast %280 : vector<16xi32> to vector<16x1xi32>
    %282 = vector.broadcast %281 : vector<16x1xi32> to vector<16x128xi32>
    %283 = arith.cmpi eq, %8, %282 : vector<16x128xi32>
    %cst_91 = arith.constant -3.40282347E+38 : f32
    %284 = vector.broadcast %cst_91 : f32 to vector<16x128xf32>
    %285 = arith.select %283, %284, %273 : vector<16x128xi1>, vector<16x128xf32>
    %cst_92 = arith.constant dense<0xFF800000> : vector<16xf32>
    %286 = vector.multi_reduction <maximumf>, %285, %cst_92 [1] : vector<16x128xf32> to vector<16xf32>
    %287 = vector.shape_cast %286 : vector<16xf32> to vector<16x1xf32>
    %288 = vector.broadcast %287 : vector<16x1xf32> to vector<16x128xf32>
    %289 = arith.cmpf oeq, %285, %288 : vector<16x128xf32>
    %c128_i32_93 = arith.constant 128 : i32
    %290 = vector.broadcast %c128_i32_93 : i32 to vector<16x128xi32>
    %291 = arith.select %289, %8, %290 : vector<16x128xi1>, vector<16x128xi32>
    %cst_94 = arith.constant dense<2147483647> : vector<16xi32>
    %292 = vector.multi_reduction <minsi>, %291, %cst_94 [1] : vector<16x128xi32> to vector<16xi32>
    %293 = vector.shape_cast %292 : vector<16xi32> to vector<16x1xi32>
    %294 = vector.broadcast %293 : vector<16x1xi32> to vector<16x128xi32>
    %295 = arith.cmpi eq, %8, %294 : vector<16x128xi32>
    %cst_95 = arith.constant -3.40282347E+38 : f32
    %296 = vector.broadcast %cst_95 : f32 to vector<16x128xf32>
    %297 = arith.select %295, %296, %285 : vector<16x128xi1>, vector<16x128xf32>
    %cst_96 = arith.constant dense<0xFF800000> : vector<16xf32>
    %298 = vector.multi_reduction <maximumf>, %297, %cst_96 [1] : vector<16x128xf32> to vector<16xf32>
    %299 = vector.shape_cast %298 : vector<16xf32> to vector<16x1xf32>
    %300 = vector.broadcast %299 : vector<16x1xf32> to vector<16x128xf32>
    %301 = arith.cmpf oeq, %297, %300 : vector<16x128xf32>
    %c128_i32_97 = arith.constant 128 : i32
    %302 = vector.broadcast %c128_i32_97 : i32 to vector<16x128xi32>
    %303 = arith.select %301, %8, %302 : vector<16x128xi1>, vector<16x128xi32>
    %cst_98 = arith.constant dense<2147483647> : vector<16xi32>
    %304 = vector.multi_reduction <minsi>, %303, %cst_98 [1] : vector<16x128xi32> to vector<16xi32>
    %305 = vector.shape_cast %304 : vector<16xi32> to vector<16x1xi32>
    %306 = vector.broadcast %305 : vector<16x1xi32> to vector<16x128xi32>
    %307 = arith.cmpi eq, %8, %306 : vector<16x128xi32>
    %cst_99 = arith.constant -3.40282347E+38 : f32
    %308 = vector.broadcast %cst_99 : f32 to vector<16x128xf32>
    %309 = arith.select %307, %308, %297 : vector<16x128xi1>, vector<16x128xf32>
    %cst_100 = arith.constant dense<0xFF800000> : vector<16xf32>
    %310 = vector.multi_reduction <maximumf>, %309, %cst_100 [1] : vector<16x128xf32> to vector<16xf32>
    %311 = vector.shape_cast %310 : vector<16xf32> to vector<16x1xf32>
    %312 = vector.broadcast %311 : vector<16x1xf32> to vector<16x128xf32>
    %313 = arith.cmpf oeq, %309, %312 : vector<16x128xf32>
    %c128_i32_101 = arith.constant 128 : i32
    %314 = vector.broadcast %c128_i32_101 : i32 to vector<16x128xi32>
    %315 = arith.select %313, %8, %314 : vector<16x128xi1>, vector<16x128xi32>
    %cst_102 = arith.constant dense<2147483647> : vector<16xi32>
    %316 = vector.multi_reduction <minsi>, %315, %cst_102 [1] : vector<16x128xi32> to vector<16xi32>
    %317 = vector.shape_cast %316 : vector<16xi32> to vector<16x1xi32>
    %318 = vector.broadcast %317 : vector<16x1xi32> to vector<16x128xi32>
    %319 = arith.cmpi eq, %8, %318 : vector<16x128xi32>
    %cst_103 = arith.constant -3.40282347E+38 : f32
    %320 = vector.broadcast %cst_103 : f32 to vector<16x128xf32>
    %321 = arith.select %319, %320, %309 : vector<16x128xi1>, vector<16x128xf32>
    %322 = arith.cmpf one, %321, %225 : vector<16x128xf32>
    %323 = vector.broadcast %227 : vector<16x1xf32> to vector<16x128xf32>
    %324 = arith.subf %225, %323 : vector<16x128xf32>
    %cst_104 = arith.constant -3.40282347E+38 : f32
    %325 = vector.broadcast %cst_104 : f32 to vector<16x128xf32>
    %326 = arith.select %322, %324, %325 : vector<16x128xi1>, vector<16x128xf32>
    %327 = math.exp %326 : vector<16x128xf32>
    %cst_105 = arith.constant dense<0.000000e+00> : vector<16xf32>
    %328 = vector.multi_reduction <add>, %327, %cst_105 [1] : vector<16x128xf32> to vector<16xf32>
    %329 = vector.shape_cast %328 : vector<16xf32> to vector<16x1xf32>
    %330 = tpu.reciprocal %329 {approx = true} : vector<16x1xf32> -> vector<16x1xf32>
    %331 = vector.broadcast %330 : vector<16x1xf32> to vector<16x128xf32>
    %332 = arith.mulf %327, %331 : vector<16x128xf32>
    %333 = vector.extract_strided_slice %6 {offsets = [0, 384], sizes = [16, 128], strides = [1, 1]} : vector<16x512xf32> to vector<16x128xf32>
    %cst_106 = arith.constant dense<0xFF800000> : vector<16xf32>
    %334 = vector.multi_reduction <maximumf>, %333, %cst_106 [1] : vector<16x128xf32> to vector<16xf32>
    %335 = vector.shape_cast %334 : vector<16xf32> to vector<16x1xf32>
    %336 = vector.broadcast %335 : vector<16x1xf32> to vector<16x128xf32>
    %337 = arith.cmpf oeq, %333, %336 : vector<16x128xf32>
    %c128_i32_107 = arith.constant 128 : i32
    %338 = vector.broadcast %c128_i32_107 : i32 to vector<16x128xi32>
    %339 = arith.select %337, %8, %338 : vector<16x128xi1>, vector<16x128xi32>
    %cst_108 = arith.constant dense<2147483647> : vector<16xi32>
    %340 = vector.multi_reduction <minsi>, %339, %cst_108 [1] : vector<16x128xi32> to vector<16xi32>
    %341 = vector.shape_cast %340 : vector<16xi32> to vector<16x1xi32>
    %342 = vector.broadcast %341 : vector<16x1xi32> to vector<16x128xi32>
    %343 = arith.cmpi eq, %8, %342 : vector<16x128xi32>
    %cst_109 = arith.constant -3.40282347E+38 : f32
    %344 = vector.broadcast %cst_109 : f32 to vector<16x128xf32>
    %345 = arith.select %343, %344, %333 : vector<16x128xi1>, vector<16x128xf32>
    %cst_110 = arith.constant dense<0xFF800000> : vector<16xf32>
    %346 = vector.multi_reduction <maximumf>, %345, %cst_110 [1] : vector<16x128xf32> to vector<16xf32>
    %347 = vector.shape_cast %346 : vector<16xf32> to vector<16x1xf32>
    %348 = vector.broadcast %347 : vector<16x1xf32> to vector<16x128xf32>
    %349 = arith.cmpf oeq, %345, %348 : vector<16x128xf32>
    %c128_i32_111 = arith.constant 128 : i32
    %350 = vector.broadcast %c128_i32_111 : i32 to vector<16x128xi32>
    %351 = arith.select %349, %8, %350 : vector<16x128xi1>, vector<16x128xi32>
    %cst_112 = arith.constant dense<2147483647> : vector<16xi32>
    %352 = vector.multi_reduction <minsi>, %351, %cst_112 [1] : vector<16x128xi32> to vector<16xi32>
    %353 = vector.shape_cast %352 : vector<16xi32> to vector<16x1xi32>
    %354 = vector.broadcast %353 : vector<16x1xi32> to vector<16x128xi32>
    %355 = arith.cmpi eq, %8, %354 : vector<16x128xi32>
    %cst_113 = arith.constant -3.40282347E+38 : f32
    %356 = vector.broadcast %cst_113 : f32 to vector<16x128xf32>
    %357 = arith.select %355, %356, %345 : vector<16x128xi1>, vector<16x128xf32>
    %cst_114 = arith.constant dense<0xFF800000> : vector<16xf32>
    %358 = vector.multi_reduction <maximumf>, %357, %cst_114 [1] : vector<16x128xf32> to vector<16xf32>
    %359 = vector.shape_cast %358 : vector<16xf32> to vector<16x1xf32>
    %360 = vector.broadcast %359 : vector<16x1xf32> to vector<16x128xf32>
    %361 = arith.cmpf oeq, %357, %360 : vector<16x128xf32>
    %c128_i32_115 = arith.constant 128 : i32
    %362 = vector.broadcast %c128_i32_115 : i32 to vector<16x128xi32>
    %363 = arith.select %361, %8, %362 : vector<16x128xi1>, vector<16x128xi32>
    %cst_116 = arith.constant dense<2147483647> : vector<16xi32>
    %364 = vector.multi_reduction <minsi>, %363, %cst_116 [1] : vector<16x128xi32> to vector<16xi32>
    %365 = vector.shape_cast %364 : vector<16xi32> to vector<16x1xi32>
    %366 = vector.broadcast %365 : vector<16x1xi32> to vector<16x128xi32>
    %367 = arith.cmpi eq, %8, %366 : vector<16x128xi32>
    %cst_117 = arith.constant -3.40282347E+38 : f32
    %368 = vector.broadcast %cst_117 : f32 to vector<16x128xf32>
    %369 = arith.select %367, %368, %357 : vector<16x128xi1>, vector<16x128xf32>
    %cst_118 = arith.constant dense<0xFF800000> : vector<16xf32>
    %370 = vector.multi_reduction <maximumf>, %369, %cst_118 [1] : vector<16x128xf32> to vector<16xf32>
    %371 = vector.shape_cast %370 : vector<16xf32> to vector<16x1xf32>
    %372 = vector.broadcast %371 : vector<16x1xf32> to vector<16x128xf32>
    %373 = arith.cmpf oeq, %369, %372 : vector<16x128xf32>
    %c128_i32_119 = arith.constant 128 : i32
    %374 = vector.broadcast %c128_i32_119 : i32 to vector<16x128xi32>
    %375 = arith.select %373, %8, %374 : vector<16x128xi1>, vector<16x128xi32>
    %cst_120 = arith.constant dense<2147483647> : vector<16xi32>
    %376 = vector.multi_reduction <minsi>, %375, %cst_120 [1] : vector<16x128xi32> to vector<16xi32>
    %377 = vector.shape_cast %376 : vector<16xi32> to vector<16x1xi32>
    %378 = vector.broadcast %377 : vector<16x1xi32> to vector<16x128xi32>
    %379 = arith.cmpi eq, %8, %378 : vector<16x128xi32>
    %cst_121 = arith.constant -3.40282347E+38 : f32
    %380 = vector.broadcast %cst_121 : f32 to vector<16x128xf32>
    %381 = arith.select %379, %380, %369 : vector<16x128xi1>, vector<16x128xf32>
    %cst_122 = arith.constant dense<0xFF800000> : vector<16xf32>
    %382 = vector.multi_reduction <maximumf>, %381, %cst_122 [1] : vector<16x128xf32> to vector<16xf32>
    %383 = vector.shape_cast %382 : vector<16xf32> to vector<16x1xf32>
    %384 = vector.broadcast %383 : vector<16x1xf32> to vector<16x128xf32>
    %385 = arith.cmpf oeq, %381, %384 : vector<16x128xf32>
    %c128_i32_123 = arith.constant 128 : i32
    %386 = vector.broadcast %c128_i32_123 : i32 to vector<16x128xi32>
    %387 = arith.select %385, %8, %386 : vector<16x128xi1>, vector<16x128xi32>
    %cst_124 = arith.constant dense<2147483647> : vector<16xi32>
    %388 = vector.multi_reduction <minsi>, %387, %cst_124 [1] : vector<16x128xi32> to vector<16xi32>
    %389 = vector.shape_cast %388 : vector<16xi32> to vector<16x1xi32>
    %390 = vector.broadcast %389 : vector<16x1xi32> to vector<16x128xi32>
    %391 = arith.cmpi eq, %8, %390 : vector<16x128xi32>
    %cst_125 = arith.constant -3.40282347E+38 : f32
    %392 = vector.broadcast %cst_125 : f32 to vector<16x128xf32>
    %393 = arith.select %391, %392, %381 : vector<16x128xi1>, vector<16x128xf32>
    %cst_126 = arith.constant dense<0xFF800000> : vector<16xf32>
    %394 = vector.multi_reduction <maximumf>, %393, %cst_126 [1] : vector<16x128xf32> to vector<16xf32>
    %395 = vector.shape_cast %394 : vector<16xf32> to vector<16x1xf32>
    %396 = vector.broadcast %395 : vector<16x1xf32> to vector<16x128xf32>
    %397 = arith.cmpf oeq, %393, %396 : vector<16x128xf32>
    %c128_i32_127 = arith.constant 128 : i32
    %398 = vector.broadcast %c128_i32_127 : i32 to vector<16x128xi32>
    %399 = arith.select %397, %8, %398 : vector<16x128xi1>, vector<16x128xi32>
    %cst_128 = arith.constant dense<2147483647> : vector<16xi32>
    %400 = vector.multi_reduction <minsi>, %399, %cst_128 [1] : vector<16x128xi32> to vector<16xi32>
    %401 = vector.shape_cast %400 : vector<16xi32> to vector<16x1xi32>
    %402 = vector.broadcast %401 : vector<16x1xi32> to vector<16x128xi32>
    %403 = arith.cmpi eq, %8, %402 : vector<16x128xi32>
    %cst_129 = arith.constant -3.40282347E+38 : f32
    %404 = vector.broadcast %cst_129 : f32 to vector<16x128xf32>
    %405 = arith.select %403, %404, %393 : vector<16x128xi1>, vector<16x128xf32>
    %cst_130 = arith.constant dense<0xFF800000> : vector<16xf32>
    %406 = vector.multi_reduction <maximumf>, %405, %cst_130 [1] : vector<16x128xf32> to vector<16xf32>
    %407 = vector.shape_cast %406 : vector<16xf32> to vector<16x1xf32>
    %408 = vector.broadcast %407 : vector<16x1xf32> to vector<16x128xf32>
    %409 = arith.cmpf oeq, %405, %408 : vector<16x128xf32>
    %c128_i32_131 = arith.constant 128 : i32
    %410 = vector.broadcast %c128_i32_131 : i32 to vector<16x128xi32>
    %411 = arith.select %409, %8, %410 : vector<16x128xi1>, vector<16x128xi32>
    %cst_132 = arith.constant dense<2147483647> : vector<16xi32>
    %412 = vector.multi_reduction <minsi>, %411, %cst_132 [1] : vector<16x128xi32> to vector<16xi32>
    %413 = vector.shape_cast %412 : vector<16xi32> to vector<16x1xi32>
    %414 = vector.broadcast %413 : vector<16x1xi32> to vector<16x128xi32>
    %415 = arith.cmpi eq, %8, %414 : vector<16x128xi32>
    %cst_133 = arith.constant -3.40282347E+38 : f32
    %416 = vector.broadcast %cst_133 : f32 to vector<16x128xf32>
    %417 = arith.select %415, %416, %405 : vector<16x128xi1>, vector<16x128xf32>
    %cst_134 = arith.constant dense<0xFF800000> : vector<16xf32>
    %418 = vector.multi_reduction <maximumf>, %417, %cst_134 [1] : vector<16x128xf32> to vector<16xf32>
    %419 = vector.shape_cast %418 : vector<16xf32> to vector<16x1xf32>
    %420 = vector.broadcast %419 : vector<16x1xf32> to vector<16x128xf32>
    %421 = arith.cmpf oeq, %417, %420 : vector<16x128xf32>
    %c128_i32_135 = arith.constant 128 : i32
    %422 = vector.broadcast %c128_i32_135 : i32 to vector<16x128xi32>
    %423 = arith.select %421, %8, %422 : vector<16x128xi1>, vector<16x128xi32>
    %cst_136 = arith.constant dense<2147483647> : vector<16xi32>
    %424 = vector.multi_reduction <minsi>, %423, %cst_136 [1] : vector<16x128xi32> to vector<16xi32>
    %425 = vector.shape_cast %424 : vector<16xi32> to vector<16x1xi32>
    %426 = vector.broadcast %425 : vector<16x1xi32> to vector<16x128xi32>
    %427 = arith.cmpi eq, %8, %426 : vector<16x128xi32>
    %cst_137 = arith.constant -3.40282347E+38 : f32
    %428 = vector.broadcast %cst_137 : f32 to vector<16x128xf32>
    %429 = arith.select %427, %428, %417 : vector<16x128xi1>, vector<16x128xf32>
    %430 = arith.cmpf one, %429, %333 : vector<16x128xf32>
    %431 = vector.broadcast %335 : vector<16x1xf32> to vector<16x128xf32>
    %432 = arith.subf %333, %431 : vector<16x128xf32>
    %cst_138 = arith.constant -3.40282347E+38 : f32
    %433 = vector.broadcast %cst_138 : f32 to vector<16x128xf32>
    %434 = arith.select %430, %432, %433 : vector<16x128xi1>, vector<16x128xf32>
    %435 = math.exp %434 : vector<16x128xf32>
    %cst_139 = arith.constant dense<0.000000e+00> : vector<16xf32>
    %436 = vector.multi_reduction <add>, %435, %cst_139 [1] : vector<16x128xf32> to vector<16xf32>
    %437 = vector.shape_cast %436 : vector<16xf32> to vector<16x1xf32>
    %438 = tpu.reciprocal %437 {approx = true} : vector<16x1xf32> -> vector<16x1xf32>
    %439 = vector.broadcast %438 : vector<16x1xf32> to vector<16x128xf32>
    %440 = arith.mulf %435, %439 : vector<16x128xf32>
    %441 = tpu.concatenate %116, %224, %332, %440 in 1 : vector<16x128xf32>, vector<16x128xf32>, vector<16x128xf32>, vector<16x128xf32> -> vector<16x512xf32>
    %c0_140 = arith.constant 0 : index
    %c0_141 = arith.constant 0 : index
    %442 = vector.load %arg4[%c0_140, %c0_141] : memref<512x128xf32, #tpu.memory_space<vmem>>, vector<512x128xf32>
    %cst_142 = arith.constant dense<0.000000e+00> : vector<16x128xf32>
    %443 = tpu.matmul %441, %442, %cst_142 {dimension_numbers = #tpu.dot_dimension_numbers<[1], [0], [0], [1], [0, 0, 1, 1], [], []>} : vector<16x512xf32>, vector<512x128xf32>, vector<16x128xf32> -> vector<16x128xf32>
    %444 = arith.addf %443, %7 : vector<16x128xf32>
    %c0_143 = arith.constant 0 : index
    %c0_144 = arith.constant 0 : index
    %445 = vector.load %arg5[%c0_143, %c0_144] : memref<16x128xf32, #tpu.memory_space<vmem>>, vector<16x128xf32>
    tpu.vector_store %arg5[%c0_143, %c0_144], %444 {strides = array<i32>} : memref<16x128xf32, #tpu.memory_space<vmem>>, vector<16x128xf32>,
    return
  }
  func.func @transform_0(%arg0: i32) -> (i32, i32) {
    %c0_i32 = arith.constant 0 : i32
    %c0_i32_0 = arith.constant 0 : i32
    return %arg0, %c0_i32 : i32, i32
  }
  func.func @transform_1(%arg0: i32) -> (i32, i32) {
    %c0_i32 = arith.constant 0 : i32
    %c0_i32_0 = arith.constant 0 : i32
    %c0_i32_1 = arith.constant 0 : i32
    return %c0_i32, %c0_i32_0 : i32, i32
  }
  func.func @transform_2(%arg0: i32) -> (i32, i32) {
    %c0_i32 = arith.constant 0 : i32
    %c0_i32_0 = arith.constant 0 : i32
    %c0_i32_1 = arith.constant 0 : i32
    return %c0_i32, %c0_i32_0 : i32, i32
  }
  func.func @transform_3(%arg0: i32) -> (i32, i32) {
    %c0_i32 = arith.constant 0 : i32
    %c0_i32_0 = arith.constant 0 : i32
    %c0_i32_1 = arith.constant 0 : i32
    return %c0_i32, %c0_i32_0 : i32, i32
  }
  func.func @transform_4(%arg0: i32) -> (i32, i32) {
    %c0_i32 = arith.constant 0 : i32
    %c0_i32_0 = arith.constant 0 : i32
    return %arg0, %c0_i32 : i32, i32
  }
}

</mosaic_0001>

<bundles_post_ra>
// kernel: hashing_symbol_forward_both.1
= control target key start
LH: loop header
LB: loop body
LE: loop exit
PB: predicated region body
PF: predicated region fallthrough
CT: control target
= control target key end

     0   :  { %9 = vsyncpa [#allocation3], 0  ;;  %s2543_s0 = inlined_call_operand.hbm [shape: f32[16,32], index: 0, kind: input, shape index: {}]   ;;  %s2544_s1 = inlined_call_operand.hbm [shape: f32[32,640], index: 1, kind: input, shape index: {}]   ;;  %s2545_s2 = inlined_call_operand.hbm [shape: f32[1,640], index: 2, kind: input, shape index: {}]   ;;  %s2546_s3 = inlined_call_operand.hbm [shape: f32[512,128], index: 3, kind: input, shape index: {}]   ;;  %s2547_s4 = inlined_call_operand.vmem [shape: f32[16,128], index: 4, kind: output, shape index: {}]  }
   0x1   :  { %10 = vsyncpa [#allocation5], 0  ;;  %s29_s17 = sshll.u32 %s2544_s1, 4  ;;  %s30_s17 = int_to_ptr.hbm [resolvable:$true] %s29_s17 }
   0x2   :  { %11 = vsyncpa [#allocation8], 0  ;;  %s1912_s18 = smov [#allocation4]   ;;  %s16_s22 = sshll.u32 %s2543_s0, 4  ;;  %s17_s22 = int_to_ptr.hbm [resolvable:$true] %s16_s22 }
   0x3   :  { %s31_s19 = sshll.u32 %s1912_s18, 4  ;;  %s1913_s23 = smov 640   ;;  %s32_s19 = int_to_ptr.vmem [resolvable:$true] %s31_s19 }
   0x4   :  { %s1914_s24 = smov 40   ;;  %s1915_s25 = smov [#allocation2]  }
   0x5   :  { %37 = dma.hbm_to_vmem [thread:$0]  %s30_s17, 2560, %s32_s19, [#allocation5], %s1913_s23, %s1913_s23, %s1914_s24  }
   0x6   :  { %s18_s26 = sshll.u32 %s1915_s25, 4  ;;  %s1916_s27 = smov 128   ;;  %s19_s26 = int_to_ptr.vmem [resolvable:$true] %s18_s26 }
   0x7   :  { %s1917_s28 = smov 8   ;;  %s43_s30 = sshll.u32 %s2545_s2, 4  ;;  %s44_s30 = int_to_ptr.hbm [resolvable:$true] %s43_s30 }
   0x8   :  { %24 = dma.hbm_to_vmem [thread:$0]  %s17_s22, 256, %s19_s26, [#allocation3], %s1916_s27, %s1916_s27, %s1917_s28  }
   0x9   :  { %s1918_s5 = smov [#allocation6]   ;;  %s53_s8 = sshll.u32 %s2546_s3, 4  ;;  %s54_s8 = int_to_ptr.hbm [resolvable:$true] %s53_s8 }
   0xa   :  { %s45_s6 = sshll.u32 %s1918_s5, 4  ;;  %s1919_s9 = smov [#allocation7]   ;;  %s46_s6 = int_to_ptr.vmem [resolvable:$true] %s45_s6 }
   0xb   :  { %48 = dma.hbm_to_vmem [thread:$0]  %s44_s30, 80, %s46_s6, [#allocation5]  }
   0xc   :  { %s55_s10 = sshll.u32 %s1919_s9, 4  ;;  %s56_s10 = int_to_ptr.vmem [resolvable:$true] %s55_s10 }
   0xd   :  { %61 = dma.hbm_to_vmem [thread:$0]  %s54_s8, 8192, %s56_s10, [#allocation8], %s1916_s27, %s1916_s27, %s1917_s28  }
   0xe   :  { %1906 = dma.done.wait [#allocation3], 256  }
   0xf   :  { %1907 = vsyncadd [#allocation3], 4294967040 }
  0x10   :  { %1908 = dma.done.wait [#allocation5], 2640  }
  0x11   :  { %1909 = vsyncadd [#allocation5], 4294964656 }
  0x12   :  { %1910 = dma.done.wait [#allocation8], 8192  }
  0x13   :  { %1911 = vsyncadd [#allocation8], 4294959104  ;;  %v95_v0 = vld [vmem:[#allocation4 + $0x78] sm:$0xff]  ;;  %v97_v1 = vld [vmem:[#allocation4 + $0x88] sm:$0xff]  ;;  %vm112_vm0 = vcmask 261120   ;;  %v234_v39 = vlaneseq }
  0x14   :  { %v90_v2 = vld [vmem:[#allocation4 + $0x50] sm:$0xff]  ;;  %131 = vmatpush.msra.mxu0 %v95_v0  ;;  %1763 = vmatpush.msra.mxu1 %v95_v0  ;;  %v92_v3 = vld [vmem:[#allocation4 + $0x60] sm:$0xff]  ;;  %v85_v4 = vld [vmem:[#allocation4 + $0x28] sm:$0xff] }
  0x15   :  { %177 = vmatpush.msra.mxu2 %v97_v1  ;;  %v87_v5 = vld [vmem:[#allocation4 + $0x38] sm:$0xff]  ;;  %v80_v6 = vld [vmem:[#allocation4] sm:$0xff]  ;;  %v98_v7 = vld [vmem:[#allocation4 + $0x90] sm:$0xff]  ;;  %v1989_v40 = vand.u32 127, %v234_v39 }
  0x16   :  { %132 = vmatpush.msra.mxu0 %v90_v2  ;;  %1764 = vmatpush.msra.mxu1 %v90_v2  ;;  %v82_v8 = vld [vmem:[#allocation4 + $0x10] sm:$0xff]  ;;  %v79_v10 = vld [vmem:[#allocation2 + $0x8] sm:$0xff]  ;;  %v96_v11 = vld [vmem:[#allocation4 + $0x80] sm:$0xff] }
  0x17   :  { %178 = vmatpush.msra.mxu2 %v92_v3  ;;  %v78_v9 = vld [vmem:[#allocation2] sm:$0xff]  ;;  %200 = vmatpush.msra.mxu3 %v98_v7  ;;  %v93_v12 = vld [vmem:[#allocation4 + $0x68] sm:$0xff]  ;;  %v91_v13 = vld [vmem:[#allocation4 + $0x58] sm:$0xff] }
  0x18   :  { %133 = vmatpush.msra.mxu0 %v85_v4  ;;  %1765 = vmatpush.msra.mxu1 %v85_v4  ;;  %v88_v14 = vld [vmem:[#allocation4 + $0x40] sm:$0xff]  ;;  %v86_v15 = vld [vmem:[#allocation4 + $0x30] sm:$0xff]  ;;  %v83_v16 = vld [vmem:[#allocation4 + $0x18] sm:$0xff] }
  0x19   :  { %179 = vmatpush.msra.mxu2 %v87_v5  ;;  %201 = vmatpush.msra.mxu3 %v93_v12  ;;  %v81_v17 = vld [vmem:[#allocation4 + $0x8] sm:$0xff]  ;;  %v100_v18 = vld [vmem:[#allocation6] sm:$0x1f] }
  0x1a   :  { %134 = vmatpush.msra.mxu0 %v80_v6  ;;  %1766 = vmatpush.msra.mxu1 %v80_v6  ;;  %v102_v19 = vperm.slane %v100_v18, 0  ;;  %v103_v23 = vperm.slane %v100_v18, 1  ;;  %v104_v28 = vperm.slane %v100_v18, 2  ;;  %v105_v34 = vperm.slane %v100_v18, 3 }
  0x1b   :  { %180 = vmatpush.msra.mxu2 %v82_v8  ;;  %1753 = vmatmul.msk.f32.vlgmr.msra.gmra.mxu0 %vm112_vm0, %v78_v9 }
  0x1c   :  { %1754 = vmatmul.msk.f32.vlgmr.msra.gmra.mxu1 %vm112_vm0, %v79_v10  ;;  %1757 = vmatmul.msk.f32.vlgmr.msra.gmra.mxu2 %vm112_vm0, %v78_v9 }
  0x1d   :  { %154 = vmatpush.msrb.mxu1 %v96_v11  ;;  %202 = vmatpush.msra.mxu3 %v88_v14 }
  0x1f   :  { %155 = vmatpush.msrb.mxu1 %v91_v13  ;;  %203 = vmatpush.msra.mxu3 %v83_v16 }
  0x20   :  { %1759 = vmatmul.msk.f32.vlgmr.msra.gmra.mxu3 %vm112_vm0, %v78_v9 }
  0x21   :  { %156 = vmatpush.msrb.mxu1 %v86_v15 }
  0x23   :  { %157 = vmatpush.msrb.mxu1 %v81_v17 }
  0x24   :  { %1755 = vmatmul.msk.f32.vlgmr.msrb.gmra.mxu1 %vm112_vm0, %v78_v9  ;;  %1758 = vmatmul.msk.f32.gmra.mxu2 %vm112_vm0, %v79_v10 }
  0x28   :  { %1760 = vmatmul.msk.f32.gmra.mxu3 %vm112_vm0, %v79_v10 }
  0x2c   :  { %1756 = vmatmul.msk.f32.gmra.mxu1 %vm112_vm0, %v79_v10 }
  0x98   :  { %v136_v20 = vpop.f32.mrf.mxu0 }
  0x99   :  { %v1965_v21 = vadd.f32 %v136_v20, %v102_v19  ;;  %v139_v22 = vpop.f32.mrf.mxu1 }
  0x9a   :  { %v1984_v38 = vadd.f32 %v139_v22, %v102_v19 }
  0x9b   :  { %236 = vmax.xlane.f32.xlu1 %v1965_v21 }
  0x9f   :  { %v182_v24 = vpop.f32.mrf.mxu2 }
  0xa0   :  { %v1973_v32 = vadd.f32 %v182_v24, %v104_v28 }
  0xa1   :  { %v159_v25 = vpop.f32.mrf.mxu1 }
  0xa2   :  { %v1968_v26 = vadd.f32 %v159_v25, %v103_v23 }
  0xa3   :  { %v205_v27 = vpop.f32.mrf.mxu3 }
  0xa4   :  { %574 = vmax.xlane.f32.xlu0 %v1968_v26  ;;  %v1980_v36 = vadd.f32 %v205_v27, %v105_v34 }
  0xa7   :  { %v185_v29 = vpop.f32.mrf.mxu2 }
  0xa8   :  { %v1971_v30 = vadd.f32 %v185_v29, %v104_v28 }
  0xa9   :  { %v162_v31 = vpop.f32.mrf.mxu1 }
  0xaa   :  { %v1975_v33 = vadd.f32 %v162_v31, %v103_v23  ;;  %914 = vmax.xlane.f32.xlu2 %v1971_v30 }
  0xab   :  { %v208_v35 = vpop.f32.mrf.mxu3 }
  0xac   :  { %912 = vmax.xlane.f32.xlu0 %v1973_v32  ;;  %576 = vmax.xlane.f32.xlu1 %v1975_v33  ;;  %v1982_v37 = vadd.f32 %v208_v35, %v105_v34 }
  0xb2   :  { %1250 = vmax.xlane.f32.xlu2 %v1980_v36 }
  0xb4   :  { %238 = vmax.xlane.f32.xlu0 %v1984_v38  ;;  %1252 = vmax.xlane.f32.xlu1 %v1982_v37 }
 0x10e   :  { %v1991_v41 = vpop.xlane.xlu1 %236 }
 0x10f   :  { %vm240_vm1 = vcmp.eq.f32.partialorder %v1965_v21, %v1991_v41 }
 0x110   :  { %v242_v42 = vsel %vm240_vm1, %v1989_v40, 128 }
 0x111   :  { %v245_v43 = vshra.s32 %v242_v42, 16  ;;  %v244_v9 = vand.u32 65535, %v242_v42 }
 0x113   :  { %v247_v44 = vcvt.s32.f32 %v245_v43  ;;  %v246_v11 = vcvt.s32.f32 %v244_v9 }
 0x115   :  { %248 = vmin.xlane.f32.xlu1 %v247_v44 }
 0x117   :  { %v1996_v45 = vpop.xlane.xlu0 %574 }
 0x118   :  { %vm578_vm2 = vcmp.eq.f32.partialorder %v1968_v26, %v1996_v45 }
 0x119   :  { %v580_v46 = vsel %vm578_vm2, %v1989_v40, 128 }
 0x11a   :  { %v583_v47 = vshra.s32 %v580_v46, 16  ;;  %v582_v13 = vand.u32 65535, %v580_v46 }
 0x11c   :  { %v585_v48 = vcvt.s32.f32 %v583_v47  ;;  %v584_v15 = vcvt.s32.f32 %v582_v13 }
 0x11d   :  { %v2001_v49 = vpop.xlane.xlu2 %914 }
 0x11e   :  { %586 = vmin.xlane.f32.xlu2 %v585_v48  ;;  %vm917_vm5 = vcmp.eq.f32.partialorder %v1971_v30, %v2001_v49 }
 0x11f   :  { %v2003_v50 = vpop.xlane.xlu0 %912  ;;  %v2005_v51 = vpop.xlane.xlu1 %576  ;;  %v919_v59 = vsel %vm917_vm5, %v1989_v40, 128 }
 0x120   :  { %vm916_vm3 = vcmp.eq.f32.partialorder %v1973_v32, %v2003_v50  ;;  %vm579_vm4 = vcmp.eq.f32.partialorder %v1975_v33, %v2005_v51  ;;  %v935_v63 = vshra.s32 %v919_v59, 16  ;;  %v934_v28 = vand.u32 65535, %v919_v59 }
 0x121   :  { %v918_v52 = vsel %vm916_vm3, %v1989_v40, 128  ;;  %v581_v53 = vsel %vm579_vm4, %v1989_v40, 128 }
 0x122   :  { %v921_v54 = vshra.s32 %v918_v52, 16  ;;  %v597_v55 = vshra.s32 %v581_v53, 16  ;;  %v937_v4 = vcvt.s32.f32 %v935_v63  ;;  %v920_v17 = vand.u32 65535, %v918_v52 }
 0x123   :  { %v596_v18 = vand.u32 65535, %v581_v53  ;;  %v936_v42 = vcvt.s32.f32 %v934_v28 }
 0x124   :  { %v923_v56 = vcvt.s32.f32 %v921_v54  ;;  %v599_v57 = vcvt.s32.f32 %v597_v55  ;;  %v922_v22 = vcvt.s32.f32 %v920_v17 }
 0x125   :  { %v2015_v58 = vpop.xlane.xlu2 %1250  ;;  %v598_v23 = vcvt.s32.f32 %v596_v18 }
 0x126   :  { %vm1254_vm6 = vcmp.eq.f32.partialorder %v1980_v36, %v2015_v58  ;;  %924 = vmin.xlane.f32.xlu0 %v923_v56  ;;  %600 = vmin.xlane.f32.xlu2 %v599_v57 }
 0x127   :  { %v2020_v60 = vpop.xlane.xlu0 %238  ;;  %v2022_v61 = vpop.xlane.xlu1 %1252  ;;  %v1256_v62 = vsel %vm1254_vm6, %v1989_v40, 128 }
 0x128   :  { %vm241_vm7 = vcmp.eq.f32.partialorder %v1984_v38, %v2020_v60  ;;  %v1259_v0 = vshra.s32 %v1256_v62, 16  ;;  %vm1255_vm8 = vcmp.eq.f32.partialorder %v1982_v37, %v2022_v61  ;;  %v1258_v27 = vand.u32 65535, %v1256_v62 }
 0x129   :  { %v243_v1 = vsel %vm241_vm7, %v1989_v40, 128  ;;  %v1257_v6 = vsel %vm1255_vm8, %v1989_v40, 128 }
 0x12a   :  { %v259_v2 = vshra.s32 %v243_v1, 16  ;;  %v1261_v3 = vcvt.s32.f32 %v1259_v0  ;;  %v1273_v7 = vshra.s32 %v1257_v6, 16  ;;  %v258_v29 = vand.u32 65535, %v243_v1 }
 0x12b   :  { %v1260_v34 = vcvt.s32.f32 %v1258_v27 }
 0x12c   :  { %v261_v5 = vcvt.s32.f32 %v259_v2  ;;  %1262 = vmin.xlane.f32.xlu1 %v1261_v3  ;;  %v1275_v8 = vcvt.s32.f32 %v1273_v7 }
 0x12e   :  { %938 = vmin.xlane.f32.xlu0 %v937_v4  ;;  %262 = vmin.xlane.f32.xlu2 %v261_v5 }
 0x136   :  { %1276 = vmin.xlane.f32.xlu0 %v1275_v8 }
 0x188   :  { %v249_v10 = vpop.xlane.xlu1 %248 }
 0x189   :  { %vm250_vm9 = vcmp.eq.f32.partialorder %v247_v44, %v249_v10  ;;  %v260_v44 = vcvt.s32.f32 %v258_v29  ;;  %v255_v55 = vcvt.f32.s32 %v249_v10 }
 0x18a   :  { %v251_v12 = vsel %vm250_vm9, %v246_v11, inf }
 0x18b   :  { %252 = vmin.xlane.f32.xlu0 %v251_v12 }
 0x191   :  { %v587_v14 = vpop.xlane.xlu2 %586 }
 0x192   :  { %vm588_vm10 = vcmp.eq.f32.partialorder %v585_v48, %v587_v14  ;;  %v1272_v48 = vand.u32 65535, %v1257_v6  ;;  %v593_v63 = vcvt.f32.s32 %v587_v14 }
 0x193   :  { %v589_v16 = vsel %vm588_vm10, %v584_v15, inf }
 0x194   :  { %590 = vmin.xlane.f32.xlu1 %v589_v16  ;;  %v1274_v53 = vcvt.s32.f32 %v1272_v48  ;;  %v594_v2 = vshll.u32 %v593_v63, 16 }
 0x199   :  { %v925_v19 = vpop.xlane.xlu0 %924  ;;  %v601_v20 = vpop.xlane.xlu2 %600 }
 0x19a   :  { %vm926_vm11 = vcmp.eq.f32.partialorder %v923_v56, %v925_v19  ;;  %vm602_vm12 = vcmp.eq.f32.partialorder %v599_v57, %v601_v20  ;;  %v256_v57 = vshll.u32 %v255_v55, 16  ;;  %v607_v6 = vcvt.f32.s32 %v601_v20 }
 0x19b   :  { %v927_v24 = vsel %vm926_vm11, %v922_v22, inf  ;;  %v603_v25 = vsel %vm602_vm12, %v598_v23, inf }
 0x19c   :  { %928 = vmin.xlane.f32.xlu2 %v927_v24  ;;  %604 = vmin.xlane.f32.xlu1 %v603_v25  ;;  %v608_v11 = vshll.u32 %v607_v6, 16 }
 0x19f   :  { %v1263_v31 = vpop.xlane.xlu1 %1262 }
 0x1a0   :  { %vm1264_vm13 = vcmp.eq.f32.partialorder %v1261_v3, %v1263_v31  ;;  %v1269_v16 = vcvt.f32.s32 %v1263_v31 }
 0x1a1   :  { %v939_v35 = vpop.xlane.xlu0 %938  ;;  %v263_v39 = vpop.xlane.xlu2 %262  ;;  %v1265_v43 = vsel %vm1264_vm13, %v1260_v34, inf }
 0x1a2   :  { %vm940_vm14 = vcmp.eq.f32.partialorder %v937_v4, %v939_v35  ;;  %1266 = vmin.xlane.f32.xlu0 %v1265_v43  ;;  %vm264_vm15 = vcmp.eq.f32.partialorder %v261_v5, %v263_v39  ;;  %v931_v5 = vcvt.f32.s32 %v925_v19  ;;  %v945_v17 = vcvt.f32.s32 %v939_v35 }
 0x1a3   :  { %v941_v46 = vsel %vm940_vm14, %v936_v42, inf  ;;  %v265_v47 = vsel %vm264_vm15, %v260_v44, inf  ;;  %v269_v18 = vcvt.f32.s32 %v263_v39  ;;  %v1270_v23 = vshll.u32 %v1269_v16, 16 }
 0x1a4   :  { %942 = vmin.xlane.f32.xlu2 %v941_v46  ;;  %266 = vmin.xlane.f32.xlu1 %v265_v47  ;;  %v932_v10 = vshll.u32 %v931_v5, 16  ;;  %v946_v27 = vshll.u32 %v945_v17, 16 }
 0x1a5   :  { %v270_v31 = vshll.u32 %v269_v18, 16 }
 0x1a9   :  { %v2031_v52 = vpop.xlane.xlu0 %1276 }
 0x1aa   :  { %vm1278_vm1 = vcmp.eq.f32.partialorder %v1275_v8, %v2031_v52  ;;  %v1283_v43 = vcvt.f32.s32 %v2031_v52 }
 0x1ab   :  { %v1279_v54 = vsel %vm1278_vm1, %v1274_v53, inf }
 0x1ac   :  { %1280 = vmin.xlane.f32.xlu2 %v1279_v54  ;;  %v1284_v52 = vshll.u32 %v1283_v43, 16 }
 0x1fe   :  { %v253_v56 = vpop.xlane.xlu0 %252 }
 0x1ff   :  { %v254_v59 = vcvt.f32.s32 %v253_v56 }
 0x201   :  { %v257_v62 = vadd.s32 %v256_v57, %v254_v59 }
 0x203   :  { %vm272_vm2 = vcmp.eq.s32.totalorder %v1989_v40, %v257_v62 }
 0x204   :  { %v2036_v0 = vsel %vm272_vm2, -3.4028235e+38, %v1965_v21 }
 0x205   :  { %276 = vmax.xlane.f32.xlu2 %v2036_v0 }
 0x207   :  { %v591_v1 = vpop.xlane.xlu1 %590 }
 0x208   :  { %v592_v3 = vcvt.f32.s32 %v591_v1 }
 0x20a   :  { %v595_v4 = vadd.s32 %v594_v2, %v592_v3 }
 0x20c   :  { %vm610_vm3 = vcmp.eq.s32.totalorder %v1989_v40, %v595_v4 }
 0x20d   :  { %v2041_v7 = vsel %vm610_vm3, -3.4028235e+38, %v1968_v26 }
 0x20e   :  { %614 = vmax.xlane.f32.xlu0 %v2041_v7 }
 0x20f   :  { %v929_v8 = vpop.xlane.xlu2 %928  ;;  %v605_v9 = vpop.xlane.xlu1 %604 }
 0x210   :  { %v930_v12 = vcvt.f32.s32 %v929_v8  ;;  %v606_v13 = vcvt.f32.s32 %v605_v9 }
 0x212   :  { %v933_v14 = vadd.s32 %v932_v10, %v930_v12  ;;  %v609_v15 = vadd.s32 %v608_v11, %v606_v13 }
 0x214   :  { %vm948_vm4 = vcmp.eq.s32.totalorder %v1989_v40, %v933_v14  ;;  %vm611_vm5 = vcmp.eq.s32.totalorder %v1989_v40, %v609_v15 }
 0x215   :  { %v2047_v19 = vsel %vm948_vm4, -3.4028235e+38, %v1973_v32  ;;  %v2050_v20 = vsel %vm611_vm5, -3.4028235e+38, %v1975_v33  ;;  %v1267_v22 = vpop.xlane.xlu0 %1266 }
 0x216   :  { %952 = vmax.xlane.f32.xlu1 %v2047_v19  ;;  %616 = vmax.xlane.f32.xlu0 %v2050_v20  ;;  %v1268_v24 = vcvt.f32.s32 %v1267_v22 }
 0x217   :  { %v943_v25 = vpop.xlane.xlu2 %942  ;;  %v267_v29 = vpop.xlane.xlu1 %266 }
 0x218   :  { %v944_v28 = vcvt.f32.s32 %v943_v25  ;;  %v1271_v34 = vadd.s32 %v1270_v23, %v1268_v24  ;;  %v268_v35 = vcvt.f32.s32 %v267_v29 }
 0x21a   :  { %v947_v39 = vadd.s32 %v946_v27, %v944_v28  ;;  %v271_v42 = vadd.s32 %v270_v31, %v268_v35  ;;  %vm1286_vm6 = vcmp.eq.s32.totalorder %v1989_v40, %v1271_v34 }
 0x21b   :  { %v2057_v44 = vsel %vm1286_vm6, -3.4028235e+38, %v1980_v36 }
 0x21c   :  { %vm949_vm7 = vcmp.eq.s32.totalorder %v1989_v40, %v947_v39  ;;  %1290 = vmax.xlane.f32.xlu2 %v2057_v44  ;;  %vm273_vm8 = vcmp.eq.s32.totalorder %v1989_v40, %v271_v42 }
 0x21d   :  { %v2062_v46 = vsel %vm949_vm7, -3.4028235e+38, %v1971_v30  ;;  %v2067_v47 = vsel %vm273_vm8, -3.4028235e+38, %v1984_v38 }
 0x21e   :  { %954 = vmax.xlane.f32.xlu1 %v2062_v46  ;;  %278 = vmax.xlane.f32.xlu0 %v2067_v47 }
 0x21f   :  { %v1281_v48 = vpop.xlane.xlu2 %1280 }
 0x220   :  { %v1282_v53 = vcvt.f32.s32 %v1281_v48 }
 0x222   :  { %v1285_v54 = vadd.s32 %v1284_v52, %v1282_v53 }
 0x224   :  { %vm1287_vm9 = vcmp.eq.s32.totalorder %v1989_v40, %v1285_v54 }
 0x225   :  { %v2072_v55 = vsel %vm1287_vm9, -3.4028235e+38, %v1982_v37 }
 0x226   :  { %1292 = vmax.xlane.f32.xlu1 %v2072_v55 }
 0x278   :  { %v277_v56 = vpop.xlane.xlu2 %276 }
 0x279   :  { %vm280_vm10 = vcmp.eq.f32.partialorder %v2036_v0, %v277_v56 }
 0x27a   :  { %v282_v57 = vsel %vm280_vm10, %v1989_v40, 128 }
 0x27b   :  { %v285_v59 = vshra.s32 %v282_v57, 16  ;;  %v284_v39 = vand.u32 65535, %v282_v57 }
 0x27d   :  { %v287_v62 = vcvt.s32.f32 %v285_v59  ;;  %v286_v43 = vcvt.s32.f32 %v284_v39 }
 0x27f   :  { %288 = vmin.xlane.f32.xlu1 %v287_v62 }
 0x281   :  { %v615_v63 = vpop.xlane.xlu0 %614 }
 0x282   :  { %vm618_vm11 = vcmp.eq.f32.partialorder %v2041_v7, %v615_v63 }
 0x283   :  { %v620_v1 = vsel %vm618_vm11, %v1989_v40, 128 }
 0x284   :  { %v623_v2 = vshra.s32 %v620_v1, 16  ;;  %v622_v52 = vand.u32 65535, %v620_v1 }
 0x286   :  { %v625_v3 = vcvt.s32.f32 %v623_v2  ;;  %v624_v54 = vcvt.s32.f32 %v622_v52 }
 0x288   :  { %626 = vmin.xlane.f32.xlu2 %v625_v3 }
 0x289   :  { %v617_v4 = vpop.xlane.xlu0 %616  ;;  %v953_v5 = vpop.xlane.xlu1 %952 }
 0x28a   :  { %vm619_vm12 = vcmp.eq.f32.partialorder %v2050_v20, %v617_v4  ;;  %vm956_vm13 = vcmp.eq.f32.partialorder %v2047_v19, %v953_v5 }
 0x28b   :  { %v621_v6 = vsel %vm619_vm12, %v1989_v40, 128  ;;  %v958_v8 = vsel %vm956_vm13, %v1989_v40, 128 }
 0x28c   :  { %v637_v9 = vshra.s32 %v621_v6, 16  ;;  %v961_v10 = vshra.s32 %v958_v8, 16  ;;  %v636_v59 = vand.u32 65535, %v621_v6  ;;  %v960_v63 = vand.u32 65535, %v958_v8 }
 0x28e   :  { %v639_v11 = vcvt.s32.f32 %v637_v9  ;;  %v963_v12 = vcvt.s32.f32 %v961_v10  ;;  %v638_v5 = vcvt.s32.f32 %v636_v59  ;;  %v962_v9 = vcvt.s32.f32 %v960_v63 }
 0x28f   :  { %v1291_v13 = vpop.xlane.xlu2 %1290 }
 0x290   :  { %640 = vmin.xlane.f32.xlu2 %v639_v11  ;;  %964 = vmin.xlane.f32.xlu0 %v963_v12  ;;  %vm1294_vm14 = vcmp.eq.f32.partialorder %v2057_v44, %v1291_v13 }
 0x291   :  { %v955_v14 = vpop.xlane.xlu1 %954  ;;  %v1296_v15 = vsel %vm1294_vm14, %v1989_v40, 128  ;;  %v279_v16 = vpop.xlane.xlu0 %278 }
 0x292   :  { %vm957_vm15 = vcmp.eq.f32.partialorder %v2062_v46, %v955_v14  ;;  %vm281_vm1 = vcmp.eq.f32.partialorder %v2067_v47, %v279_v16  ;;  %v1299_v18 = vshra.s32 %v1296_v15, 16 }
 0x293   :  { %v959_v17 = vsel %vm957_vm15, %v1989_v40, 128  ;;  %v283_v22 = vsel %vm281_vm1, %v1989_v40, 128 }
 0x294   :  { %v975_v23 = vshra.s32 %v959_v17, 16  ;;  %v1301_v24 = vcvt.s32.f32 %v1299_v18  ;;  %v299_v25 = vshra.s32 %v283_v22, 16  ;;  %v974_v13 = vand.u32 65535, %v959_v17 }
 0x295   :  { %v298_v1 = vand.u32 65535, %v283_v22 }
 0x296   :  { %v977_v27 = vcvt.s32.f32 %v975_v23  ;;  %1302 = vmin.xlane.f32.xlu1 %v1301_v24  ;;  %v301_v28 = vcvt.s32.f32 %v299_v25  ;;  %v976_v18 = vcvt.s32.f32 %v974_v13 }
 0x297   :  { %v300_v23 = vcvt.s32.f32 %v298_v1 }
 0x298   :  { %978 = vmin.xlane.f32.xlu0 %v977_v27  ;;  %302 = vmin.xlane.f32.xlu2 %v301_v28 }
 0x299   :  { %v1293_v29 = vpop.xlane.xlu1 %1292 }
 0x29a   :  { %vm1295_vm2 = vcmp.eq.f32.partialorder %v2072_v55, %v1293_v29 }
 0x29b   :  { %v1297_v31 = vsel %vm1295_vm2, %v1989_v40, 128 }
 0x29c   :  { %v1313_v34 = vshra.s32 %v1297_v31, 16  ;;  %v1312_v25 = vand.u32 65535, %v1297_v31 }
 0x29e   :  { %v1315_v35 = vcvt.s32.f32 %v1313_v34 }
 0x2a0   :  { %1316 = vmin.xlane.f32.xlu0 %v1315_v35 }
 0x2f2   :  { %v289_v42 = vpop.xlane.xlu1 %288 }
 0x2f3   :  { %vm290_vm3 = vcmp.eq.f32.partialorder %v287_v62, %v289_v42  ;;  %v1298_v62 = vand.u32 65535, %v1296_v15  ;;  %v1314_v15 = vcvt.s32.f32 %v1312_v25  ;;  %v295_v22 = vcvt.f32.s32 %v289_v42 }
 0x2f4   :  { %v291_v48 = vsel %vm290_vm3, %v286_v43, inf }
 0x2f5   :  { %292 = vmin.xlane.f32.xlu0 %v291_v48  ;;  %v1300_v16 = vcvt.s32.f32 %v1298_v62  ;;  %v296_v34 = vshll.u32 %v295_v22, 16 }
 0x2fb   :  { %v627_v53 = vpop.xlane.xlu2 %626 }
 0x2fc   :  { %vm628_vm4 = vcmp.eq.f32.partialorder %v625_v3, %v627_v53 }
 0x2fd   :  { %v629_v56 = vsel %vm628_vm4, %v624_v54, inf }
 0x2fe   :  { %630 = vmin.xlane.f32.xlu1 %v629_v56 }
 0x303   :  { %v641_v2 = vpop.xlane.xlu2 %640  ;;  %v965_v4 = vpop.xlane.xlu0 %964 }
 0x304   :  { %vm642_vm5 = vcmp.eq.f32.partialorder %v639_v11, %v641_v2  ;;  %vm966_vm6 = vcmp.eq.f32.partialorder %v963_v12, %v965_v4  ;;  %v971_v56 = vcvt.f32.s32 %v965_v4 }
 0x305   :  { %v643_v57 = vsel %vm642_vm5, %v638_v5, inf  ;;  %v967_v10 = vsel %vm966_vm6, %v962_v9, inf }
 0x306   :  { %644 = vmin.xlane.f32.xlu1 %v643_v57  ;;  %968 = vmin.xlane.f32.xlu2 %v967_v10 }
 0x309   :  { %v1303_v14 = vpop.xlane.xlu1 %1302 }
 0x30a   :  { %vm1304_vm7 = vcmp.eq.f32.partialorder %v1301_v24, %v1303_v14  ;;  %v1309_v62 = vcvt.f32.s32 %v1303_v14 }
 0x30b   :  { %v979_v3 = vpop.xlane.xlu0 %978  ;;  %v303_v6 = vpop.xlane.xlu2 %302  ;;  %v1305_v8 = vsel %vm1304_vm7, %v1300_v16, inf }
 0x30c   :  { %vm980_vm8 = vcmp.eq.f32.partialorder %v977_v27, %v979_v3  ;;  %1306 = vmin.xlane.f32.xlu0 %v1305_v8  ;;  %vm304_vm9 = vcmp.eq.f32.partialorder %v301_v28, %v303_v6  ;;  %v633_v27 = vcvt.f32.s32 %v627_v53  ;;  %v985_v13 = vcvt.f32.s32 %v979_v3 }
 0x30d   :  { %v981_v11 = vsel %vm980_vm8, %v976_v18, inf  ;;  %v305_v12 = vsel %vm304_vm9, %v300_v23, inf  ;;  %v1310_v16 = vshll.u32 %v1309_v62, 16 }
 0x30e   :  { %982 = vmin.xlane.f32.xlu2 %v981_v11  ;;  %306 = vmin.xlane.f32.xlu1 %v305_v12  ;;  %v634_v48 = vshll.u32 %v633_v27, 16  ;;  %v986_v3 = vshll.u32 %v985_v13, 16 }
 0x313   :  { %v2091_v29 = vpop.xlane.xlu0 %1316 }
 0x314   :  { %vm1318_vm10 = vcmp.eq.f32.partialorder %v1315_v35, %v2091_v29  ;;  %v647_v35 = vcvt.f32.s32 %v641_v2  ;;  %v309_v2 = vcvt.f32.s32 %v303_v6 }
 0x315   :  { %v1319_v17 = vsel %vm1318_vm10, %v1314_v15, inf }
 0x316   :  { %1320 = vmin.xlane.f32.xlu2 %v1319_v17  ;;  %v648_v63 = vshll.u32 %v647_v35, 16  ;;  %v310_v11 = vshll.u32 %v309_v2, 16 }
 0x368   :  { %v293_v24 = vpop.xlane.xlu0 %292 }
 0x369   :  { %v294_v39 = vcvt.f32.s32 %v293_v24 }
 0x36b   :  { %v297_v43 = vadd.s32 %v296_v34, %v294_v39 }
 0x36d   :  { %vm312_vm11 = vcmp.eq.s32.totalorder %v1989_v40, %v297_v43 }
 0x36e   :  { %v2096_v28 = vsel %vm312_vm11, -3.4028235e+38, %v2036_v0  ;;  %v972_v0 = vshll.u32 %v971_v56, 16 }
 0x36f   :  { %316 = vmax.xlane.f32.xlu2 %v2096_v28 }
 0x371   :  { %v631_v31 = vpop.xlane.xlu1 %630 }
 0x372   :  { %v632_v52 = vcvt.f32.s32 %v631_v31 }
 0x374   :  { %v635_v54 = vadd.s32 %v634_v48, %v632_v52 }
 0x376   :  { %vm650_vm12 = vcmp.eq.s32.totalorder %v1989_v40, %v635_v54 }
 0x377   :  { %v2101_v42 = vsel %vm650_vm12, -3.4028235e+38, %v2041_v7 }
 0x378   :  { %654 = vmax.xlane.f32.xlu0 %v2101_v42 }
 0x379   :  { %v969_v59 = vpop.xlane.xlu2 %968  ;;  %v645_v53 = vpop.xlane.xlu1 %644 }
 0x37a   :  { %v970_v5 = vcvt.f32.s32 %v969_v59  ;;  %v646_v9 = vcvt.f32.s32 %v645_v53 }
 0x37c   :  { %v973_v57 = vadd.s32 %v972_v0, %v970_v5  ;;  %v649_v10 = vadd.s32 %v648_v63, %v646_v9 }
 0x37e   :  { %vm988_vm13 = vcmp.eq.s32.totalorder %v1989_v40, %v973_v57  ;;  %vm651_vm14 = vcmp.eq.s32.totalorder %v1989_v40, %v649_v10 }
 0x37f   :  { %v2107_v7 = vsel %vm988_vm13, -3.4028235e+38, %v2047_v19  ;;  %v2110_v4 = vsel %vm651_vm14, -3.4028235e+38, %v2050_v20  ;;  %v1307_v1 = vpop.xlane.xlu0 %1306  ;;  %v1323_v20 = vcvt.f32.s32 %v2091_v29 }
 0x380   :  { %992 = vmax.xlane.f32.xlu1 %v2107_v7  ;;  %656 = vmax.xlane.f32.xlu0 %v2110_v4  ;;  %v1308_v18 = vcvt.f32.s32 %v1307_v1 }
 0x381   :  { %v983_v14 = vpop.xlane.xlu2 %982  ;;  %v307_v23 = vpop.xlane.xlu1 %306  ;;  %v1324_v24 = vshll.u32 %v1323_v20, 16 }
 0x382   :  { %v984_v8 = vcvt.f32.s32 %v983_v14  ;;  %v1311_v12 = vadd.s32 %v1310_v16, %v1308_v18  ;;  %v308_v6 = vcvt.f32.s32 %v307_v23 }
 0x384   :  { %v987_v25 = vadd.s32 %v986_v3, %v984_v8  ;;  %v311_v19 = vadd.s32 %v310_v11, %v308_v6  ;;  %vm1326_vm15 = vcmp.eq.s32.totalorder %v1989_v40, %v1311_v12 }
 0x385   :  { %v2117_v15 = vsel %vm1326_vm15, -3.4028235e+38, %v2057_v44 }
 0x386   :  { %vm989_vm1 = vcmp.eq.s32.totalorder %v1989_v40, %v987_v25  ;;  %1330 = vmax.xlane.f32.xlu2 %v2117_v15  ;;  %vm313_vm2 = vcmp.eq.s32.totalorder %v1989_v40, %v311_v19 }
 0x387   :  { %v2122_v17 = vsel %vm989_vm1, -3.4028235e+38, %v2062_v46  ;;  %v2127_v22 = vsel %vm313_vm2, -3.4028235e+38, %v2067_v47 }
 0x388   :  { %994 = vmax.xlane.f32.xlu1 %v2122_v17  ;;  %318 = vmax.xlane.f32.xlu0 %v2127_v22 }
 0x389   :  { %v1321_v29 = vpop.xlane.xlu2 %1320 }
 0x38a   :  { %v1322_v44 = vcvt.f32.s32 %v1321_v29 }
 0x38c   :  { %v1325_v34 = vadd.s32 %v1324_v24, %v1322_v44 }
 0x38e   :  { %vm1327_vm3 = vcmp.eq.s32.totalorder %v1989_v40, %v1325_v34 }
 0x38f   :  { %v2132_v39 = vsel %vm1327_vm3, -3.4028235e+38, %v2072_v55 }
 0x390   :  { %1332 = vmax.xlane.f32.xlu1 %v2132_v39 }
 0x3e2   :  { %v317_v46 = vpop.xlane.xlu2 %316 }
 0x3e3   :  { %vm320_vm4 = vcmp.eq.f32.partialorder %v2096_v28, %v317_v46 }
 0x3e4   :  { %v322_v43 = vsel %vm320_vm4, %v1989_v40, 128 }
 0x3e5   :  { %v325_v47 = vshra.s32 %v322_v43, 16  ;;  %v324_v25 = vand.u32 65535, %v322_v43 }
 0x3e7   :  { %v327_v27 = vcvt.s32.f32 %v325_v47  ;;  %v326_v20 = vcvt.s32.f32 %v324_v25 }
 0x3e9   :  { %328 = vmin.xlane.f32.xlu1 %v327_v27 }
 0x3eb   :  { %v655_v31 = vpop.xlane.xlu0 %654 }
 0x3ec   :  { %vm658_vm5 = vcmp.eq.f32.partialorder %v2101_v42, %v655_v31 }
 0x3ed   :  { %v660_v48 = vsel %vm658_vm5, %v1989_v40, 128 }
 0x3ee   :  { %v663_v52 = vshra.s32 %v660_v48, 16  ;;  %v662_v24 = vand.u32 65535, %v660_v48 }
 0x3f0   :  { %v665_v54 = vcvt.s32.f32 %v663_v52  ;;  %v664_v34 = vcvt.s32.f32 %v662_v24 }
 0x3f2   :  { %666 = vmin.xlane.f32.xlu2 %v665_v54 }
 0x3f3   :  { %v657_v55 = vpop.xlane.xlu0 %656  ;;  %v993_v35 = vpop.xlane.xlu1 %992 }
 0x3f4   :  { %vm659_vm6 = vcmp.eq.f32.partialorder %v2110_v4, %v657_v55  ;;  %vm996_vm7 = vcmp.eq.f32.partialorder %v2107_v7, %v993_v35 }
 0x3f5   :  { %v661_v56 = vsel %vm659_vm6, %v1989_v40, 128  ;;  %v998_v59 = vsel %vm996_vm7, %v1989_v40, 128 }
 0x3f6   :  { %v677_v53 = vshra.s32 %v661_v56, 16  ;;  %v1001_v63 = vshra.s32 %v998_v59, 16  ;;  %v676_v47 = vand.u32 65535, %v661_v56  ;;  %v1000_v31 = vand.u32 65535, %v998_v59 }
 0x3f8   :  { %v679_v0 = vcvt.s32.f32 %v677_v53  ;;  %v1003_v5 = vcvt.s32.f32 %v1001_v63  ;;  %v678_v35 = vcvt.s32.f32 %v676_v47  ;;  %v1002_v53 = vcvt.s32.f32 %v1000_v31 }
 0x3f9   :  { %v1331_v9 = vpop.xlane.xlu2 %1330 }
 0x3fa   :  { %680 = vmin.xlane.f32.xlu2 %v679_v0  ;;  %1004 = vmin.xlane.f32.xlu0 %v1003_v5  ;;  %vm1334_vm8 = vcmp.eq.f32.partialorder %v2117_v15, %v1331_v9 }
 0x3fb   :  { %v995_v57 = vpop.xlane.xlu1 %994  ;;  %v1336_v10 = vsel %vm1334_vm8, %v1989_v40, 128  ;;  %v319_v62 = vpop.xlane.xlu0 %318 }
 0x3fc   :  { %vm997_vm9 = vcmp.eq.f32.partialorder %v2122_v17, %v995_v57  ;;  %vm321_vm10 = vcmp.eq.f32.partialorder %v2127_v22, %v319_v62  ;;  %v1339_v2 = vshra.s32 %v1336_v10, 16  ;;  %v1338_v9 = vand.u32 65535, %v1336_v10 }
 0x3fd   :  { %v999_v13 = vsel %vm997_vm9, %v1989_v40, 128  ;;  %v323_v1 = vsel %vm321_vm10, %v1989_v40, 128 }
 0x3fe   :  { %v1015_v16 = vshra.s32 %v999_v13, 16  ;;  %v1341_v18 = vcvt.s32.f32 %v1339_v2  ;;  %v339_v14 = vshra.s32 %v323_v1, 16  ;;  %v338_v48 = vand.u32 65535, %v323_v1 }
 0x3ff   :  { %v1340_v62 = vcvt.s32.f32 %v1338_v9 }
 0x400   :  { %v1017_v3 = vcvt.s32.f32 %v1015_v16  ;;  %1342 = vmin.xlane.f32.xlu1 %v1341_v18  ;;  %v341_v8 = vcvt.s32.f32 %v339_v14  ;;  %v340_v16 = vcvt.s32.f32 %v338_v48 }
 0x402   :  { %1018 = vmin.xlane.f32.xlu0 %v1017_v3  ;;  %342 = vmin.xlane.f32.xlu2 %v341_v8 }
 0x403   :  { %v1333_v23 = vpop.xlane.xlu1 %1332 }
 0x404   :  { %vm1335_vm11 = vcmp.eq.f32.partialorder %v2132_v39, %v1333_v23 }
 0x405   :  { %v1337_v11 = vsel %vm1335_vm11, %v1989_v40, 128 }
 0x406   :  { %v1353_v12 = vshra.s32 %v1337_v11, 16  ;;  %v1352_v14 = vand.u32 65535, %v1337_v11 }
 0x408   :  { %v1355_v6 = vcvt.s32.f32 %v1353_v12 }
 0x40a   :  { %1356 = vmin.xlane.f32.xlu0 %v1355_v6 }
 0x45c   :  { %v329_v19 = vpop.xlane.xlu1 %328 }
 0x45d   :  { %vm330_vm12 = vcmp.eq.f32.partialorder %v327_v27, %v329_v19  ;;  %v1014_v27 = vand.u32 65535, %v999_v13  ;;  %v1354_v13 = vcvt.s32.f32 %v1352_v14 }
 0x45e   :  { %v331_v29 = vsel %vm330_vm12, %v326_v20, inf }
 0x45f   :  { %332 = vmin.xlane.f32.xlu0 %v331_v29  ;;  %v1016_v2 = vcvt.s32.f32 %v1014_v27 }
 0x465   :  { %v667_v44 = vpop.xlane.xlu2 %666 }
 0x466   :  { %vm668_vm13 = vcmp.eq.f32.partialorder %v665_v54, %v667_v44 }
 0x467   :  { %v669_v46 = vsel %vm668_vm13, %v664_v34, inf }
 0x468   :  { %670 = vmin.xlane.f32.xlu1 %v669_v46 }
 0x46d   :  { %v681_v52 = vpop.xlane.xlu2 %680  ;;  %v1005_v55 = vpop.xlane.xlu0 %1004 }
 0x46e   :  { %vm682_vm14 = vcmp.eq.f32.partialorder %v679_v0, %v681_v52  ;;  %vm1006_vm15 = vcmp.eq.f32.partialorder %v1003_v5, %v1005_v55  ;;  %v1011_v46 = vcvt.f32.s32 %v1005_v55 }
 0x46f   :  { %v683_v43 = vsel %vm682_vm14, %v678_v35, inf  ;;  %v1007_v63 = vsel %vm1006_vm15, %v1002_v53, inf }
 0x470   :  { %684 = vmin.xlane.f32.xlu1 %v683_v43  ;;  %1008 = vmin.xlane.f32.xlu2 %v1007_v63 }
 0x473   :  { %v1343_v57 = vpop.xlane.xlu1 %1342 }
 0x474   :  { %vm1344_vm1 = vcmp.eq.f32.partialorder %v1341_v18, %v1343_v57  ;;  %v335_v18 = vcvt.f32.s32 %v329_v19  ;;  %v1349_v9 = vcvt.f32.s32 %v1343_v57 }
 0x475   :  { %v1019_v54 = vpop.xlane.xlu0 %1018  ;;  %v343_v56 = vpop.xlane.xlu2 %342  ;;  %v1345_v59 = vsel %vm1344_vm1, %v1340_v62, inf }
 0x476   :  { %vm1020_vm2 = vcmp.eq.f32.partialorder %v1017_v3, %v1019_v54  ;;  %1346 = vmin.xlane.f32.xlu0 %v1345_v59  ;;  %vm344_vm3 = vcmp.eq.f32.partialorder %v341_v8, %v343_v56  ;;  %v336_v12 = vshll.u32 %v335_v18, 16  ;;  %v673_v3 = vcvt.f32.s32 %v667_v44 }
 0x477   :  { %v1021_v0 = vsel %vm1020_vm2, %v1016_v2, inf  ;;  %v345_v5 = vsel %vm344_vm3, %v340_v16, inf  ;;  %v1025_v27 = vcvt.f32.s32 %v1019_v54  ;;  %v1350_v62 = vshll.u32 %v1349_v9, 16 }
 0x478   :  { %1022 = vmin.xlane.f32.xlu2 %v1021_v0  ;;  %346 = vmin.xlane.f32.xlu1 %v345_v5  ;;  %v674_v29 = vshll.u32 %v673_v3, 16 }
 0x479   :  { %v1026_v54 = vshll.u32 %v1025_v27, 16 }
 0x47d   :  { %v2151_v10 = vpop.xlane.xlu0 %1356 }
 0x47e   :  { %vm1358_vm4 = vcmp.eq.f32.partialorder %v1355_v6, %v2151_v10  ;;  %v687_v6 = vcvt.f32.s32 %v681_v52  ;;  %v349_v52 = vcvt.f32.s32 %v343_v56 }
 0x47f   :  { %v1359_v1 = vsel %vm1358_vm4, %v1354_v13, inf }
 0x480   :  { %1360 = vmin.xlane.f32.xlu2 %v1359_v1  ;;  %v688_v31 = vshll.u32 %v687_v6, 16  ;;  %v350_v0 = vshll.u32 %v349_v52, 16 }
 0x4d2   :  { %v333_v23 = vpop.xlane.xlu0 %332 }
 0x4d3   :  { %v334_v25 = vcvt.f32.s32 %v333_v23 }
 0x4d5   :  { %v337_v20 = vadd.s32 %v336_v12, %v334_v25 }
 0x4d7   :  { %vm352_vm5 = vcmp.eq.s32.totalorder %v1989_v40, %v337_v20 }
 0x4d8   :  { %v2156_v8 = vsel %vm352_vm5, -3.4028235e+38, %v2096_v28  ;;  %v1012_v28 = vshll.u32 %v1011_v46, 16 }
 0x4d9   :  { %356 = vmax.xlane.f32.xlu2 %v2156_v8 }
 0x4db   :  { %v671_v11 = vpop.xlane.xlu1 %670 }
 0x4dc   :  { %v672_v24 = vcvt.f32.s32 %v671_v11 }
 0x4de   :  { %v675_v34 = vadd.s32 %v674_v29, %v672_v24 }
 0x4e0   :  { %vm690_vm6 = vcmp.eq.s32.totalorder %v1989_v40, %v675_v34 }
 0x4e1   :  { %v2161_v19 = vsel %vm690_vm6, -3.4028235e+38, %v2101_v42 }
 0x4e2   :  { %694 = vmax.xlane.f32.xlu0 %v2161_v19 }
 0x4e3   :  { %v1009_v47 = vpop.xlane.xlu2 %1008  ;;  %v685_v44 = vpop.xlane.xlu1 %684 }
 0x4e4   :  { %v1010_v35 = vcvt.f32.s32 %v1009_v47  ;;  %v686_v53 = vcvt.f32.s32 %v685_v44 }
 0x4e6   :  { %v1013_v43 = vadd.s32 %v1012_v28, %v1010_v35  ;;  %v689_v63 = vadd.s32 %v688_v31, %v686_v53 }
 0x4e8   :  { %vm1028_vm7 = vcmp.eq.s32.totalorder %v1989_v40, %v1013_v43  ;;  %vm691_vm8 = vcmp.eq.s32.totalorder %v1989_v40, %v689_v63 }
 0x4e9   :  { %v2167_v42 = vsel %vm1028_vm7, -3.4028235e+38, %v2107_v7  ;;  %v2170_v55 = vsel %vm691_vm8, -3.4028235e+38, %v2110_v4  ;;  %v1347_v48 = vpop.xlane.xlu0 %1346  ;;  %v1363_v4 = vcvt.f32.s32 %v2151_v10 }
 0x4ea   :  { %1032 = vmax.xlane.f32.xlu1 %v2167_v42  ;;  %696 = vmax.xlane.f32.xlu0 %v2170_v55  ;;  %v1348_v2 = vcvt.f32.s32 %v1347_v48 }
 0x4eb   :  { %v1023_v57 = vpop.xlane.xlu2 %1022  ;;  %v347_v16 = vpop.xlane.xlu1 %346  ;;  %v1364_v23 = vshll.u32 %v1363_v4, 16 }
 0x4ec   :  { %v1024_v59 = vcvt.f32.s32 %v1023_v57  ;;  %v1351_v5 = vadd.s32 %v1350_v62, %v1348_v2  ;;  %v348_v56 = vcvt.f32.s32 %v347_v16 }
 0x4ee   :  { %v1027_v14 = vadd.s32 %v1026_v54, %v1024_v59  ;;  %v351_v7 = vadd.s32 %v350_v0, %v348_v56  ;;  %vm1366_vm9 = vcmp.eq.s32.totalorder %v1989_v40, %v1351_v5 }
 0x4ef   :  { %v2177_v13 = vsel %vm1366_vm9, -3.4028235e+38, %v2117_v15 }
 0x4f0   :  { %vm1029_vm10 = vcmp.eq.s32.totalorder %v1989_v40, %v1027_v14  ;;  %1370 = vmax.xlane.f32.xlu2 %v2177_v13  ;;  %vm353_vm11 = vcmp.eq.s32.totalorder %v1989_v40, %v351_v7 }
 0x4f1   :  { %v2182_v1 = vsel %vm1029_vm10, -3.4028235e+38, %v2122_v17  ;;  %v2187_v18 = vsel %vm353_vm11, -3.4028235e+38, %v2127_v22 }
 0x4f2   :  { %1034 = vmax.xlane.f32.xlu1 %v2182_v1  ;;  %358 = vmax.xlane.f32.xlu0 %v2187_v18 }
 0x4f3   :  { %v1361_v10 = vpop.xlane.xlu2 %1360 }
 0x4f4   :  { %v1362_v15 = vcvt.f32.s32 %v1361_v10 }
 0x4f6   :  { %v1365_v12 = vadd.s32 %v1364_v23, %v1362_v15 }
 0x4f8   :  { %vm1367_vm12 = vcmp.eq.s32.totalorder %v1989_v40, %v1365_v12 }
 0x4f9   :  { %v2192_v25 = vsel %vm1367_vm12, -3.4028235e+38, %v2132_v39 }
 0x4fa   :  { %1372 = vmax.xlane.f32.xlu1 %v2192_v25 }
 0x54c   :  { %v357_v17 = vpop.xlane.xlu2 %356 }
 0x54d   :  { %vm360_vm13 = vcmp.eq.f32.partialorder %v2156_v8, %v357_v17 }
 0x54e   :  { %v362_v20 = vsel %vm360_vm13, %v1989_v40, 128 }
 0x54f   :  { %v365_v22 = vshra.s32 %v362_v20, 16  ;;  %v364_v14 = vand.u32 65535, %v362_v20 }
 0x551   :  { %v367_v3 = vcvt.s32.f32 %v365_v22  ;;  %v366_v4 = vcvt.s32.f32 %v364_v14 }
 0x553   :  { %368 = vmin.xlane.f32.xlu1 %v367_v3 }
 0x555   :  { %v695_v11 = vpop.xlane.xlu0 %694 }
 0x556   :  { %vm698_vm14 = vcmp.eq.f32.partialorder %v2161_v19, %v695_v11 }
 0x557   :  { %v700_v29 = vsel %vm698_vm14, %v1989_v40, 128 }
 0x558   :  { %v703_v24 = vshra.s32 %v700_v29, 16  ;;  %v702_v23 = vand.u32 65535, %v700_v29 }
 0x55a   :  { %v705_v34 = vcvt.s32.f32 %v703_v24  ;;  %v704_v12 = vcvt.s32.f32 %v702_v23 }
 0x55c   :  { %706 = vmin.xlane.f32.xlu2 %v705_v34 }
 0x55d   :  { %v697_v39 = vpop.xlane.xlu0 %696  ;;  %v1033_v6 = vpop.xlane.xlu1 %1032 }
 0x55e   :  { %vm699_vm15 = vcmp.eq.f32.partialorder %v2170_v55, %v697_v39  ;;  %vm1036_vm1 = vcmp.eq.f32.partialorder %v2167_v42, %v1033_v6 }
 0x55f   :  { %v701_v46 = vsel %vm699_vm15, %v1989_v40, 128  ;;  %v1038_v47 = vsel %vm1036_vm1, %v1989_v40, 128 }
 0x560   :  { %v717_v44 = vshra.s32 %v701_v46, 16  ;;  %v1041_v31 = vshra.s32 %v1038_v47, 16  ;;  %v716_v22 = vand.u32 65535, %v701_v46  ;;  %v1040_v11 = vand.u32 65535, %v1038_v47 }
 0x562   :  { %v719_v28 = vcvt.s32.f32 %v717_v44  ;;  %v1043_v35 = vcvt.s32.f32 %v1041_v31  ;;  %v718_v6 = vcvt.s32.f32 %v716_v22  ;;  %v1042_v44 = vcvt.s32.f32 %v1040_v11 }
 0x563   :  { %v1371_v53 = vpop.xlane.xlu2 %1370 }
 0x564   :  { %720 = vmin.xlane.f32.xlu2 %v719_v28  ;;  %1044 = vmin.xlane.f32.xlu0 %v1043_v35  ;;  %vm1374_vm2 = vcmp.eq.f32.partialorder %v2177_v13, %v1371_v53 }
 0x565   :  { %v1035_v43 = vpop.xlane.xlu1 %1034  ;;  %v1376_v63 = vsel %vm1374_vm2, %v1989_v40, 128  ;;  %v359_v9 = vpop.xlane.xlu0 %358 }
 0x566   :  { %vm1037_vm3 = vcmp.eq.f32.partialorder %v2182_v1, %v1035_v43  ;;  %vm361_vm4 = vcmp.eq.f32.partialorder %v2187_v18, %v359_v9  ;;  %v1379_v52 = vshra.s32 %v1376_v63, 16  ;;  %v1378_v53 = vand.u32 65535, %v1376_v63 }
 0x567   :  { %v1039_v27 = vsel %vm1037_vm3, %v1989_v40, 128  ;;  %v363_v48 = vsel %vm361_vm4, %v1989_v40, 128 }
 0x568   :  { %v1055_v62 = vshra.s32 %v1039_v27, 16  ;;  %v1381_v2 = vcvt.s32.f32 %v1379_v52  ;;  %v379_v57 = vshra.s32 %v363_v48, 16  ;;  %v378_v29 = vand.u32 65535, %v363_v48 }
 0x569   :  { %v1380_v9 = vcvt.s32.f32 %v1378_v53 }
 0x56a   :  { %v1057_v54 = vcvt.s32.f32 %v1055_v62  ;;  %1382 = vmin.xlane.f32.xlu1 %v1381_v2  ;;  %v381_v59 = vcvt.s32.f32 %v379_v57  ;;  %v380_v62 = vcvt.s32.f32 %v378_v29 }
 0x56c   :  { %1058 = vmin.xlane.f32.xlu0 %v1057_v54  ;;  %382 = vmin.xlane.f32.xlu2 %v381_v59 }
 0x56d   :  { %v1373_v16 = vpop.xlane.xlu1 %1372 }
 0x56e   :  { %vm1375_vm5 = vcmp.eq.f32.partialorder %v2192_v25, %v1373_v16 }
 0x56f   :  { %v1377_v0 = vsel %vm1375_vm5, %v1989_v40, 128 }
 0x570   :  { %v1393_v5 = vshra.s32 %v1377_v0, 16  ;;  %v1392_v57 = vand.u32 65535, %v1377_v0 }
 0x572   :  { %v1395_v56 = vcvt.s32.f32 %v1393_v5 }
 0x574   :  { %1396 = vmin.xlane.f32.xlu0 %v1395_v56 }
 0x5c6   :  { %v369_v7 = vpop.xlane.xlu1 %368 }
 0x5c7   :  { %vm370_vm6 = vcmp.eq.f32.partialorder %v367_v3, %v369_v7  ;;  %v1054_v3 = vand.u32 65535, %v1039_v27  ;;  %v1394_v27 = vcvt.s32.f32 %v1392_v57 }
 0x5c8   :  { %v371_v10 = vsel %vm370_vm6, %v366_v4, inf }
 0x5c9   :  { %372 = vmin.xlane.f32.xlu0 %v371_v10  ;;  %v1056_v52 = vcvt.s32.f32 %v1054_v3 }
 0x5cf   :  { %v707_v15 = vpop.xlane.xlu2 %706 }
 0x5d0   :  { %vm708_vm7 = vcmp.eq.f32.partialorder %v705_v34, %v707_v15 }
 0x5d1   :  { %v709_v17 = vsel %vm708_vm7, %v704_v12, inf }
 0x5d2   :  { %710 = vmin.xlane.f32.xlu1 %v709_v17 }
 0x5d7   :  { %v721_v24 = vpop.xlane.xlu2 %720  ;;  %v1045_v39 = vpop.xlane.xlu0 %1044 }
 0x5d8   :  { %vm722_vm8 = vcmp.eq.f32.partialorder %v719_v28, %v721_v24  ;;  %vm1046_vm9 = vcmp.eq.f32.partialorder %v1043_v35, %v1045_v39  ;;  %v1051_v17 = vcvt.f32.s32 %v1045_v39 }
 0x5d9   :  { %v723_v20 = vsel %vm722_vm8, %v718_v6, inf  ;;  %v1047_v31 = vsel %vm1046_vm9, %v1042_v44, inf }
 0x5da   :  { %724 = vmin.xlane.f32.xlu1 %v723_v20  ;;  %1048 = vmin.xlane.f32.xlu2 %v1047_v31 }
 0x5dd   :  { %v1383_v43 = vpop.xlane.xlu1 %1382 }
 0x5de   :  { %vm1384_vm10 = vcmp.eq.f32.partialorder %v1381_v2, %v1383_v43  ;;  %v375_v2 = vcvt.f32.s32 %v369_v7  ;;  %v1389_v53 = vcvt.f32.s32 %v1383_v43 }
 0x5df   :  { %v1059_v34 = vpop.xlane.xlu0 %1058  ;;  %v383_v46 = vpop.xlane.xlu2 %382  ;;  %v1385_v47 = vsel %vm1384_vm10, %v1380_v9, inf }
 0x5e0   :  { %vm1060_vm11 = vcmp.eq.f32.partialorder %v1057_v54, %v1059_v34  ;;  %1386 = vmin.xlane.f32.xlu0 %v1385_v47  ;;  %vm384_vm12 = vcmp.eq.f32.partialorder %v381_v59, %v383_v46  ;;  %v376_v5 = vshll.u32 %v375_v2, 16  ;;  %v713_v54 = vcvt.f32.s32 %v707_v15 }
 0x5e1   :  { %v1061_v28 = vsel %vm1060_vm11, %v1056_v52, inf  ;;  %v385_v35 = vsel %vm384_vm12, %v380_v62, inf  ;;  %v1065_v3 = vcvt.f32.s32 %v1059_v34  ;;  %v1390_v9 = vshll.u32 %v1389_v53, 16 }
 0x5e2   :  { %1062 = vmin.xlane.f32.xlu2 %v1061_v28  ;;  %386 = vmin.xlane.f32.xlu1 %v385_v35  ;;  %v714_v10 = vshll.u32 %v713_v54, 16 }
 0x5e3   :  { %v1066_v34 = vshll.u32 %v1065_v3, 16 }
 0x5e7   :  { %v2211_v63 = vpop.xlane.xlu0 %1396 }
 0x5e8   :  { %vm1398_vm13 = vcmp.eq.f32.partialorder %v1395_v56, %v2211_v63  ;;  %v727_v56 = vcvt.f32.s32 %v721_v24  ;;  %v389_v24 = vcvt.f32.s32 %v383_v46 }
 0x5e9   :  { %v1399_v48 = vsel %vm1398_vm13, %v1394_v27, inf }
 0x5ea   :  { %1400 = vmin.xlane.f32.xlu2 %v1399_v48  ;;  %v728_v11 = vshll.u32 %v727_v56, 16  ;;  %v390_v28 = vshll.u32 %v389_v24, 16 }
 0x63c   :  { %v373_v16 = vpop.xlane.xlu0 %372 }
 0x63d   :  { %v374_v14 = vcvt.f32.s32 %v373_v16 }
 0x63f   :  { %v377_v4 = vadd.s32 %v376_v5, %v374_v14 }
 0x641   :  { %vm392_vm14 = vcmp.eq.s32.totalorder %v1989_v40, %v377_v4 }
 0x642   :  { %v2216_v59 = vsel %vm392_vm14, -3.4028235e+38, %v2156_v8  ;;  %v1052_v8 = vshll.u32 %v1051_v17, 16 }
 0x643   :  { %396 = vmax.xlane.f32.xlu2 %v2216_v59 }
 0x645   :  { %v711_v0 = vpop.xlane.xlu1 %710 }
 0x646   :  { %v712_v23 = vcvt.f32.s32 %v711_v0 }
 0x648   :  { %v715_v12 = vadd.s32 %v714_v10, %v712_v23 }
 0x64a   :  { %vm730_vm15 = vcmp.eq.s32.totalorder %v1989_v40, %v715_v12 }
 0x64b   :  { %v2221_v7 = vsel %vm730_vm15, -3.4028235e+38, %v2161_v19 }
 0x64c   :  { %734 = vmax.xlane.f32.xlu0 %v2221_v7 }
 0x64d   :  { %v1049_v22 = vpop.xlane.xlu2 %1048  ;;  %v725_v15 = vpop.xlane.xlu1 %724 }
 0x64e   :  { %v1050_v6 = vcvt.f32.s32 %v1049_v22  ;;  %v726_v44 = vcvt.f32.s32 %v725_v15 }
 0x650   :  { %v1053_v20 = vadd.s32 %v1052_v8, %v1050_v6  ;;  %v729_v31 = vadd.s32 %v728_v11, %v726_v44 }
 0x652   :  { %vm1068_vm1 = vcmp.eq.s32.totalorder %v1989_v40, %v1053_v20  ;;  %vm731_vm2 = vcmp.eq.s32.totalorder %v1989_v40, %v729_v31 }
 0x653   :  { %v2227_v19 = vsel %vm1068_vm1, -3.4028235e+38, %v2167_v42  ;;  %v2230_v39 = vsel %vm731_vm2, -3.4028235e+38, %v2170_v55  ;;  %v1387_v29 = vpop.xlane.xlu0 %1386  ;;  %v1403_v55 = vcvt.f32.s32 %v2211_v63 }
 0x654   :  { %1072 = vmax.xlane.f32.xlu1 %v2227_v19  ;;  %736 = vmax.xlane.f32.xlu0 %v2230_v39  ;;  %v1388_v52 = vcvt.f32.s32 %v1387_v29 }
 0x655   :  { %v1063_v43 = vpop.xlane.xlu2 %1062  ;;  %v387_v62 = vpop.xlane.xlu1 %386  ;;  %v1404_v16 = vshll.u32 %v1403_v55, 16 }
 0x656   :  { %v1064_v47 = vcvt.f32.s32 %v1063_v43  ;;  %v1391_v35 = vadd.s32 %v1390_v9, %v1388_v52  ;;  %v388_v46 = vcvt.f32.s32 %v387_v62 }
 0x658   :  { %v1067_v57 = vadd.s32 %v1066_v34, %v1064_v47  ;;  %v391_v42 = vadd.s32 %v390_v28, %v388_v46  ;;  %vm1406_vm3 = vcmp.eq.s32.totalorder %v1989_v40, %v1391_v35 }
 0x659   :  { %v2237_v27 = vsel %vm1406_vm3, -3.4028235e+38, %v2177_v13 }
 0x65a   :  { %vm1069_vm4 = vcmp.eq.s32.totalorder %v1989_v40, %v1067_v57  ;;  %1410 = vmax.xlane.f32.xlu2 %v2237_v27  ;;  %vm393_vm5 = vcmp.eq.s32.totalorder %v1989_v40, %v391_v42 }
 0x65b   :  { %v2242_v48 = vsel %vm1069_vm4, -3.4028235e+38, %v2182_v1  ;;  %v2247_v2 = vsel %vm393_vm5, -3.4028235e+38, %v2187_v18 }
 0x65c   :  { %1074 = vmax.xlane.f32.xlu1 %v2242_v48  ;;  %398 = vmax.xlane.f32.xlu0 %v2247_v2 }
 0x65d   :  { %v1401_v63 = vpop.xlane.xlu2 %1400 }
 0x65e   :  { %v1402_v13 = vcvt.f32.s32 %v1401_v63 }
 0x660   :  { %v1405_v5 = vadd.s32 %v1404_v16, %v1402_v13 }
 0x662   :  { %vm1407_vm6 = vcmp.eq.s32.totalorder %v1989_v40, %v1405_v5 }
 0x663   :  { %v2252_v14 = vsel %vm1407_vm6, -3.4028235e+38, %v2192_v25 }
 0x664   :  { %1412 = vmax.xlane.f32.xlu1 %v2252_v14 }
 0x6b6   :  { %v397_v1 = vpop.xlane.xlu2 %396 }
 0x6b7   :  { %vm400_vm7 = vcmp.eq.f32.partialorder %v2216_v59, %v397_v1 }
 0x6b8   :  { %v402_v4 = vsel %vm400_vm7, %v1989_v40, 128 }
 0x6b9   :  { %v405_v18 = vshra.s32 %v402_v4, 16  ;;  %v404_v57 = vand.u32 65535, %v402_v4 }
 0x6bb   :  { %v407_v54 = vcvt.s32.f32 %v405_v18  ;;  %v406_v55 = vcvt.s32.f32 %v404_v57 }
 0x6bd   :  { %408 = vmin.xlane.f32.xlu1 %v407_v54 }
 0x6bf   :  { %v735_v0 = vpop.xlane.xlu0 %734 }
 0x6c0   :  { %vm738_vm8 = vcmp.eq.f32.partialorder %v2221_v7, %v735_v0 }
 0x6c1   :  { %v740_v10 = vsel %vm738_vm8, %v1989_v40, 128 }
 0x6c2   :  { %v743_v23 = vshra.s32 %v740_v10, 16  ;;  %v742_v16 = vand.u32 65535, %v740_v10 }
 0x6c4   :  { %v745_v12 = vcvt.s32.f32 %v743_v23  ;;  %v744_v5 = vcvt.s32.f32 %v742_v16 }
 0x6c6   :  { %746 = vmin.xlane.f32.xlu2 %v745_v12 }
 0x6c7   :  { %v737_v25 = vpop.xlane.xlu0 %736  ;;  %v1073_v56 = vpop.xlane.xlu1 %1072 }
 0x6c8   :  { %vm739_vm9 = vcmp.eq.f32.partialorder %v2230_v39, %v737_v25  ;;  %vm1076_vm10 = vcmp.eq.f32.partialorder %v2227_v19, %v1073_v56 }
 0x6c9   :  { %v741_v17 = vsel %vm739_vm9, %v1989_v40, 128  ;;  %v1078_v22 = vsel %vm1076_vm10, %v1989_v40, 128 }
 0x6ca   :  { %v757_v15 = vshra.s32 %v741_v17, 16  ;;  %v1081_v11 = vshra.s32 %v1078_v22, 16  ;;  %v756_v18 = vand.u32 65535, %v741_v17  ;;  %v1080_v0 = vand.u32 65535, %v1078_v22 }
 0x6cc   :  { %v759_v8 = vcvt.s32.f32 %v757_v15  ;;  %v1083_v6 = vcvt.s32.f32 %v1081_v11  ;;  %v758_v56 = vcvt.s32.f32 %v756_v18  ;;  %v1082_v15 = vcvt.s32.f32 %v1080_v0 }
 0x6cd   :  { %v1411_v44 = vpop.xlane.xlu2 %1410 }
 0x6ce   :  { %760 = vmin.xlane.f32.xlu2 %v759_v8  ;;  %1084 = vmin.xlane.f32.xlu0 %v1083_v6  ;;  %vm1414_vm11 = vcmp.eq.f32.partialorder %v2237_v27, %v1411_v44 }
 0x6cf   :  { %v1075_v20 = vpop.xlane.xlu1 %1074  ;;  %v1416_v31 = vsel %vm1414_vm11, %v1989_v40, 128  ;;  %v399_v53 = vpop.xlane.xlu0 %398 }
 0x6d0   :  { %vm1077_vm12 = vcmp.eq.f32.partialorder %v2242_v48, %v1075_v20  ;;  %vm401_vm13 = vcmp.eq.f32.partialorder %v2247_v2, %v399_v53  ;;  %v1419_v24 = vshra.s32 %v1416_v31, 16  ;;  %v1418_v44 = vand.u32 65535, %v1416_v31 }
 0x6d1   :  { %v1079_v3 = vsel %vm1077_vm12, %v1989_v40, 128  ;;  %v403_v29 = vsel %vm401_vm13, %v1989_v40, 128 }
 0x6d2   :  { %v1095_v9 = vshra.s32 %v1079_v3, 16  ;;  %v1421_v52 = vcvt.s32.f32 %v1419_v24  ;;  %v419_v43 = vshra.s32 %v403_v29, 16  ;;  %v418_v10 = vand.u32 65535, %v403_v29 }
 0x6d3   :  { %v1420_v53 = vcvt.s32.f32 %v1418_v44 }
 0x6d4   :  { %v1097_v34 = vcvt.s32.f32 %v1095_v9  ;;  %1422 = vmin.xlane.f32.xlu1 %v1421_v52  ;;  %v421_v47 = vcvt.s32.f32 %v419_v43  ;;  %v420_v9 = vcvt.s32.f32 %v418_v10 }
 0x6d6   :  { %1098 = vmin.xlane.f32.xlu0 %v1097_v34  ;;  %422 = vmin.xlane.f32.xlu2 %v421_v47 }
 0x6d7   :  { %v1413_v62 = vpop.xlane.xlu1 %1412 }
 0x6d8   :  { %vm1415_vm14 = vcmp.eq.f32.partialorder %v2252_v14, %v1413_v62 }
 0x6d9   :  { %v1417_v28 = vsel %vm1415_vm14, %v1989_v40, 128 }
 0x6da   :  { %v1433_v35 = vshra.s32 %v1417_v28, 16  ;;  %v1432_v43 = vand.u32 65535, %v1417_v28 }
 0x6dc   :  { %v1435_v46 = vcvt.s32.f32 %v1433_v35 }
 0x6de   :  { %1436 = vmin.xlane.f32.xlu0 %v1435_v46 }
 0x730   :  { %v409_v42 = vpop.xlane.xlu1 %408 }
 0x731   :  { %vm410_vm15 = vcmp.eq.f32.partialorder %v407_v54, %v409_v42  ;;  %v1094_v54 = vand.u32 65535, %v1079_v3  ;;  %v1434_v3 = vcvt.s32.f32 %v1432_v43 }
 0x732   :  { %v411_v63 = vsel %vm410_vm15, %v406_v55, inf }
 0x733   :  { %412 = vmin.xlane.f32.xlu0 %v411_v63  ;;  %v1096_v24 = vcvt.s32.f32 %v1094_v54 }
 0x739   :  { %v747_v13 = vpop.xlane.xlu2 %746 }
 0x73a   :  { %vm748_vm1 = vcmp.eq.f32.partialorder %v745_v12, %v747_v13 }
 0x73b   :  { %v749_v1 = vsel %vm748_vm1, %v744_v5, inf }
 0x73c   :  { %750 = vmin.xlane.f32.xlu1 %v749_v1 }
 0x741   :  { %v761_v23 = vpop.xlane.xlu2 %760  ;;  %v1085_v25 = vpop.xlane.xlu0 %1084 }
 0x742   :  { %vm762_vm2 = vcmp.eq.f32.partialorder %v759_v8, %v761_v23  ;;  %vm1086_vm3 = vcmp.eq.f32.partialorder %v1083_v6, %v1085_v25  ;;  %v1091_v1 = vcvt.f32.s32 %v1085_v25 }
 0x743   :  { %v763_v4 = vsel %vm762_vm2, %v758_v56, inf  ;;  %v1087_v11 = vsel %vm1086_vm3, %v1082_v15, inf }
 0x744   :  { %764 = vmin.xlane.f32.xlu1 %v763_v4  ;;  %1088 = vmin.xlane.f32.xlu2 %v1087_v11 }
 0x747   :  { %v1423_v20 = vpop.xlane.xlu1 %1422 }
 0x748   :  { %vm1424_vm4 = vcmp.eq.f32.partialorder %v1421_v52, %v1423_v20  ;;  %v415_v52 = vcvt.f32.s32 %v409_v42  ;;  %v1429_v44 = vcvt.f32.s32 %v1423_v20 }
 0x749   :  { %v1099_v12 = vpop.xlane.xlu0 %1098  ;;  %v423_v17 = vpop.xlane.xlu2 %422  ;;  %v1425_v22 = vsel %vm1424_vm4, %v1420_v53, inf }
 0x74a   :  { %vm1100_vm5 = vcmp.eq.f32.partialorder %v1097_v34, %v1099_v12  ;;  %1426 = vmin.xlane.f32.xlu0 %v1425_v22  ;;  %vm424_vm6 = vcmp.eq.f32.partialorder %v421_v47, %v423_v17  ;;  %v416_v35 = vshll.u32 %v415_v52, 16  ;;  %v753_v34 = vcvt.f32.s32 %v747_v13 }
 0x74b   :  { %v1101_v8 = vsel %vm1100_vm5, %v1096_v24, inf  ;;  %v425_v6 = vsel %vm424_vm6, %v420_v9, inf  ;;  %v1105_v54 = vcvt.f32.s32 %v1099_v12  ;;  %v1430_v53 = vshll.u32 %v1429_v44, 16 }
 0x74c   :  { %1102 = vmin.xlane.f32.xlu2 %v1101_v8  ;;  %426 = vmin.xlane.f32.xlu1 %v425_v6  ;;  %v754_v63 = vshll.u32 %v753_v34, 16 }
 0x74d   :  { %v1106_v12 = vshll.u32 %v1105_v54, 16 }
 0x751   :  { %v2271_v31 = vpop.xlane.xlu0 %1436 }
 0x752   :  { %vm1438_vm7 = vcmp.eq.f32.partialorder %v1435_v46, %v2271_v31  ;;  %v767_v46 = vcvt.f32.s32 %v761_v23  ;;  %v429_v23 = vcvt.f32.s32 %v423_v17 }
 0x753   :  { %v1439_v29 = vsel %vm1438_vm7, %v1434_v3, inf }
 0x754   :  { %1440 = vmin.xlane.f32.xlu2 %v1439_v29  ;;  %v768_v0 = vshll.u32 %v767_v46, 16  ;;  %v430_v8 = vshll.u32 %v429_v23, 16 }
 0x7a6   :  { %v413_v62 = vpop.xlane.xlu0 %412 }
 0x7a7   :  { %v414_v57 = vcvt.f32.s32 %v413_v62 }
 0x7a9   :  { %v417_v55 = vadd.s32 %v416_v35, %v414_v57 }
 0x7ab   :  { %vm432_vm8 = vcmp.eq.s32.totalorder %v1989_v40, %v417_v55 }
 0x7ac   :  { %v2276_v47 = vsel %vm432_vm8, -3.4028235e+38, %v2216_v59  ;;  %v1092_v59 = vshll.u32 %v1091_v1, 16 }
 0x7ad   :  { %436 = vmax.xlane.f32.xlu2 %v2276_v47 }
 0x7af   :  { %v751_v28 = vpop.xlane.xlu1 %750 }
 0x7b0   :  { %v752_v16 = vcvt.f32.s32 %v751_v28 }
 0x7b2   :  { %v755_v5 = vadd.s32 %v754_v63, %v752_v16 }
 0x7b4   :  { %vm770_vm9 = vcmp.eq.s32.totalorder %v1989_v40, %v755_v5 }
 0x7b5   :  { %v2281_v42 = vsel %vm770_vm9, -3.4028235e+38, %v2221_v7 }
 0x7b6   :  { %774 = vmax.xlane.f32.xlu0 %v2281_v42 }
 0x7b7   :  { %v1089_v18 = vpop.xlane.xlu2 %1088  ;;  %v765_v13 = vpop.xlane.xlu1 %764 }
 0x7b8   :  { %v1090_v56 = vcvt.f32.s32 %v1089_v18  ;;  %v766_v15 = vcvt.f32.s32 %v765_v13 }
 0x7ba   :  { %v1093_v4 = vadd.s32 %v1092_v59, %v1090_v56  ;;  %v769_v11 = vadd.s32 %v768_v0, %v766_v15 }
 0x7bc   :  { %vm1108_vm10 = vcmp.eq.s32.totalorder %v1989_v40, %v1093_v4  ;;  %vm771_vm11 = vcmp.eq.s32.totalorder %v1989_v40, %v769_v11 }
 0x7bd   :  { %v2287_v7 = vsel %vm1108_vm10, -3.4028235e+38, %v2227_v19  ;;  %v2290_v25 = vsel %vm771_vm11, -3.4028235e+38, %v2230_v39  ;;  %v1427_v10 = vpop.xlane.xlu0 %1426  ;;  %v1443_v39 = vcvt.f32.s32 %v2271_v31 }
 0x7be   :  { %1112 = vmax.xlane.f32.xlu1 %v2287_v7  ;;  %776 = vmax.xlane.f32.xlu0 %v2290_v25  ;;  %v1428_v24 = vcvt.f32.s32 %v1427_v10 }
 0x7bf   :  { %v1103_v20 = vpop.xlane.xlu2 %1102  ;;  %v427_v9 = vpop.xlane.xlu1 %426  ;;  %v1444_v62 = vshll.u32 %v1443_v39, 16 }
 0x7c0   :  { %v1104_v22 = vcvt.f32.s32 %v1103_v20  ;;  %v1431_v6 = vadd.s32 %v1430_v53, %v1428_v24  ;;  %v428_v17 = vcvt.f32.s32 %v427_v9 }
 0x7c2   :  { %v1107_v43 = vadd.s32 %v1106_v12, %v1104_v22  ;;  %v431_v19 = vadd.s32 %v430_v8, %v428_v17  ;;  %vm1446_vm12 = vcmp.eq.s32.totalorder %v1989_v40, %v1431_v6 }
 0x7c3   :  { %v2297_v3 = vsel %vm1446_vm12, -3.4028235e+38, %v2237_v27 }
 0x7c4   :  { %vm1109_vm13 = vcmp.eq.s32.totalorder %v1989_v40, %v1107_v43  ;;  %1450 = vmax.xlane.f32.xlu2 %v2297_v3  ;;  %vm433_vm14 = vcmp.eq.s32.totalorder %v1989_v40, %v431_v19 }
 0x7c5   :  { %v2302_v29 = vsel %vm1109_vm13, -3.4028235e+38, %v2242_v48  ;;  %v2307_v52 = vsel %vm433_vm14, -3.4028235e+38, %v2247_v2 }
 0x7c6   :  { %1114 = vmax.xlane.f32.xlu1 %v2302_v29  ;;  %438 = vmax.xlane.f32.xlu0 %v2307_v52 }
 0x7c7   :  { %v1441_v31 = vpop.xlane.xlu2 %1440 }
 0x7c8   :  { %v1442_v27 = vcvt.f32.s32 %v1441_v31 }
 0x7ca   :  { %v1445_v35 = vadd.s32 %v1444_v62, %v1442_v27 }
 0x7cc   :  { %vm1447_vm15 = vcmp.eq.s32.totalorder %v1989_v40, %v1445_v35 }
 0x7cd   :  { %v2312_v57 = vsel %vm1447_vm15, -3.4028235e+38, %v2252_v14 }
 0x7ce   :  { %1452 = vmax.xlane.f32.xlu1 %v2312_v57 }
 0x820   :  { %v437_v48 = vpop.xlane.xlu2 %436 }
 0x821   :  { %vm440_vm1 = vcmp.eq.f32.partialorder %v2276_v47, %v437_v48 }
 0x822   :  { %v442_v55 = vsel %vm440_vm1, %v1989_v40, 128 }
 0x823   :  { %v445_v2 = vshra.s32 %v442_v55, 16  ;;  %v444_v43 = vand.u32 65535, %v442_v55 }
 0x825   :  { %v447_v34 = vcvt.s32.f32 %v445_v2  ;;  %v446_v39 = vcvt.s32.f32 %v444_v43 }
 0x827   :  { %448 = vmin.xlane.f32.xlu1 %v447_v34 }
 0x829   :  { %v775_v28 = vpop.xlane.xlu0 %774 }
 0x82a   :  { %vm778_vm2 = vcmp.eq.f32.partialorder %v2281_v42, %v775_v28 }
 0x82b   :  { %v780_v63 = vsel %vm778_vm2, %v1989_v40, 128 }
 0x82c   :  { %v783_v16 = vshra.s32 %v780_v63, 16  ;;  %v782_v62 = vand.u32 65535, %v780_v63 }
 0x82e   :  { %v785_v5 = vcvt.s32.f32 %v783_v16  ;;  %v784_v35 = vcvt.s32.f32 %v782_v62 }
 0x830   :  { %786 = vmin.xlane.f32.xlu2 %v785_v5 }
 0x831   :  { %v777_v14 = vpop.xlane.xlu0 %776  ;;  %v1113_v46 = vpop.xlane.xlu1 %1112 }
 0x832   :  { %vm779_vm3 = vcmp.eq.f32.partialorder %v2290_v25, %v777_v14  ;;  %vm1116_vm4 = vcmp.eq.f32.partialorder %v2287_v7, %v1113_v46 }
 0x833   :  { %v781_v1 = vsel %vm779_vm3, %v1989_v40, 128  ;;  %v1118_v18 = vsel %vm1116_vm4, %v1989_v40, 128 }
 0x834   :  { %v797_v13 = vshra.s32 %v781_v1, 16  ;;  %v1121_v0 = vshra.s32 %v1118_v18, 16  ;;  %v796_v2 = vand.u32 65535, %v781_v1  ;;  %v1120_v28 = vand.u32 65535, %v1118_v18 }
 0x836   :  { %v799_v59 = vcvt.s32.f32 %v797_v13  ;;  %v1123_v56 = vcvt.s32.f32 %v1121_v0  ;;  %v798_v46 = vcvt.s32.f32 %v796_v2  ;;  %v1122_v13 = vcvt.s32.f32 %v1120_v28 }
 0x837   :  { %v1451_v15 = vpop.xlane.xlu2 %1450 }
 0x838   :  { %800 = vmin.xlane.f32.xlu2 %v799_v59  ;;  %1124 = vmin.xlane.f32.xlu0 %v1123_v56  ;;  %vm1454_vm5 = vcmp.eq.f32.partialorder %v2297_v3, %v1451_v15 }
 0x839   :  { %v1115_v4 = vpop.xlane.xlu1 %1114  ;;  %v1456_v11 = vsel %vm1454_vm5, %v1989_v40, 128  ;;  %v439_v44 = vpop.xlane.xlu0 %438 }
 0x83a   :  { %vm1117_vm6 = vcmp.eq.f32.partialorder %v2302_v29, %v1115_v4  ;;  %vm441_vm7 = vcmp.eq.f32.partialorder %v2307_v52, %v439_v44  ;;  %v1459_v23 = vshra.s32 %v1456_v11, 16  ;;  %v1458_v15 = vand.u32 65535, %v1456_v11 }
 0x83b   :  { %v1119_v54 = vsel %vm1117_vm6, %v1989_v40, 128  ;;  %v443_v10 = vsel %vm441_vm7, %v1989_v40, 128 }
 0x83c   :  { %v1135_v53 = vshra.s32 %v1119_v54, 16  ;;  %v1461_v24 = vcvt.s32.f32 %v1459_v23  ;;  %v459_v20 = vshra.s32 %v443_v10, 16  ;;  %v458_v63 = vand.u32 65535, %v443_v10 }
 0x83d   :  { %v1460_v44 = vcvt.s32.f32 %v1458_v15 }
 0x83e   :  { %v1137_v12 = vcvt.s32.f32 %v1135_v53  ;;  %1462 = vmin.xlane.f32.xlu1 %v1461_v24  ;;  %v461_v22 = vcvt.s32.f32 %v459_v20  ;;  %v460_v53 = vcvt.s32.f32 %v458_v63 }
 0x840   :  { %1138 = vmin.xlane.f32.xlu0 %v1137_v12  ;;  %462 = vmin.xlane.f32.xlu2 %v461_v22 }
 0x841   :  { %v1453_v9 = vpop.xlane.xlu1 %1452 }
 0x842   :  { %vm1455_vm8 = vcmp.eq.f32.partialorder %v2312_v57, %v1453_v9 }
 0x843   :  { %v1457_v8 = vsel %vm1455_vm8, %v1989_v40, 128 }
 0x844   :  { %v1473_v6 = vshra.s32 %v1457_v8, 16  ;;  %v1472_v20 = vand.u32 65535, %v1457_v8 }
 0x846   :  { %v1475_v17 = vcvt.s32.f32 %v1473_v6 }
 0x848   :  { %1476 = vmin.xlane.f32.xlu0 %v1475_v17 }
 0x89a   :  { %v449_v19 = vpop.xlane.xlu1 %448 }
 0x89b   :  { %vm450_vm9 = vcmp.eq.f32.partialorder %v447_v34, %v449_v19  ;;  %v1134_v34 = vand.u32 65535, %v1119_v54  ;;  %v1474_v54 = vcvt.s32.f32 %v1472_v20 }
 0x89c   :  { %v451_v31 = vsel %vm450_vm9, %v446_v39, inf }
 0x89d   :  { %452 = vmin.xlane.f32.xlu0 %v451_v31  ;;  %v1136_v23 = vcvt.s32.f32 %v1134_v34 }
 0x8a3   :  { %v787_v27 = vpop.xlane.xlu2 %786 }
 0x8a4   :  { %vm788_vm10 = vcmp.eq.f32.partialorder %v785_v5, %v787_v27 }
 0x8a5   :  { %v789_v48 = vsel %vm788_vm10, %v784_v35, inf }
 0x8a6   :  { %790 = vmin.xlane.f32.xlu1 %v789_v48 }
 0x8ab   :  { %v801_v16 = vpop.xlane.xlu2 %800  ;;  %v1125_v14 = vpop.xlane.xlu0 %1124 }
 0x8ac   :  { %vm802_vm11 = vcmp.eq.f32.partialorder %v799_v59, %v801_v16  ;;  %vm1126_vm12 = vcmp.eq.f32.partialorder %v1123_v56, %v1125_v14  ;;  %v1131_v48 = vcvt.f32.s32 %v1125_v14 }
 0x8ad   :  { %v803_v55 = vsel %vm802_vm11, %v798_v46, inf  ;;  %v1127_v0 = vsel %vm1126_vm12, %v1122_v13, inf }
 0x8ae   :  { %804 = vmin.xlane.f32.xlu1 %v803_v55  ;;  %1128 = vmin.xlane.f32.xlu2 %v1127_v0 }
 0x8b1   :  { %v1463_v4 = vpop.xlane.xlu1 %1462 }
 0x8b2   :  { %vm1464_vm13 = vcmp.eq.f32.partialorder %v1461_v24, %v1463_v4  ;;  %v455_v24 = vcvt.f32.s32 %v449_v19  ;;  %v1469_v15 = vcvt.f32.s32 %v1463_v4 }
 0x8b3   :  { %v1139_v5 = vpop.xlane.xlu0 %1138  ;;  %v463_v1 = vpop.xlane.xlu2 %462  ;;  %v1465_v18 = vsel %vm1464_vm13, %v1460_v44, inf }
 0x8b4   :  { %vm1140_vm14 = vcmp.eq.f32.partialorder %v1137_v12, %v1139_v5  ;;  %1466 = vmin.xlane.f32.xlu0 %v1465_v18  ;;  %vm464_vm15 = vcmp.eq.f32.partialorder %v461_v22, %v463_v1  ;;  %v456_v6 = vshll.u32 %v455_v24, 16  ;;  %v793_v12 = vcvt.f32.s32 %v787_v27 }
 0x8b5   :  { %v1141_v59 = vsel %vm1140_vm14, %v1136_v23, inf  ;;  %v465_v56 = vsel %vm464_vm15, %v460_v53, inf  ;;  %v1145_v34 = vcvt.f32.s32 %v1139_v5  ;;  %v1470_v44 = vshll.u32 %v1469_v15, 16 }
 0x8b6   :  { %1142 = vmin.xlane.f32.xlu2 %v1141_v59  ;;  %466 = vmin.xlane.f32.xlu1 %v465_v56  ;;  %v794_v31 = vshll.u32 %v793_v12, 16 }
 0x8b7   :  { %v1146_v5 = vshll.u32 %v1145_v34, 16 }
 0x8bb   :  { %v2331_v11 = vpop.xlane.xlu0 %1476 }
 0x8bc   :  { %vm1478_vm1 = vcmp.eq.f32.partialorder %v1475_v17, %v2331_v11  ;;  %v807_v17 = vcvt.f32.s32 %v801_v16  ;;  %v469_v16 = vcvt.f32.s32 %v463_v1 }
 0x8bd   :  { %v1479_v10 = vsel %vm1478_vm1, %v1474_v54, inf }
 0x8be   :  { %1480 = vmin.xlane.f32.xlu2 %v1479_v10  ;;  %v808_v28 = vshll.u32 %v807_v17, 16  ;;  %v470_v59 = vshll.u32 %v469_v16, 16 }
 0x910   :  { %v453_v9 = vpop.xlane.xlu0 %452 }
 0x911   :  { %v454_v43 = vcvt.f32.s32 %v453_v9 }
 0x913   :  { %v457_v39 = vadd.s32 %v456_v6, %v454_v43 }
 0x915   :  { %vm472_vm2 = vcmp.eq.s32.totalorder %v1989_v40, %v457_v39 }
 0x916   :  { %v2336_v22 = vsel %vm472_vm2, -3.4028235e+38, %v2276_v47  ;;  %v1132_v47 = vshll.u32 %v1131_v48, 16 }
 0x917   :  { %476 = vmax.xlane.f32.xlu2 %v2336_v22 }
 0x919   :  { %v791_v8 = vpop.xlane.xlu1 %790 }
 0x91a   :  { %v792_v62 = vcvt.f32.s32 %v791_v8 }
 0x91c   :  { %v795_v35 = vadd.s32 %v794_v31, %v792_v62 }
 0x91e   :  { %vm810_vm3 = vcmp.eq.s32.totalorder %v1989_v40, %v795_v35 }
 0x91f   :  { %v2341_v19 = vsel %vm810_vm3, -3.4028235e+38, %v2281_v42 }
 0x920   :  { %814 = vmax.xlane.f32.xlu0 %v2341_v19 }
 0x921   :  { %v1129_v2 = vpop.xlane.xlu2 %1128  ;;  %v805_v27 = vpop.xlane.xlu1 %804 }
 0x922   :  { %v1130_v46 = vcvt.f32.s32 %v1129_v2  ;;  %v806_v13 = vcvt.f32.s32 %v805_v27 }
 0x924   :  { %v1133_v55 = vadd.s32 %v1132_v47, %v1130_v46  ;;  %v809_v0 = vadd.s32 %v808_v28, %v806_v13 }
 0x926   :  { %vm1148_vm4 = vcmp.eq.s32.totalorder %v1989_v40, %v1133_v55  ;;  %vm811_vm5 = vcmp.eq.s32.totalorder %v1989_v40, %v809_v0 }
 0x927   :  { %v2347_v42 = vsel %vm1148_vm4, -3.4028235e+38, %v2287_v7  ;;  %v2350_v14 = vsel %vm811_vm5, -3.4028235e+38, %v2290_v25  ;;  %v1467_v63 = vpop.xlane.xlu0 %1466  ;;  %v1483_v25 = vcvt.f32.s32 %v2331_v11 }
 0x928   :  { %1152 = vmax.xlane.f32.xlu1 %v2347_v42  ;;  %816 = vmax.xlane.f32.xlu0 %v2350_v14  ;;  %v1468_v23 = vcvt.f32.s32 %v1467_v63 }
 0x929   :  { %v1143_v4 = vpop.xlane.xlu2 %1142  ;;  %v467_v53 = vpop.xlane.xlu1 %466  ;;  %v1484_v9 = vshll.u32 %v1483_v25, 16 }
 0x92a   :  { %v1144_v18 = vcvt.f32.s32 %v1143_v4  ;;  %v1471_v56 = vadd.s32 %v1470_v44, %v1468_v23  ;;  %v468_v1 = vcvt.f32.s32 %v467_v53 }
 0x92c   :  { %v1147_v20 = vadd.s32 %v1146_v5, %v1144_v18  ;;  %v471_v7 = vadd.s32 %v470_v59, %v468_v1  ;;  %vm1486_vm6 = vcmp.eq.s32.totalorder %v1989_v40, %v1471_v56 }
 0x92d   :  { %v2357_v54 = vsel %vm1486_vm6, -3.4028235e+38, %v2297_v3 }
 0x92e   :  { %vm1149_vm7 = vcmp.eq.s32.totalorder %v1989_v40, %v1147_v20  ;;  %1490 = vmax.xlane.f32.xlu2 %v2357_v54  ;;  %vm473_vm8 = vcmp.eq.s32.totalorder %v1989_v40, %v471_v7 }
 0x92f   :  { %v2362_v10 = vsel %vm1149_vm7, -3.4028235e+38, %v2302_v29  ;;  %v2367_v24 = vsel %vm473_vm8, -3.4028235e+38, %v2307_v52 }
 0x930   :  { %1154 = vmax.xlane.f32.xlu1 %v2362_v10  ;;  %478 = vmax.xlane.f32.xlu0 %v2367_v24 }
 0x931   :  { %v1481_v11 = vpop.xlane.xlu2 %1480 }
 0x932   :  { %v1482_v3 = vcvt.f32.s32 %v1481_v11 }
 0x934   :  { %v1485_v6 = vadd.s32 %v1484_v9, %v1482_v3 }
 0x936   :  { %vm1487_vm9 = vcmp.eq.s32.totalorder %v1989_v40, %v1485_v6 }
 0x937   :  { %v2372_v43 = vsel %vm1487_vm9, -3.4028235e+38, %v2312_v57 }
 0x938   :  { %1492 = vmax.xlane.f32.xlu1 %v2372_v43 }
 0x98a   :  { %v477_v29 = vpop.xlane.xlu2 %476 }
 0x98b   :  { %vm480_vm10 = vcmp.eq.f32.partialorder %v2336_v22, %v477_v29 }
 0x98c   :  { %v482_v39 = vsel %vm480_vm10, %v1989_v40, 128 }
 0x98d   :  { %v485_v52 = vshra.s32 %v482_v39, 16  ;;  %v484_v20 = vand.u32 65535, %v482_v39 }
 0x98f   :  { %v487_v12 = vcvt.s32.f32 %v485_v52  ;;  %v486_v7 = vcvt.s32.f32 %v484_v20 }
 0x991   :  { %488 = vmin.xlane.f32.xlu1 %v487_v12 }
 0x993   :  { %v815_v8 = vpop.xlane.xlu0 %814 }
 0x994   :  { %vm818_vm11 = vcmp.eq.f32.partialorder %v2341_v19, %v815_v8 }
 0x995   :  { %v820_v31 = vsel %vm818_vm11, %v1989_v40, 128 }
 0x996   :  { %v823_v62 = vshra.s32 %v820_v31, 16  ;;  %v822_v9 = vand.u32 65535, %v820_v31 }
 0x998   :  { %v825_v35 = vcvt.s32.f32 %v823_v62  ;;  %v824_v3 = vcvt.s32.f32 %v822_v9 }
 0x99a   :  { %826 = vmin.xlane.f32.xlu2 %v825_v35 }
 0x99b   :  { %v817_v57 = vpop.xlane.xlu0 %816  ;;  %v1153_v17 = vpop.xlane.xlu1 %1152 }
 0x99c   :  { %vm819_vm12 = vcmp.eq.f32.partialorder %v2350_v14, %v817_v57  ;;  %vm1156_vm13 = vcmp.eq.f32.partialorder %v2347_v42, %v1153_v17 }
 0x99d   :  { %v821_v48 = vsel %vm819_vm12, %v1989_v40, 128  ;;  %v1158_v2 = vsel %vm1156_vm13, %v1989_v40, 128 }
 0x99e   :  { %v837_v27 = vshra.s32 %v821_v48, 16  ;;  %v1161_v28 = vshra.s32 %v1158_v2, 16  ;;  %v836_v52 = vand.u32 65535, %v821_v48  ;;  %v1160_v8 = vand.u32 65535, %v1158_v2 }
 0x9a0   :  { %v839_v47 = vcvt.s32.f32 %v837_v27  ;;  %v1163_v46 = vcvt.s32.f32 %v1161_v28  ;;  %v838_v62 = vcvt.s32.f32 %v836_v52  ;;  %v1162_v57 = vcvt.s32.f32 %v1160_v8 }
 0x9a1   :  { %v1491_v13 = vpop.xlane.xlu2 %1490 }
 0x9a2   :  { %840 = vmin.xlane.f32.xlu2 %v839_v47  ;;  %1164 = vmin.xlane.f32.xlu0 %v1163_v46  ;;  %vm1494_vm14 = vcmp.eq.f32.partialorder %v2357_v54, %v1491_v13 }
 0x9a3   :  { %v1155_v55 = vpop.xlane.xlu1 %1154  ;;  %v1496_v0 = vsel %vm1494_vm14, %v1989_v40, 128  ;;  %v479_v15 = vpop.xlane.xlu0 %478 }
 0x9a4   :  { %vm1157_vm15 = vcmp.eq.f32.partialorder %v2362_v10, %v1155_v55  ;;  %v1499_v34 = vshra.s32 %v1496_v0, 16  ;;  %vm481_vm1 = vcmp.eq.f32.partialorder %v2367_v24, %v479_v15  ;;  %v1498_v13 = vand.u32 65535, %v1496_v0 }
 0x9a5   :  { %v1159_v16 = vsel %vm1157_vm15, %v1989_v40, 128  ;;  %v483_v63 = vsel %vm481_vm1, %v1989_v40, 128 }
 0x9a6   :  { %v1175_v44 = vshra.s32 %v1159_v16, 16  ;;  %v1501_v23 = vcvt.s32.f32 %v1499_v34  ;;  %v499_v4 = vshra.s32 %v483_v63, 16  ;;  %v498_v31 = vand.u32 65535, %v483_v63 }
 0x9a7   :  { %v1500_v55 = vcvt.s32.f32 %v1498_v13 }
 0x9a8   :  { %v1177_v5 = vcvt.s32.f32 %v1175_v44  ;;  %v501_v18 = vcvt.s32.f32 %v499_v4  ;;  %1502 = vmin.xlane.f32.xlu1 %v1501_v23  ;;  %v500_v48 = vcvt.s32.f32 %v498_v31 }
 0x9aa   :  { %1178 = vmin.xlane.f32.xlu0 %v1177_v5  ;;  %502 = vmin.xlane.f32.xlu2 %v501_v18 }
 0x9ab   :  { %v1493_v53 = vpop.xlane.xlu1 %1492 }
 0x9ac   :  { %vm1495_vm2 = vcmp.eq.f32.partialorder %v2372_v43, %v1493_v53 }
 0x9ad   :  { %v1497_v59 = vsel %vm1495_vm2, %v1989_v40, 128 }
 0x9ae   :  { %v1513_v56 = vshra.s32 %v1497_v59, 16  ;;  %v1512_v4 = vand.u32 65535, %v1497_v59 }
 0x9b0   :  { %v1515_v1 = vcvt.s32.f32 %v1513_v56  ;;  %v1514_v0 = vcvt.s32.f32 %v1512_v4 }
 0x9b2   :  { %1516 = vmin.xlane.f32.xlu0 %v1515_v1 }
 0xa04   :  { %v489_v25 = vpop.xlane.xlu1 %488 }
 0xa05   :  { %vm490_vm3 = vcmp.eq.f32.partialorder %v487_v12, %v489_v25  ;;  %v1174_v12 = vand.u32 65535, %v1159_v16  ;;  %v495_v63 = vcvt.f32.s32 %v489_v25 }
 0xa06   :  { %v491_v11 = vsel %vm490_vm3, %v486_v7, inf }
 0xa07   :  { %492 = vmin.xlane.f32.xlu0 %v491_v11 }
 0xa0d   :  { %v827_v6 = vpop.xlane.xlu2 %826 }
 0xa0e   :  { %vm828_vm4 = vcmp.eq.f32.partialorder %v825_v35, %v827_v6  ;;  %v1176_v35 = vcvt.s32.f32 %v1174_v12 }
 0xa0f   :  { %v829_v29 = vsel %vm828_vm4, %v824_v3, inf }
 0xa10   :  { %830 = vmin.xlane.f32.xlu1 %v829_v29 }
 0xa15   :  { %v841_v17 = vpop.xlane.xlu2 %840  ;;  %v1165_v27 = vpop.xlane.xlu0 %1164 }
 0xa16   :  { %vm842_vm5 = vcmp.eq.f32.partialorder %v839_v47, %v841_v17  ;;  %vm1166_vm6 = vcmp.eq.f32.partialorder %v1163_v46, %v1165_v27  ;;  %v1171_v29 = vcvt.f32.s32 %v1165_v27 }
 0xa17   :  { %v843_v39 = vsel %vm842_vm5, %v838_v62, inf  ;;  %v1167_v28 = vsel %vm1166_vm6, %v1162_v57, inf }
 0xa18   :  { %844 = vmin.xlane.f32.xlu1 %v843_v39  ;;  %1168 = vmin.xlane.f32.xlu2 %v1167_v28 }
 0xa1b   :  { %v1503_v15 = vpop.xlane.xlu1 %1502 }
 0xa1c   :  { %vm1504_vm7 = vcmp.eq.f32.partialorder %v1501_v23, %v1503_v15  ;;  %v496_v23 = vshll.u32 %v495_v63, 16  ;;  %v1509_v13 = vcvt.f32.s32 %v1503_v15 }
 0xa1d   :  { %v1179_v34 = vpop.xlane.xlu0 %1178  ;;  %v503_v2 = vpop.xlane.xlu2 %502  ;;  %v1505_v44 = vsel %vm1504_vm7, %v1500_v55, inf }
 0xa1e   :  { %vm1180_vm8 = vcmp.eq.f32.partialorder %v1177_v5, %v1179_v34  ;;  %vm504_vm9 = vcmp.eq.f32.partialorder %v501_v18, %v503_v2  ;;  %1506 = vmin.xlane.f32.xlu0 %v1505_v44  ;;  %v833_v5 = vcvt.f32.s32 %v827_v6  ;;  %v1185_v12 = vcvt.f32.s32 %v1179_v34 }
 0xa1f   :  { %v1181_v47 = vsel %vm1180_vm8, %v1176_v35, inf  ;;  %v505_v46 = vsel %vm504_vm9, %v500_v48, inf  ;;  %v1510_v55 = vshll.u32 %v1509_v13, 16 }
 0xa20   :  { %1182 = vmin.xlane.f32.xlu2 %v1181_v47  ;;  %506 = vmin.xlane.f32.xlu1 %v505_v46  ;;  %v834_v11 = vshll.u32 %v833_v5, 16  ;;  %v1186_v34 = vshll.u32 %v1185_v12, 16 }
 0xa25   :  { %v1517_v53 = vpop.xlane.xlu0 %1516 }
 0xa26   :  { %vm1518_vm10 = vcmp.eq.f32.partialorder %v1515_v1, %v1517_v53  ;;  %v847_v1 = vcvt.f32.s32 %v841_v17  ;;  %v509_v17 = vcvt.f32.s32 %v503_v2 }
 0xa27   :  { %v1519_v16 = vsel %vm1518_vm10, %v1514_v0, inf }
 0xa28   :  { %1520 = vmin.xlane.f32.xlu2 %v1519_v16  ;;  %v848_v8 = vshll.u32 %v847_v1, 16  ;;  %v510_v47 = vshll.u32 %v509_v17, 16 }
 0xa7a   :  { %v493_v56 = vpop.xlane.xlu0 %492 }
 0xa7b   :  { %v494_v20 = vcvt.f32.s32 %v493_v56 }
 0xa7d   :  { %v497_v7 = vadd.s32 %v496_v23, %v494_v20 }
 0xa7f   :  { %vm512_vm11 = vcmp.eq.s32.totalorder %v1989_v40, %v497_v7 }
 0xa80   :  { %v2393_v18 = vsel %vm512_vm11, -3.4028235e+38, %v2336_v22  ;;  %v1172_v22 = vshll.u32 %v1171_v29, 16 }
 0xa81   :  { %516 = vmax.xlane.f32.xlu2 %v2393_v18 }
 0xa83   :  { %v831_v59 = vpop.xlane.xlu1 %830 }
 0xa84   :  { %v832_v9 = vcvt.f32.s32 %v831_v59 }
 0xa86   :  { %v835_v3 = vadd.s32 %v834_v11, %v832_v9 }
 0xa88   :  { %vm850_vm12 = vcmp.eq.s32.totalorder %v1989_v40, %v835_v3 }
 0xa89   :  { %v2398_v25 = vsel %vm850_vm12, -3.4028235e+38, %v2341_v19 }
 0xa8a   :  { %854 = vmax.xlane.f32.xlu0 %v2398_v25 }
 0xa8b   :  { %v1169_v52 = vpop.xlane.xlu2 %1168  ;;  %v845_v6 = vpop.xlane.xlu1 %844 }
 0xa8c   :  { %v1170_v62 = vcvt.f32.s32 %v1169_v52  ;;  %v846_v57 = vcvt.f32.s32 %v845_v6 }
 0xa8e   :  { %v1173_v39 = vadd.s32 %v1172_v22, %v1170_v62  ;;  %v849_v28 = vadd.s32 %v848_v8, %v846_v57 }
 0xa90   :  { %vm1188_vm13 = vcmp.eq.s32.totalorder %v1989_v40, %v1173_v39  ;;  %vm851_vm14 = vcmp.eq.s32.totalorder %v1989_v40, %v849_v28 }
 0xa91   :  { %v2404_v19 = vsel %vm1188_vm13, -3.4028235e+38, %v2347_v42  ;;  %v2407_v27 = vsel %vm851_vm14, -3.4028235e+38, %v2350_v14  ;;  %v1507_v31 = vpop.xlane.xlu0 %1506  ;;  %v1523_v14 = vcvt.f32.s32 %v1517_v53 }
 0xa92   :  { %1192 = vmax.xlane.f32.xlu1 %v2404_v19  ;;  %856 = vmax.xlane.f32.xlu0 %v2407_v27  ;;  %v1508_v35 = vcvt.f32.s32 %v1507_v31 }
 0xa93   :  { %v1183_v15 = vpop.xlane.xlu2 %1182  ;;  %v507_v44 = vpop.xlane.xlu1 %506  ;;  %v1524_v56 = vshll.u32 %v1523_v14, 16 }
 0xa94   :  { %v1184_v48 = vcvt.f32.s32 %v1183_v15  ;;  %v1511_v46 = vadd.s32 %v1510_v55, %v1508_v35  ;;  %v508_v2 = vcvt.f32.s32 %v507_v44 }
 0xa96   :  { %v1187_v4 = vadd.s32 %v1186_v34, %v1184_v48  ;;  %v511_v42 = vadd.s32 %v510_v47, %v508_v2  ;;  %vm1526_vm15 = vcmp.eq.s32.totalorder %v1989_v40, %v1511_v46 }
 0xa97   :  { %v2413_v0 = vsel %vm1526_vm15, -3.4028235e+38, %v2357_v54 }
 0xa98   :  { %vm1189_vm1 = vcmp.eq.s32.totalorder %v1989_v40, %v1187_v4  ;;  %1530 = vmax.xlane.f32.xlu2 %v2413_v0  ;;  %vm513_vm2 = vcmp.eq.s32.totalorder %v1989_v40, %v511_v42 }
 0xa99   :  { %v2418_v16 = vsel %vm1189_vm1, -3.4028235e+38, %v2362_v10  ;;  %v2423_v63 = vsel %vm513_vm2, -3.4028235e+38, %v2367_v24 }
 0xa9a   :  { %1194 = vmax.xlane.f32.xlu1 %v2418_v16  ;;  %518 = vmax.xlane.f32.xlu0 %v2423_v63 }
 0xa9b   :  { %v1521_v53 = vpop.xlane.xlu2 %1520 }
 0xa9c   :  { %v1522_v54 = vcvt.f32.s32 %v1521_v53 }
 0xa9e   :  { %v1525_v23 = vadd.s32 %v1524_v56, %v1522_v54 }
 0xaa0   :  { %vm1527_vm3 = vcmp.eq.s32.totalorder %v1989_v40, %v1525_v23 }
 0xaa1   :  { %v2428_v20 = vsel %vm1527_vm3, -3.4028235e+38, %v2372_v43 }
 0xaa2   :  { %1532 = vmax.xlane.f32.xlu1 %v2428_v20 }
 0xaf4   :  { %v517_v10 = vpop.xlane.xlu2 %516 }
 0xaf5   :  { %vm520_vm4 = vcmp.eq.f32.partialorder %v2393_v18, %v517_v10 }
 0xaf6   :  { %v522_v7 = vsel %vm520_vm4, %v1989_v40, 128 }
 0xaf7   :  { %v525_v24 = vshra.s32 %v522_v7, 16  ;;  %v524_v4 = vand.u32 65535, %v522_v7 }
 0xaf9   :  { %v527_v5 = vcvt.s32.f32 %v525_v24  ;;  %v526_v42 = vcvt.s32.f32 %v524_v4 }
 0xafb   :  { %528 = vmin.xlane.f32.xlu1 %v527_v5 }
 0xafd   :  { %v855_v59 = vpop.xlane.xlu0 %854 }
 0xafe   :  { %vm858_vm5 = vcmp.eq.f32.partialorder %v2398_v25, %v855_v59 }
 0xaff   :  { %v860_v11 = vsel %vm858_vm5, %v1989_v40, 128 }
 0xb00   :  { %v863_v9 = vshra.s32 %v860_v11, 16  ;;  %v862_v56 = vand.u32 65535, %v860_v11 }
 0xb02   :  { %v865_v3 = vcvt.s32.f32 %v863_v9  ;;  %v864_v54 = vcvt.s32.f32 %v862_v56 }
 0xb04   :  { %866 = vmin.xlane.f32.xlu2 %v865_v3 }
 0xb05   :  { %v857_v43 = vpop.xlane.xlu0 %856  ;;  %v1193_v1 = vpop.xlane.xlu1 %1192 }
 0xb06   :  { %vm859_vm6 = vcmp.eq.f32.partialorder %v2407_v27, %v857_v43  ;;  %vm1196_vm7 = vcmp.eq.f32.partialorder %v2404_v19, %v1193_v1 }
 0xb07   :  { %v861_v29 = vsel %vm859_vm6, %v1989_v40, 128  ;;  %v1198_v52 = vsel %vm1196_vm7, %v1989_v40, 128 }
 0xb08   :  { %v877_v6 = vshra.s32 %v861_v29, 16  ;;  %v1201_v8 = vshra.s32 %v1198_v52, 16  ;;  %v876_v24 = vand.u32 65535, %v861_v29  ;;  %v1200_v59 = vand.u32 65535, %v1198_v52 }
 0xb0a   :  { %v879_v22 = vcvt.s32.f32 %v877_v6  ;;  %v1203_v62 = vcvt.s32.f32 %v1201_v8  ;;  %v878_v9 = vcvt.s32.f32 %v876_v24  ;;  %v1202_v43 = vcvt.s32.f32 %v1200_v59 }
 0xb0b   :  { %v1531_v57 = vpop.xlane.xlu2 %1530 }
 0xb0c   :  { %880 = vmin.xlane.f32.xlu2 %v879_v22  ;;  %1204 = vmin.xlane.f32.xlu0 %v1203_v62  ;;  %vm1534_vm8 = vcmp.eq.f32.partialorder %v2413_v0, %v1531_v57 }
 0xb0d   :  { %v1195_v39 = vpop.xlane.xlu1 %1194  ;;  %v1536_v28 = vsel %vm1534_vm8, %v1989_v40, 128  ;;  %v519_v13 = vpop.xlane.xlu0 %518 }
 0xb0e   :  { %vm1197_vm9 = vcmp.eq.f32.partialorder %v2418_v16, %v1195_v39  ;;  %v1539_v12 = vshra.s32 %v1536_v28, 16  ;;  %vm521_vm10 = vcmp.eq.f32.partialorder %v2423_v63, %v519_v13  ;;  %v1538_v57 = vand.u32 65535, %v1536_v28 }
 0xb0f   :  { %v1199_v17 = vsel %vm1197_vm9, %v1989_v40, 128  ;;  %v523_v31 = vsel %vm521_vm10, %v1989_v40, 128 }
 0xb10   :  { %v1215_v55 = vshra.s32 %v1199_v17, 16  ;;  %v1541_v35 = vcvt.s32.f32 %v1539_v12  ;;  %v539_v15 = vshra.s32 %v523_v31, 16  ;;  %v538_v11 = vand.u32 65535, %v523_v31 }
 0xb11   :  { %v1540_v39 = vcvt.s32.f32 %v1538_v57 }
 0xb12   :  { %v1217_v34 = vcvt.s32.f32 %v1215_v55  ;;  %v541_v48 = vcvt.s32.f32 %v539_v15  ;;  %1542 = vmin.xlane.f32.xlu1 %v1541_v35  ;;  %v540_v52 = vcvt.s32.f32 %v538_v11  ;;  %v1603_v11 = vld [vmem:[#allocation7 + $0x78] sm:$0xff] }
 0xb13   :  { %1652 = vmatpush.msra.mxu1 %v1603_v11  ;;  %v1235_v11 = vsub.f32 %v1971_v30, %v2001_v49 }
 0xb14   :  { %1218 = vmin.xlane.f32.xlu0 %v1217_v34  ;;  %542 = vmin.xlane.f32.xlu2 %v541_v48 }
 0xb15   :  { %v1533_v44 = vpop.xlane.xlu1 %1532 }
 0xb16   :  { %vm1535_vm11 = vcmp.eq.f32.partialorder %v2428_v20, %v1533_v44 }
 0xb17   :  { %v1537_v47 = vsel %vm1535_vm11, %v1989_v40, 128 }
 0xb18   :  { %v1553_v46 = vshra.s32 %v1537_v47, 16 }
 0xb1a   :  { %v1555_v2 = vcvt.s32.f32 %v1553_v46 }
 0xb1c   :  { %1556 = vmin.xlane.f32.xlu0 %v1555_v2 }
 0xb6e   :  { %v529_v14 = vpop.xlane.xlu1 %528 }
 0xb6f   :  { %vm530_vm12 = vcmp.eq.f32.partialorder %v527_v5, %v529_v14  ;;  %v1214_v5 = vand.u32 65535, %v1199_v17  ;;  %v1552_v17 = vand.u32 65535, %v1537_v47  ;;  %v535_v15 = vcvt.f32.s32 %v529_v14 }
 0xb70   :  { %v531_v53 = vsel %vm530_vm12, %v526_v42, inf }
 0xb71   :  { %532 = vmin.xlane.f32.xlu0 %v531_v53  ;;  %v1554_v31 = vcvt.s32.f32 %v1552_v17  ;;  %v536_v46 = vshll.u32 %v535_v15, 16  ;;  %v99_v15 = vld [vmem:[#allocation4 + $0x98] sm:$0xff] }
 0xb72   :  { %223 = vmatpush.msrb.mxu0 %v99_v15 }
 0xb77   :  { %v867_v23 = vpop.xlane.xlu2 %866 }
 0xb78   :  { %vm868_vm13 = vcmp.eq.f32.partialorder %v865_v3, %v867_v23  ;;  %v1216_v3 = vcvt.s32.f32 %v1214_v5  ;;  %v873_v42 = vcvt.f32.s32 %v867_v23 }
 0xb79   :  { %v869_v10 = vsel %vm868_vm13, %v864_v54, inf }
 0xb7a   :  { %870 = vmin.xlane.f32.xlu1 %v869_v10  ;;  %v874_v54 = vshll.u32 %v873_v42, 16 }
 0xb7f   :  { %v881_v1 = vpop.xlane.xlu2 %880  ;;  %v1205_v6 = vpop.xlane.xlu0 %1204 }
 0xb80   :  { %vm882_vm14 = vcmp.eq.f32.partialorder %v879_v22, %v881_v1  ;;  %vm1206_vm15 = vcmp.eq.f32.partialorder %v1203_v62, %v1205_v6  ;;  %v887_v24 = vcvt.f32.s32 %v881_v1  ;;  %v1211_v59 = vcvt.f32.s32 %v1205_v6 }
 0xb81   :  { %v883_v7 = vsel %vm882_vm14, %v878_v9, inf  ;;  %v1207_v8 = vsel %vm1206_vm15, %v1202_v43, inf  ;;  %v896_v9 = vsub.f32 %v1968_v26, %v1996_v45  ;;  %v1602_v45 = vld [vmem:[#allocation7 + $0x70] sm:$0xff] }
 0xb82   :  { %884 = vmin.xlane.f32.xlu1 %v883_v7  ;;  %1208 = vmin.xlane.f32.xlu2 %v1207_v8  ;;  %v1212_v8 = vshll.u32 %v1211_v59, 16 }
 0xb83   :  { %1653 = vmatpush.msra.mxu1 %v1602_v45 }
 0xb85   :  { %v2447_v13 = vpop.xlane.xlu1 %1542 }
 0xb86   :  { %vm1544_vm1 = vcmp.eq.f32.partialorder %v1541_v35, %v2447_v13  ;;  %v1549_v6 = vcvt.f32.s32 %v2447_v13  ;;  %v1617_v13 = vld [vmem:[#allocation7 + $0xe8] sm:$0xff] }
 0xb87   :  { %v2450_v29 = vpop.xlane.xlu0 %1218  ;;  %v2452_v12 = vpop.xlane.xlu2 %542  ;;  %v1545_v22 = vsel %vm1544_vm1, %v1540_v39, inf }
 0xb88   :  { %vm1220_vm2 = vcmp.eq.f32.partialorder %v1217_v34, %v2450_v29  ;;  %vm544_vm3 = vcmp.eq.f32.partialorder %v541_v48, %v2452_v12  ;;  %1546 = vmin.xlane.f32.xlu0 %v1545_v22  ;;  %v558_v48 = vsub.f32 %v1965_v21, %v1991_v41  ;;  %v1618_v22 = vld [vmem:[#allocation7 + $0xf0] sm:$0xff] }
 0xb89   :  { %v1221_v62 = vsel %vm1220_vm2, %v1216_v3, inf  ;;  %v545_v28 = vsel %vm544_vm3, %v540_v52, inf  ;;  %v1619_v3 = vld [vmem:[#allocation7 + $0xf8] sm:$0xff]  ;;  %v1601_v52 = vld [vmem:[#allocation7 + $0x68] sm:$0xff] }
 0xb8a   :  { %1222 = vmin.xlane.f32.xlu2 %v1221_v62  ;;  %546 = vmin.xlane.f32.xlu1 %v545_v28  ;;  %v1234_v62 = vsub.f32 %v1973_v32, %v2003_v50  ;;  %v549_v28 = vcvt.f32.s32 %v2452_v12 }
 0xb8b   :  { %1675 = vmatpush.msrb.mxu2 %v1619_v3  ;;  %1654 = vmatpush.msra.mxu1 %v1601_v52 }
 0xb8d   :  { %1676 = vmatpush.msrb.mxu2 %v1618_v22 }
 0xb8f   :  { %v2456_v55 = vpop.xlane.xlu0 %1556  ;;  %1677 = vmatpush.msrb.mxu2 %v1617_v13  ;;  %v1594_v13 = vld [vmem:[#allocation7 + $0x30] sm:$0xff] }
 0xb90   :  { %vm1558_vm4 = vcmp.eq.f32.partialorder %v1555_v2, %v2456_v55 }
 0xb91   :  { %v1559_v35 = vsel %vm1558_vm4, %v1554_v31, inf }
 0xb92   :  { %1560 = vmin.xlane.f32.xlu2 %v1559_v35  ;;  %v1600_v35 = vld [vmem:[#allocation7 + $0x60] sm:$0xff] }
 0xb93   :  { %1655 = vmatpush.msra.mxu1 %v1600_v35 }
 0xbe4   :  { %v533_v44 = vpop.xlane.xlu0 %532 }
 0xbe5   :  { %v534_v34 = vcvt.f32.s32 %v533_v44  ;;  %v1550_v44 = vshll.u32 %v1549_v6, 16  ;;  %v1613_v6 = vld [vmem:[#allocation7 + $0xc8] sm:$0xff] }
 0xbe7   :  { %v537_v4 = vadd.s32 %v536_v46, %v534_v34  ;;  %v1616_v34 = vld [vmem:[#allocation7 + $0xe0] sm:$0xff] }
 0xbe8   :  { %1678 = vmatpush.msrb.mxu2 %v1616_v34  ;;  %v1651_v34 = vld [vmem:[#allocation7 + $0x1f8] sm:$0xff] }
 0xbe9   :  { %vm552_vm5 = vcmp.eq.s32.totalorder %v1989_v40, %v537_v4  ;;  %v94_v4 = vld [vmem:[#allocation4 + $0x70] sm:$0xff] }
 0xbea   :  { %v554_v47 = vsel %vm552_vm5, -3.4028235e+38, %v2393_v18  ;;  %224 = vmatpush.msrb.mxu0 %v94_v4  ;;  %v1611_v4 = vld [vmem:[#allocation7 + $0xb8] sm:$0xff] }
 0xbeb   :  { %vm556_vm6 = vcmp.ne.f32.partialorder %v554_v47, %v1965_v21  ;;  %v888_v21 = vshll.u32 %v887_v24, 16  ;;  %v1615_v47 = vld [vmem:[#allocation7 + $0xd8] sm:$0xff] }
 0xbec   :  { %v560_v53 = vsel %vm556_vm6, %v558_v48, -3.4028235e+38  ;;  %1679 = vmatpush.msrb.mxu2 %v1615_v47  ;;  %v1649_v47 = vld [vmem:[#allocation7 + $0x1e8] sm:$0xff] }
 0xbed   :  { %v562_v56 = vmul.f32 1.442695, %v560_v53  ;;  %v871_v2 = vpop.xlane.xlu1 %870 }
 0xbee   :  { %v872_v10 = vcvt.f32.s32 %v871_v2 }
 0xbef   :  { %1775 = vpow2.f32 %v562_v56 }
 0xbf0   :  { %v875_v14 = vadd.s32 %v874_v54, %v872_v10  ;;  %v1634_v54 = vld [vmem:[#allocation7 + $0x170] sm:$0xff]  ;;  %v89_v10 = vld [vmem:[#allocation4 + $0x48] sm:$0xff] }
 0xbf1   :  { %225 = vmatpush.msrb.mxu0 %v89_v10  ;;  %v1608_v10 = vld [vmem:[#allocation7 + $0xa0] sm:$0xff] }
 0xbf2   :  { %vm890_vm7 = vcmp.eq.s32.totalorder %v1989_v40, %v875_v14  ;;  %v550_v14 = vshll.u32 %v549_v28, 16  ;;  %v1573_v28 = vsub.f32 %v1982_v37, %v2022_v61  ;;  %v1592_v61 = vld [vmem:[#allocation7 + $0x20] sm:$0xff] }
 0xbf3   :  { %v892_v41 = vsel %vm890_vm7, -3.4028235e+38, %v2398_v25  ;;  %v1225_v25 = vcvt.f32.s32 %v2450_v29  ;;  %v897_v29 = vsub.f32 %v1975_v33, %v2005_v51  ;;  %v1635_v51 = vld [vmem:[#allocation7 + $0x178] sm:$0xff] }
 0xbf4   :  { %vm894_vm8 = vcmp.ne.f32.partialorder %v892_v41, %v1968_v26  ;;  %1698 = vmatpush.msrb.mxu3 %v1635_v51  ;;  %v1633_v41 = vld [vmem:[#allocation7 + $0x168] sm:$0xff]  ;;  %v1591_v51 = vld [vmem:[#allocation7 + $0x18] sm:$0xff] }
 0xbf5   :  { %v2469_v18 = vpop.eup %1775  ;;  %v898_v23 = vsel %vm894_vm8, %v896_v9, -3.4028235e+38  ;;  %v1209_v43 = vpop.xlane.xlu2 %1208  ;;  %v1226_v50 = vshll.u32 %v1225_v25, 16  ;;  %v1598_v9 = vld [vmem:[#allocation7 + $0x50] sm:$0xff]  ;;  %v1596_v25 = vld [vmem:[#allocation7 + $0x40] sm:$0xff] }
 0xbf6   :  { %v885_v7 = vpop.xlane.xlu1 %884  ;;  %v900_v57 = vmul.f32 1.442695, %v898_v23  ;;  %v1210_v5 = vcvt.f32.s32 %v1209_v43  ;;  %566 = vadd.xlane.f32.xlu2 %v2469_v18  ;;  %v1614_v23 = vld [vmem:[#allocation7 + $0xd0] sm:$0xff]  ;;  %1699 = vmatpush.msrb.mxu3 %v1634_v54  ;;  %v84_v43 = vld [vmem:[#allocation4 + $0x20] sm:$0xff] }
 0xbf7   :  { %v886_v1 = vcvt.f32.s32 %v885_v7  ;;  %1680 = vmatpush.msrb.mxu2 %v1614_v23  ;;  %226 = vmatpush.msrb.mxu0 %v84_v43  ;;  %v1588_v54 = vld [vmem:[#allocation7] sm:$0xff]  ;;  %v1626_v23 = vld [vmem:[#allocation7 + $0x130] sm:$0xff]  ;;  %v1645_v43 = vld [vmem:[#allocation7 + $0x1c8] sm:$0xff] }
 0xbf8   :  { %1777 = vpow2.f32 %v900_v57  ;;  %v1213_v26 = vadd.s32 %v1212_v8, %v1210_v5  ;;  %v1597_v8 = vld [vmem:[#allocation7 + $0x48] sm:$0xff]  ;;  %v1572_v57 = vsub.f32 %v1980_v36, %v2015_v58  ;;  %v1563_v5 = vcvt.f32.s32 %v2456_v55  ;;  %1700 = vmatpush.msrb.mxu3 %v1633_v41  ;;  %v1646_v41 = vld [vmem:[#allocation7 + $0x1d0] sm:$0xff] }
 0xbf9   :  { %v889_v39 = vadd.s32 %v888_v21, %v886_v1  ;;  %v559_v58 = vsub.f32 %v1984_v38, %v2020_v60  ;;  %1681 = vmatpush.msrb.mxu2 %v1613_v6  ;;  %1721 = vmatpush.msra.mxu0 %v1651_v34  ;;  %v1643_v6 = vld [vmem:[#allocation7 + $0x1b8] sm:$0xff] }
 0xbfa   :  { %vm1228_vm9 = vcmp.eq.s32.totalorder %v1989_v40, %v1213_v26  ;;  %v1807_v26 = vld [vmem:[#allocation2] sm:$0xff]  ;;  %v1564_v52 = vshll.u32 %v1563_v5, 16  ;;  %v1604_v5 = vld [vmem:[#allocation7 + $0x80] sm:$0xff] }
 0xbfb   :  { %vm891_vm10 = vcmp.eq.s32.totalorder %v1989_v40, %v889_v39  ;;  %v1230_v17 = vsel %vm1228_vm9, -3.4028235e+38, %v2404_v19  ;;  %v1547_v46 = vpop.xlane.xlu0 %1546  ;;  %1761 = vmatmul.msk.f32.vlgmr.msrb.gmra.mxu0 %vm112_vm0, %v1807_v26  ;;  %v1595_v39 = vld [vmem:[#allocation7 + $0x38] sm:$0xff]  ;;  %v1620_v26 = vld [vmem:[#allocation7 + $0x100] sm:$0xff] }
 0xbfc   :  { %v893_v31 = vsel %vm891_vm10, -3.4028235e+38, %v2407_v27  ;;  %vm1232_vm11 = vcmp.ne.f32.partialorder %v1230_v17, %v1973_v32  ;;  %v1548_v19 = vcvt.f32.s32 %v1547_v46  ;;  %v1599_v27 = vld [vmem:[#allocation7 + $0x58] sm:$0xff]  ;;  %v1632_v46 = vld [vmem:[#allocation7 + $0x160] sm:$0xff] }
 0xbfd   :  { %vm895_vm12 = vcmp.ne.f32.partialorder %v893_v31, %v1975_v33  ;;  %v1236_v12 = vsel %vm1232_vm11, %v1234_v62, -3.4028235e+38  ;;  %v1223_v42 = vpop.xlane.xlu2 %1222  ;;  %1656 = vmatpush.msra.mxu1 %v1599_v27  ;;  %v1808_v31 = vld [vmem:[#allocation2 + $0x8] sm:$0xff]  ;;  %1701 = vmatpush.msrb.mxu3 %v1632_v46 }
 0xbfe   :  { %v899_v48 = vsel %vm895_vm12, %v897_v29, -3.4028235e+38  ;;  %v2485_v53 = vpop.eup %1777  ;;  %v1238_v56 = vmul.f32 1.442695, %v1236_v12  ;;  %v1224_v2 = vcvt.f32.s32 %v1223_v42  ;;  %v547_v33 = vpop.xlane.xlu1 %546  ;;  %v1551_v24 = vadd.s32 %v1550_v44, %v1548_v19  ;;  %v1631_v12 = vld [vmem:[#allocation7 + $0x158] sm:$0xff]  ;;  %v1590_v19 = vld [vmem:[#allocation7 + $0x10] sm:$0xff] }
 0xbff   :  { %v902_v32 = vmul.f32 1.442695, %v899_v48  ;;  %v548_v59 = vcvt.f32.s32 %v547_v33  ;;  %904 = vadd.xlane.f32.xlu0 %v2485_v53  ;;  %1657 = vmatpush.msra.mxu1 %v1598_v9  ;;  %v1650_v48 = vld [vmem:[#allocation7 + $0x1f0] sm:$0xff]  ;;  %v1648_v33 = vld [vmem:[#allocation7 + $0x1e0] sm:$0xff]  ;;  %v1627_v9 = vld [vmem:[#allocation7 + $0x138] sm:$0xff] }
 0xc00   :  { %1779 = vpow2.f32 %v1238_v56  ;;  %v1227_v21 = vadd.s32 %v1226_v50, %v1224_v2  ;;  %vm1566_vm13 = vcmp.eq.s32.totalorder %v1989_v40, %v1551_v24  ;;  %v1610_v42 = vld [vmem:[#allocation7 + $0xb0] sm:$0xff]  ;;  %1702 = vmatpush.msrb.mxu3 %v1631_v12  ;;  %1722 = vmatpush.msra.mxu0 %v1650_v48  ;;  %v1589_v56 = vld [vmem:[#allocation7 + $0x8] sm:$0xff]  ;;  %v1647_v24 = vld [vmem:[#allocation7 + $0x1d8] sm:$0xff] }
 0xc01   :  { %1781 = vpow2.f32 %v902_v32  ;;  %v551_v7 = vadd.s32 %v550_v14, %v548_v59  ;;  %v1568_v1 = vsel %vm1566_vm13, -3.4028235e+38, %v2413_v0  ;;  %1658 = vmatpush.msra.mxu1 %v1597_v8  ;;  %v1630_v27 = vld [vmem:[#allocation7 + $0x150] sm:$0xff]  ;;  %v1609_v32 = vld [vmem:[#allocation7 + $0xa8] sm:$0xff]  ;;  %v1628_v14 = vld [vmem:[#allocation7 + $0x140] sm:$0xff] }
 0xc02   :  { %vm1229_vm14 = vcmp.eq.s32.totalorder %v1989_v40, %v1227_v21  ;;  %vm1570_vm15 = vcmp.ne.f32.partialorder %v1568_v1, %v1980_v36  ;;  %v1629_v2 = vld [vmem:[#allocation7 + $0x148] sm:$0xff]  ;;  %1703 = vmatpush.msrb.mxu3 %v1630_v27  ;;  %1723 = vmatpush.msra.mxu0 %v1649_v47  ;;  %v1607_v59 = vld [vmem:[#allocation7 + $0x98] sm:$0xff]  ;;  %v1606_v21 = vld [vmem:[#allocation7 + $0x90] sm:$0xff] }
 0xc03   :  { %v1231_v45 = vsel %vm1229_vm14, -3.4028235e+38, %v2418_v16  ;;  %vm553_vm1 = vcmp.eq.s32.totalorder %v1989_v40, %v551_v7  ;;  %v1574_v0 = vsel %vm1570_vm15, %v1572_v57, -3.4028235e+38  ;;  %1659 = vmatpush.msra.mxu1 %v1596_v25  ;;  %1762 = vmatmul.msk.f32.gmra.mxu0 %vm112_vm0, %v1808_v31  ;;  %v1605_v7 = vld [vmem:[#allocation7 + $0x88] sm:$0xff]  ;;  %v1644_v57 = vld [vmem:[#allocation7 + $0x1c0] sm:$0xff] }
 0xc04   :  { %vm1233_vm2 = vcmp.ne.f32.partialorder %v1231_v45, %v1971_v30  ;;  %v555_v55 = vsel %vm553_vm1, -3.4028235e+38, %v2423_v63  ;;  %v1576_v36 = vmul.f32 1.442695, %v1574_v0  ;;  %1704 = vmatpush.msrb.mxu3 %v1629_v2  ;;  %1724 = vmatpush.msra.mxu0 %v1648_v33  ;;  %v1625_v8 = vld [vmem:[#allocation7 + $0x128] sm:$0xff]  ;;  %v1624_v1 = vld [vmem:[#allocation7 + $0x120] sm:$0xff] }
 0xc05   :  { %v1237_v49 = vsel %vm1233_vm2, %v1235_v11, -3.4028235e+38  ;;  %vm557_vm3 = vcmp.ne.f32.partialorder %v555_v55, %v1984_v38  ;;  %v1561_v16 = vpop.xlane.xlu2 %1560  ;;  %1660 = vmatpush.msra.mxu1 %v1595_v39  ;;  %v1593_v38 = vld [vmem:[#allocation7 + $0x28] sm:$0xff]  ;;  %v1623_v11 = vld [vmem:[#allocation7 + $0x118] sm:$0xff]  ;;  %v1642_v45 = vld [vmem:[#allocation7 + $0x1b0] sm:$0xff] }
 0xc06   :  { %v2505_v3 = vpop.eup %1779  ;;  %v1240_v60 = vmul.f32 1.442695, %v1237_v49  ;;  %v561_v22 = vsel %vm557_vm3, %v559_v58, -3.4028235e+38  ;;  %v1562_v62 = vcvt.f32.s32 %v1561_v16  ;;  %1783 = vpow2.f32 %v1576_v36  ;;  %1705 = vmatpush.msrb.mxu3 %v1628_v14  ;;  %1725 = vmatpush.msra.mxu0 %v1647_v24  ;;  %v1622_v25 = vld [vmem:[#allocation7 + $0x110] sm:$0xff]  ;;  %v1641_v58 = vld [vmem:[#allocation7 + $0x1a8] sm:$0xff] }
 0xc07   :  { %v2507_v30 = vpop.eup %1781  ;;  %v564_v63 = vmul.f32 1.442695, %v561_v22  ;;  %1242 = vadd.xlane.f32.xlu1 %v2505_v3  ;;  %1661 = vmatpush.msra.mxu1 %v1594_v13  ;;  %v1621_v0 = vld [vmem:[#allocation7 + $0x108] sm:$0xff]  ;;  %v1640_v55 = vld [vmem:[#allocation7 + $0x1a0] sm:$0xff]  ;;  %v1639_v36 = vld [vmem:[#allocation7 + $0x198] sm:$0xff] }
 0xc08   :  { %1785 = vpow2.f32 %v1240_v60  ;;  %v1565_v29 = vadd.s32 %v1564_v52, %v1562_v62  ;;  %906 = vadd.xlane.f32.xlu0 %v2507_v30  ;;  %1706 = vmatpush.msrb.mxu3 %v1627_v9  ;;  %v1638_v49 = vld [vmem:[#allocation7 + $0x190] sm:$0xff]  ;;  %v1637_v16 = vld [vmem:[#allocation7 + $0x188] sm:$0xff]  ;;  %v1636_v52 = vld [vmem:[#allocation7 + $0x180] sm:$0xff] }
 0xc09   :  { %1787 = vpow2.f32 %v564_v63  ;;  %1662 = vmatpush.msra.mxu1 %v1593_v38  ;;  %1726 = vmatpush.msra.mxu0 %v1646_v41 }
 0xc0a   :  { %vm1567_vm4 = vcmp.eq.s32.totalorder %v1989_v40, %v1565_v29  ;;  %1707 = vmatpush.msrb.mxu3 %v1626_v23 }
 0xc0b   :  { %v1569_v17 = vsel %vm1567_vm4, -3.4028235e+38, %v2428_v20  ;;  %v1612_v20 = vld [vmem:[#allocation7 + $0xc0] sm:$0xff]  ;;  %1663 = vmatpush.msra.mxu1 %v1592_v61  ;;  %1727 = vmatpush.msra.mxu0 %v1645_v43 }
 0xc0c   :  { %vm1571_vm5 = vcmp.ne.f32.partialorder %v1569_v17, %v1982_v37  ;;  %v2517_v35 = vpop.eup %1783  ;;  %1682 = vmatpush.msrb.mxu2 %v1612_v20  ;;  %1708 = vmatpush.msrb.mxu3 %v1625_v8 }
 0xc0d   :  { %v1575_v15 = vsel %vm1571_vm5, %v1573_v28, -3.4028235e+38  ;;  %1580 = vadd.xlane.f32.xlu2 %v2517_v35  ;;  %1664 = vmatpush.msra.mxu1 %v1591_v51 }
 0xc0e   :  { %v2519_v44 = vpop.eup %1785  ;;  %v1578_v50 = vmul.f32 1.442695, %v1575_v15  ;;  %1683 = vmatpush.msrb.mxu2 %v1611_v4  ;;  %1728 = vmatpush.msra.mxu0 %v1644_v57 }
 0xc0f   :  { %v2522_v40 = vpop.eup %1787  ;;  %1244 = vadd.xlane.f32.xlu1 %v2519_v44  ;;  %1665 = vmatpush.msra.mxu1 %v1590_v19  ;;  %v1809_v19 = vld [vmem:[#allocation6] sm:$0x1f] }
 0xc10   :  { %1789 = vpow2.f32 %v1578_v50  ;;  %568 = vadd.xlane.f32.xlu0 %v2522_v40  ;;  %1684 = vmatpush.msrb.mxu2 %v1610_v42  ;;  %v106_v42 = vperm.slane %v1809_v19, 4 }
 0xc11   :  { %1666 = vmatpush.msra.mxu1 %v1589_v56  ;;  %1709 = vmatpush.msrb.mxu3 %v1624_v1 }
 0xc12   :  { %1685 = vmatpush.msrb.mxu2 %v1609_v32  ;;  %1729 = vmatpush.msra.mxu0 %v1643_v6 }
 0xc13   :  { %1667 = vmatpush.msra.mxu1 %v1588_v54  ;;  %1710 = vmatpush.msrb.mxu3 %v1623_v11 }
 0xc14   :  { %1686 = vmatpush.msrb.mxu2 %v1608_v10  ;;  %1730 = vmatpush.msra.mxu0 %v1642_v45 }
 0xc15   :  { %1711 = vmatpush.msrb.mxu3 %v1622_v25 }
 0xc16   :  { %v2526_v37 = vpop.eup %1789  ;;  %1687 = vmatpush.msrb.mxu2 %v1607_v59  ;;  %1731 = vmatpush.msra.mxu0 %v1641_v58 }
 0xc17   :  { %1582 = vadd.xlane.f32.xlu1 %v2526_v37  ;;  %1712 = vmatpush.msrb.mxu3 %v1621_v0 }
 0xc18   :  { %1688 = vmatpush.msrb.mxu2 %v1606_v21  ;;  %1732 = vmatpush.msra.mxu0 %v1640_v55 }
 0xc19   :  { %1713 = vmatpush.msrb.mxu3 %v1620_v26 }
 0xc1a   :  { %1689 = vmatpush.msrb.mxu2 %v1605_v7  ;;  %1733 = vmatpush.msra.mxu0 %v1639_v36 }
 0xc1c   :  { %1690 = vmatpush.msrb.mxu2 %v1604_v5  ;;  %1734 = vmatpush.msra.mxu0 %v1638_v49 }
 0xc1e   :  { %1735 = vmatpush.msra.mxu0 %v1637_v16 }
 0xc20   :  { %1736 = vmatpush.msra.mxu0 %v1636_v52 }
 0xc69   :  { %v567_v39 = vpop.xlane.xlu2 %566 }
 0xc6a   :  { %1791 = vrcp.f32 %v567_v39 }
 0xc70   :  { %v1792_v60 = vpop.eup %1791 }
 0xc71   :  { %v572_v22 = vmul.f32 %v1792_v60, %v2469_v18 }
 0xc72   :  { %v905_v62 = vpop.xlane.xlu0 %904 }
 0xc73   :  { %1793 = vrcp.f32 %v905_v62  ;;  %1668 = vmatmul.f32.vlgmr.msra.gmra.mxu1 %v572_v22 }
 0xc78   :  { %v228_v48 = vpop.f32.mrf.mxu0 }
 0xc79   :  { %v1794_v63 = vpop.eup %1793  ;;  %v229_v47 = vadd.f32 %v228_v48, %v106_v42 }
 0xc7a   :  { %v1243_v13 = vpop.xlane.xlu1 %1242  ;;  %v910_v29 = vmul.f32 %v1794_v63, %v2485_v53 }
 0xc7b   :  { %v907_v38 = vpop.xlane.xlu0 %906  ;;  %1795 = vrcp.f32 %v1243_v13 }
 0xc7c   :  { %1797 = vrcp.f32 %v907_v38  ;;  %1691 = vmatmul.f32.vlgmr.msrb.gmra.mxu2 %v910_v29 }
 0xc80   :  { %v1581_v17 = vpop.xlane.xlu2 %1580  ;;  %v231_v27 = vpop.f32.mrf.mxu0 }
 0xc81   :  { %v1796_v28 = vpop.eup %1795  ;;  %1799 = vrcp.f32 %v1581_v17  ;;  %v232_v54 = vadd.f32 %v231_v27, %v106_v42 }
 0xc82   :  { %v1798_v31 = vpop.eup %1797  ;;  %v1245_v15 = vpop.xlane.xlu1 %1244  ;;  %v1248_v50 = vmul.f32 %v1796_v28, %v2505_v3 }
 0xc83   :  { %v569_v61 = vpop.xlane.xlu0 %568  ;;  %1801 = vrcp.f32 %v1245_v15  ;;  %v911_v18 = vmul.f32 %v1798_v31, %v2507_v30 }
 0xc84   :  { %1803 = vrcp.f32 %v569_v61  ;;  %1714 = vmatmul.f32.vlgmr.msrb.gmra.mxu3 %v1248_v50 }
 0xc85   :  { %1694 = vmatmul.f32.gmra.mxu2 %v911_v18 }
 0xc87   :  { %v1800_v20 = vpop.eup %1799 }
 0xc88   :  { %v1586_v46 = vmul.f32 %v1800_v20, %v2517_v35 }
 0xc89   :  { %v1802_v53 = vpop.eup %1801 }
 0xc8a   :  { %v1804_v34 = vpop.eup %1803  ;;  %v1583_v51 = vpop.xlane.xlu1 %1582  ;;  %v1249_v4 = vmul.f32 %v1802_v53, %v2519_v44  ;;  %1737 = vmatmul.f32.vlgmr.msra.gmra.mxu0 %v1586_v46 }
 0xc8b   :  { %1805 = vrcp.f32 %v1583_v51  ;;  %v573_v12 = vmul.f32 %v1804_v34, %v2522_v40 }
 0xc8c   :  { %1717 = vmatmul.f32.gmra.mxu3 %v1249_v4 }
 0xc8d   :  { %1671 = vmatmul.f32.gmra.mxu1 %v573_v12 }
 0xc91   :  { %v1806_v3 = vpop.eup %1805 }
 0xc92   :  { %v1587_v30 = vmul.f32 %v1806_v3, %v2526_v37 }
 0xc94   :  { %1740 = vmatmul.f32.gmra.mxu0 %v1587_v30 }
 0xcf0   :  { %v1669_v35 = vpop.f32.mrf.mxu1 }
 0xcf1   :  { %v1670_v32 = vadd.f32 %v1669_v35, %v229_v47 }
 0xcff   :  { %v1692_v56 = vpop.f32.mrf.mxu2 }
 0xd00   :  { %v1693_v2 = vadd.f32 %v1692_v56, %v1670_v32 }
 0xd07   :  { %v1715_v44 = vpop.f32.mrf.mxu3  ;;  %v1738_v10 = vpop.f32.mrf.mxu0 }
 0xd08   :  { %v1716_v33 = vadd.f32 %v1715_v44, %v1693_v2  ;;  %v1695_v37 = vpop.f32.mrf.mxu2 }
 0xd0a   :  { %v1739_v40 = vadd.f32 %v1738_v10, %v1716_v33  ;;  %v1672_v14 = vpop.f32.mrf.mxu1 }
 0xd0b   :  { %v1673_v24 = vadd.f32 %v1672_v14, %v232_v54 }
 0xd0c   :  { %1744 = vst [vmem:[%s2547_s4] sm:$0xff] %v1739_v40 }
 0xd0d   :  { %v1696_v59 = vadd.f32 %v1695_v37, %v1673_v24 }
 0xd0f   :  { %v1718_v9 = vpop.f32.mrf.mxu3 }
 0xd10   :  { %v1719_v41 = vadd.f32 %v1718_v9, %v1696_v59 }
 0xd11   :  { %v1741_v21 = vpop.f32.mrf.mxu0 }
 0xd12   :  { %v1742_v23 = vadd.f32 %v1741_v21, %v1719_v41 }
 0xd14   :  { %1745 = vst [vmem:[%s2547_s4 + $0x8] sm:$0xff] %v1742_v23 }
 0xd15   :  { %1750 = vsyncpa [#allocation3], 1 }
 0xd16   :  { %1751 = vsyncpa [#allocation5], 1 }
 0xd17   :  { %1752 = vsyncpa [#allocation8], 1 }

</bundles_post_ra>
